<compile_context>
chip_gen: v6e
topology: v6e:2x2x1
jax: 0.10.0
libtpu: 0.0.40
codegen_flags: <defaults>
</compile_context>

<pallas_src>
import jax
import jax.numpy as jnp
from jax.experimental import pallas as pl
from jax.experimental.pallas import tpu as pltpu

TIME_BLOCK = 8                      # timesteps per pipelined grid block
VMEM_LIMIT = 48 * 1024 * 1024       # <= v7x headroom; fine on v5e/v6e too


# ---------------------------------------------------------------------------
# Fused kernel: per-block input projection + bidirectional GRU recurrence.
#   lens_ref : (B, 1)        int32  valid lengths (padded rows are 0 -> never update)
#   xf_ref   : (KT*B, E)     bf16   embeddings, forward-time block  (grid i -> block i)
#   xb_ref   : (KT*B, E)     bf16   embeddings, reversed-time block (grid i -> block G-1-i)
#   wih_ref  : (2, E, 3H)    bf16   fused-gate input weights  [r|z|n] per direction
#   whh_ref  : (2, H, 3H)    bf16   fused-gate recurrent weights per direction
#   bproj_ref: (2, 1, 3H)    f32    r: b_ir+b_hr, z: b_iz+b_hz, n: b_in
#   bhn_ref  : (2, 1, H)     f32    hidden bias of the n gate (cannot be folded)
#   out_ref  : (2, B, H)     f32    [h_fwd_final, h_bwd_final]
#   hf/hb    : (B, H) f32 VMEM scratch, carried across grid steps
# ---------------------------------------------------------------------------
def gru_fused_kernel(lens_ref, xf_ref, xb_ref, wih_ref, whh_ref, bproj_ref, bhn_ref,
                     out_ref, hf_ref, hb_ref):
    B, H = hf_ref.shape
    kt = xf_ref.shape[0] // B
    i = pl.program_id(0)
    G = pl.num_programs(0)

    @pl.when(i == 0)
    def _init():
        hf_ref[...] = jnp.zeros_like(hf_ref)
        hb_ref[...] = jnp.zeros_like(hb_ref)

    lens = lens_ref[...]                                   # (B, 1) int32

    # --- hoisted per-invocation invariants (loads + broadcasts done once) ---
    whh_f = whh_ref[0]                                     # (H, 3H) bf16
    whh_b = whh_ref[1]
    bhn_f = jnp.broadcast_to(bhn_ref[0], (B, H))           # (B, H) f32
    bhn_b = jnp.broadcast_to(bhn_ref[1], (B, H))

    # --- fused input projections for the whole time block (hide under the chain) ---
    gx_f = jnp.dot(xf_ref[...], wih_ref[0],
                   preferred_element_type=jnp.float32) + bproj_ref[0]   # (kt*B, 3H) f32
    gx_b = jnp.dot(xb_ref[...], wih_ref[1],
                   preferred_element_type=jnp.float32) + bproj_ref[1]

    def cell(gx, h, whh_d, bhn_d, valid):
        # PyTorch GRU cell; input half (gx) precomputed.  bf16 MXU dot, f32 gate math.
        gh = jnp.dot(h.astype(jnp.bfloat16), whh_d,
                     preferred_element_type=jnp.float32)   # (B, 3H), single vmatmul
        r = jax.nn.sigmoid(gx[:, 0:H] + gh[:, 0:H])
        z = jax.nn.sigmoid(gx[:, H:2 * H] + gh[:, H:2 * H])
        n = jnp.tanh(gx[:, 2 * H:3 * H] + r * (gh[:, 2 * H:3 * H] + bhn_d))
        h_new = (1.0 - z) * n + z * h
        # packed-sequence masking: only advance h on valid steps (t < len)
        return jnp.where(valid, h_new, h)

    h_f = hf_ref[...]
    h_b = hb_ref[...]
    base_f = i * kt                                        # absolute time of fwd row 0
    base_b = (G - 1 - i) * kt                              # absolute time of bwd row 0
    for k in range(kt):                                    # static unroll of the time block
        h_f = cell(gx_f[k * B:(k + 1) * B], h_f, whh_f, bhn_f, (base_f + k) < lens)
        kb = kt - 1 - k                                    # backward walks the block reversed
        h_b = cell(gx_b[kb * B:(kb + 1) * B], h_b, whh_b, bhn_b, (base_b + kb) < lens)
    hf_ref[...] = h_f
    hb_ref[...] = h_b

    @pl.when(i == G - 1)
    def _finalize():
        out_ref[0] = h_f
        out_ref[1] = h_b


# ---------------------------------------------------------------------------
# Wrapper: embedding lookup (glue) + one fused pallas_call.
# ---------------------------------------------------------------------------
@jax.jit
def sentence_encoder_forward(source_padded, source_lengths, params):
    """
    source_padded  : (T, B) int32 word indices (padding_idx = 0)
    source_lengths : (B,)   int32 valid lengths (sorted longest -> shortest)
    returns        : (B, 2*H) float32 = cat(h_n[fwd], h_n[bwd])  (eval-mode dropout)
    """
    emb = params["embedding"]                         # (V, E) bf16
    wih, whh = params["wih"], params["whh"]           # (2,E,3H) / (2,H,3H) bf16
    b_proj, b_hn = params["b_proj"], params["b_hn"]   # (2,1,3H) / (2,1,H) f32

    T, B = source_padded.shape
    E = emb.shape[1]
    H = whh.shape[1]

    kt = TIME_BLOCK
    B_pad = 16 * pl.cdiv(B, 16)                       # bf16 vregs pack (16,128) sublanes
    T_pad = kt * pl.cdiv(T, kt)                       # multiple of the time block
    G = T_pad // kt
    rows_blk = kt * B_pad

    tok = jnp.zeros((T_pad, B_pad), jnp.int32).at[:T, :B].set(source_padded)
    lens = jnp.zeros((B_pad, 1), jnp.int32).at[:B, 0].set(source_lengths.astype(jnp.int32))

    # TODO(synk): embedding gather could be fused into the kernel via scalar prefetch of
    # token ids + per-row DMA from an HBM-resident table; kept as JAX glue here.
    X = emb[tok].reshape(T_pad * B_pad, E)            # (T_pad*B_pad, E) bf16

    out2 = pl.pallas_call(
        gru_fused_kernel,
        grid=(G,),
        in_specs=[
            pl.BlockSpec((B_pad, 1), lambda i: (0, 0)),                 # lengths
            pl.BlockSpec((rows_blk, E), lambda i: (i, 0)),              # X, forward time
            pl.BlockSpec((rows_blk, E), lambda i: (G - 1 - i, 0)),      # X, reversed time
            pl.BlockSpec((2, E, 3 * H), lambda i: (0, 0, 0)),           # W_ih (fused gates)
            pl.BlockSpec((2, H, 3 * H), lambda i: (0, 0, 0)),           # W_hh (fused gates)
            pl.BlockSpec((2, 1, 3 * H), lambda i: (0, 0, 0)),           # folded input bias
            pl.BlockSpec((2, 1, H), lambda i: (0, 0, 0)),               # b_hn
        ],
        out_specs=pl.BlockSpec((2, B_pad, H), lambda i: (0, 0, 0)),
        out_shape=jax.ShapeDtypeStruct((2, B_pad, H), jnp.float32),
        scratch_shapes=[pltpu.VMEM((B_pad, H), jnp.float32),
                        pltpu.VMEM((B_pad, H), jnp.float32)],
        compiler_params=pltpu.CompilerParams(
            dimension_semantics=("arbitrary",), vmem_limit_bytes=VMEM_LIMIT),
    )(lens, X, X, wih, whh, b_proj, b_hn)

    # TODO(synk): nn.Dropout(p=0.3) is stochastic in training; eval-mode identity here.
    return jnp.concatenate([out2[0, :B], out2[1, :B]], axis=1)   # (B, 2H)


# ---------------------------------------------------------------------------
# Pure-JAX reference (same mixed precision / same preprocessed params).
# ---------------------------------------------------------------------------
def reference_forward(source_padded, source_lengths, params):
    emb = params["embedding"]
    wih, whh = params["wih"], params["whh"]
    b_proj, b_hn = params["b_proj"], params["b_hn"]
    T, B = source_padded.shape
    H = whh.shape[1]
    X = emb[source_padded]                            # (T, B, E) bf16
    lens = source_lengths.reshape(B, 1).astype(jnp.int32)

    def cell(x, h, d, valid):
        gx = jnp.dot(x, wih[d], preferred_element_type=jnp.float32) + b_proj[d]
        gh = jnp.dot(h.astype(jnp.bfloat16), whh[d], preferred_element_type=jnp.float32)
        r = jax.nn.sigmoid(gx[:, 0:H] + gh[:, 0:H])
        z = jax.nn.sigmoid(gx[:, H:2 * H] + gh[:, H:2 * H])
        n = jnp.tanh(gx[:, 2 * H:3 * H] + r * (gh[:, 2 * H:3 * H] + b_hn[d]))
        h_new = (1.0 - z) * n + z * h
        return jnp.where(valid, h_new, h)

    h_f = jnp.zeros((B, H), jnp.float32)
    for t in range(T):
        h_f = cell(X[t], h_f, 0, t < lens)
    h_b = jnp.zeros((B, H), jnp.float32)
    for t in range(T - 1, -1, -1):
        h_b = cell(X[t], h_b, 1, t < lens)
    return jnp.concatenate([h_f, h_b], axis=1)


# ---------------------------------------------------------------------------
# Parameter init (PyTorch nn.GRU / nn.Embedding layout) + TPU-friendly packing.
# ---------------------------------------------------------------------------
def init_params(key, vocab_size, word_embed_size, hidden_size):
    E, H, V = word_embed_size, hidden_size, vocab_size
    keys = jax.random.split(key, 9)
    s = 1.0 / jnp.sqrt(jnp.float32(H))
    u = lambda k, shape: jax.random.uniform(k, shape, jnp.float32, -s, s)
    emb = 0.1 * jax.random.normal(keys[0], (V, E), jnp.float32)
    emb = emb.at[0].set(0.0)                          # padding_idx = 0
    return {
        "embedding": emb,
        "w_ih_f": u(keys[1], (3 * H, E)), "w_hh_f": u(keys[2], (3 * H, H)),
        "b_ih_f": u(keys[3], (3 * H,)),   "b_hh_f": u(keys[4], (3 * H,)),
        "w_ih_b": u(keys[5], (3 * H, E)), "w_hh_b": u(keys[6], (3 * H, H)),
        "b_ih_b": u(keys[7], (3 * H,)),   "b_hh_b": u(keys[8], (3 * H,)),
    }


def prepare_params(raw, hidden_size):
    H = hidden_size

    def fold_bias(bi, bh):                            # r,z: b_i+b_h folded ; n: b_i only
        return jnp.concatenate([bi[0:2 * H] + bh[0:2 * H], bi[2 * H:3 * H]]).reshape(1, 3 * H)

    # PyTorch (3H, X) gate order is [r | z | n]; transpose -> (X, 3H) fused-gate layout.
    wih = jnp.stack([raw["w_ih_f"].T, raw["w_ih_b"].T], 0).astype(jnp.bfloat16)   # (2,E,3H)
    whh = jnp.stack([raw["w_hh_f"].T, raw["w_hh_b"].T], 0).astype(jnp.bfloat16)   # (2,H,3H)
    b_proj = jnp.stack([fold_bias(raw["b_ih_f"], raw["b_hh_f"]),
                        fold_bias(raw["b_ih_b"], raw["b_hh_b"])], 0)              # (2,1,3H)
    b_hn = jnp.stack([raw["b_hh_f"][2 * H:3 * H].reshape(1, H),
                      raw["b_hh_b"][2 * H:3 * H].reshape(1, H)], 0)               # (2,1,H)
    return {"embedding": raw["embedding"].astype(jnp.bfloat16),
            "wih": wih, "whh": whh, "b_proj": b_proj, "b_hn": b_hn}


if __name__ == "__main__":
    T, B = 10, 6                # src_len, batch (exercises T- and B-padding)
    E, H, V = 32, 32, 50        # word_embed_size, hidden_size, vocab size

    key = jax.random.PRNGKey(0)
    k_params, k_tokens = jax.random.split(key)

    params = prepare_params(init_params(k_params, V, E, H), H)

    # lengths sorted longest -> shortest (as the module requires)
    source_lengths = jnp.array([10, 9, 7, 5, 3, 2], dtype=jnp.int32)
    tokens = jax.random.randint(k_tokens, (T, B), 1, V, dtype=jnp.int32)
    t_idx = jnp.arange(T)[:, None]
    source_padded = jnp.where(t_idx < source_lengths[None, :], tokens, 0)

    out = sentence_encoder_forward(source_padded, source_lengths, params)
    out = jax.block_until_ready(out)

    ref = reference_forward(source_padded, source_lengths, params)
    assert out.shape == (B, 2 * H)
    assert jnp.allclose(out, ref, atol=1e-3, rtol=1e-3), "mismatch vs reference"

    print("KERNEL_OK")
</pallas_src>

<mosaic_0001>
module attributes {stable_mosaic.version = 11 : i64} {
  func.func @gru_fused_kernel(%arg0: i32, %arg1: memref<16x1xi32, #tpu.memory_space<vmem>>, %arg2: memref<128x32xbf16, #tpu.memory_space<vmem>>, %arg3: memref<128x32xbf16, #tpu.memory_space<vmem>>, %arg4: memref<2x32x96xbf16, #tpu.memory_space<vmem>>, %arg5: memref<2x32x96xbf16, #tpu.memory_space<vmem>>, %arg6: memref<2x1x96xf32, #tpu.memory_space<vmem>>, %arg7: memref<2x1x32xf32, #tpu.memory_space<vmem>>, %arg8: memref<2x16x32xf32, #tpu.memory_space<vmem>>, %arg9: memref<16x32xf32, #tpu.memory_space<vmem>>, %arg10: memref<16x32xf32, #tpu.memory_space<vmem>>) attributes {dimension_semantics = [#tpu.dimension_semantics<arbitrary>], iteration_bounds = array<i64: 2>, scalar_prefetch = 0 : i64, scratch_operands = 2 : i64, tpu.core_type = #tpu.core_type<tc>, window_params = [{pipeline_mode = #tpu.pipeline_mode<synchronous>, transform_indices = @transform_0, window_bounds = array<i64: 16, 1>}, {transform_indices = @transform_1, window_bounds = array<i64: 128, 32>}, {transform_indices = @transform_2, window_bounds = array<i64: 128, 32>}, {pipeline_mode = #tpu.pipeline_mode<synchronous>, transform_indices = @transform_3, window_bounds = array<i64: 2, 32, 96>}, {pipeline_mode = #tpu.pipeline_mode<synchronous>, transform_indices = @transform_4, window_bounds = array<i64: 2, 32, 96>}, {pipeline_mode = #tpu.pipeline_mode<synchronous>, transform_indices = @transform_5, window_bounds = array<i64: 2, 1, 96>}, {pipeline_mode = #tpu.pipeline_mode<synchronous>, transform_indices = @transform_6, window_bounds = array<i64: 2, 1, 32>}, {pipeline_mode = #tpu.pipeline_mode<synchronous>, transform_indices = @transform_7, window_bounds = array<i64: 2, 16, 32>}]} {
    %c0_i32 = arith.constant 0 : i32
    %0 = arith.cmpi eq, %arg0, %c0_i32 : i32
    %1 = arith.extui %0 : i1 to i32
    %c0_i32_0 = arith.constant 0 : i32
    %2 = arith.cmpi ne, %1, %c0_i32_0 : i32
    scf.if %2 {
      %cst_115 = arith.constant 0.000000e+00 : f32
      %618 = vector.broadcast %cst_115 : f32 to vector<16x32xf32>
      %c0_116 = arith.constant 0 : index
      %c0_117 = arith.constant 0 : index
      %619 = vector.load %arg9[%c0_116, %c0_117] : memref<16x32xf32, #tpu.memory_space<vmem>>, vector<16x32xf32>
      tpu.vector_store %arg9[%c0_116, %c0_117], %618 {strides = array<i32>} : memref<16x32xf32, #tpu.memory_space<vmem>>, vector<16x32xf32>,
      %cst_118 = arith.constant 0.000000e+00 : f32
      %620 = vector.broadcast %cst_118 : f32 to vector<16x32xf32>
      %c0_119 = arith.constant 0 : index
      %c0_120 = arith.constant 0 : index
      %621 = vector.load %arg10[%c0_119, %c0_120] : memref<16x32xf32, #tpu.memory_space<vmem>>, vector<16x32xf32>
      tpu.vector_store %arg10[%c0_119, %c0_120], %620 {strides = array<i32>} : memref<16x32xf32, #tpu.memory_space<vmem>>, vector<16x32xf32>,
    } else {
    }
    %c0 = arith.constant 0 : index
    %c0_1 = arith.constant 0 : index
    %3 = vector.load %arg1[%c0, %c0_1] : memref<16x1xi32, #tpu.memory_space<vmem>>, vector<16x1xi32>
    %c0_2 = arith.constant 0 : index
    %c0_3 = arith.constant 0 : index
    %c0_4 = arith.constant 0 : index
    %4 = vector.load %arg5[%c0_2, %c0_3, %c0_4] : memref<2x32x96xbf16, #tpu.memory_space<vmem>>, vector<1x32x96xbf16>
    %5 = vector.shape_cast %4 : vector<1x32x96xbf16> to vector<32x96xbf16>
    %c1 = arith.constant 1 : index
    %c0_5 = arith.constant 0 : index
    %c0_6 = arith.constant 0 : index
    %6 = vector.load %arg5[%c1, %c0_5, %c0_6] : memref<2x32x96xbf16, #tpu.memory_space<vmem>>, vector<1x32x96xbf16>
    %7 = vector.shape_cast %6 : vector<1x32x96xbf16> to vector<32x96xbf16>
    %c0_7 = arith.constant 0 : index
    %c0_8 = arith.constant 0 : index
    %c0_9 = arith.constant 0 : index
    %8 = vector.load %arg7[%c0_7, %c0_8, %c0_9] : memref<2x1x32xf32, #tpu.memory_space<vmem>>, vector<1x1x32xf32>
    %9 = vector.shape_cast %8 : vector<1x1x32xf32> to vector<1x32xf32>
    %10 = vector.shape_cast %9 : vector<1x32xf32> to vector<1x32xf32>
    %11 = vector.broadcast %10 : vector<1x32xf32> to vector<16x32xf32>
    %c1_10 = arith.constant 1 : index
    %c0_11 = arith.constant 0 : index
    %c0_12 = arith.constant 0 : index
    %12 = vector.load %arg7[%c1_10, %c0_11, %c0_12] : memref<2x1x32xf32, #tpu.memory_space<vmem>>, vector<1x1x32xf32>
    %13 = vector.shape_cast %12 : vector<1x1x32xf32> to vector<1x32xf32>
    %14 = vector.shape_cast %13 : vector<1x32xf32> to vector<1x32xf32>
    %15 = vector.broadcast %14 : vector<1x32xf32> to vector<16x32xf32>
    %c0_13 = arith.constant 0 : index
    %c0_14 = arith.constant 0 : index
    %16 = vector.load %arg2[%c0_13, %c0_14] : memref<128x32xbf16, #tpu.memory_space<vmem>>, vector<128x32xbf16>
    %c0_15 = arith.constant 0 : index
    %c0_16 = arith.constant 0 : index
    %c0_17 = arith.constant 0 : index
    %17 = vector.load %arg4[%c0_15, %c0_16, %c0_17] : memref<2x32x96xbf16, #tpu.memory_space<vmem>>, vector<1x32x96xbf16>
    %18 = vector.shape_cast %17 : vector<1x32x96xbf16> to vector<32x96xbf16>
    %cst = arith.constant dense<0.000000e+00> : vector<128x96xf32>
    %19 = tpu.matmul %16, %18, %cst {dimension_numbers = #tpu.dot_dimension_numbers<[1], [0], [0], [1], [0, 0, 1, 1], [], []>} : vector<128x32xbf16>, vector<32x96xbf16>, vector<128x96xf32> -> vector<128x96xf32>
    %c0_18 = arith.constant 0 : index
    %c0_19 = arith.constant 0 : index
    %c0_20 = arith.constant 0 : index
    %20 = vector.load %arg6[%c0_18, %c0_19, %c0_20] : memref<2x1x96xf32, #tpu.memory_space<vmem>>, vector<1x1x96xf32>
    %21 = vector.shape_cast %20 : vector<1x1x96xf32> to vector<1x96xf32>
    %22 = vector.broadcast %21 : vector<1x96xf32> to vector<128x96xf32>
    %23 = arith.addf %19, %22 : vector<128x96xf32>
    %c0_21 = arith.constant 0 : index
    %c0_22 = arith.constant 0 : index
    %24 = vector.load %arg3[%c0_21, %c0_22] : memref<128x32xbf16, #tpu.memory_space<vmem>>, vector<128x32xbf16>
    %c1_23 = arith.constant 1 : index
    %c0_24 = arith.constant 0 : index
    %c0_25 = arith.constant 0 : index
    %25 = vector.load %arg4[%c1_23, %c0_24, %c0_25] : memref<2x32x96xbf16, #tpu.memory_space<vmem>>, vector<1x32x96xbf16>
    %26 = vector.shape_cast %25 : vector<1x32x96xbf16> to vector<32x96xbf16>
    %cst_26 = arith.constant dense<0.000000e+00> : vector<128x96xf32>
    %27 = tpu.matmul %24, %26, %cst_26 {dimension_numbers = #tpu.dot_dimension_numbers<[1], [0], [0], [1], [0, 0, 1, 1], [], []>} : vector<128x32xbf16>, vector<32x96xbf16>, vector<128x96xf32> -> vector<128x96xf32>
    %c1_27 = arith.constant 1 : index
    %c0_28 = arith.constant 0 : index
    %c0_29 = arith.constant 0 : index
    %28 = vector.load %arg6[%c1_27, %c0_28, %c0_29] : memref<2x1x96xf32, #tpu.memory_space<vmem>>, vector<1x1x96xf32>
    %29 = vector.shape_cast %28 : vector<1x1x96xf32> to vector<1x96xf32>
    %30 = vector.broadcast %29 : vector<1x96xf32> to vector<128x96xf32>
    %31 = arith.addf %27, %30 : vector<128x96xf32>
    %c0_30 = arith.constant 0 : index
    %c0_31 = arith.constant 0 : index
    %32 = vector.load %arg9[%c0_30, %c0_31] : memref<16x32xf32, #tpu.memory_space<vmem>>, vector<16x32xf32>
    %c0_32 = arith.constant 0 : index
    %c0_33 = arith.constant 0 : index
    %33 = vector.load %arg10[%c0_32, %c0_33] : memref<16x32xf32, #tpu.memory_space<vmem>>, vector<16x32xf32>
    %c8_i32 = arith.constant 8 : i32
    %34 = arith.muli %arg0, %c8_i32 : i32
    %c1_i32 = arith.constant 1 : i32
    %35 = arith.subi %c1_i32, %arg0 : i32
    %c8_i32_34 = arith.constant 8 : i32
    %36 = arith.muli %35, %c8_i32_34 : i32
    %37 = vector.extract_strided_slice %23 {offsets = [0, 0], sizes = [16, 96], strides = [1, 1]} : vector<128x96xf32> to vector<16x96xf32>
    %c0_i32_35 = arith.constant 0 : i32
    %38 = arith.addi %34, %c0_i32_35 : i32
    %39 = vector.broadcast %38 : i32 to vector<16x1xi32>
    %40 = arith.cmpi slt, %39, %3 : vector<16x1xi32>
    %41 = arith.truncf %32 : vector<16x32xf32> to vector<16x32xbf16>
    %cst_36 = arith.constant dense<0.000000e+00> : vector<16x96xf32>
    %42 = tpu.matmul %41, %5, %cst_36 {dimension_numbers = #tpu.dot_dimension_numbers<[1], [0], [0], [1], [0, 0, 1, 1], [], []>} : vector<16x32xbf16>, vector<32x96xbf16>, vector<16x96xf32> -> vector<16x96xf32>
    %43 = vector.extract_strided_slice %37 {offsets = [0, 0], sizes = [16, 32], strides = [1, 1]} : vector<16x96xf32> to vector<16x32xf32>
    %44 = vector.extract_strided_slice %42 {offsets = [0, 0], sizes = [16, 32], strides = [1, 1]} : vector<16x96xf32> to vector<16x32xf32>
    %45 = arith.addf %43, %44 : vector<16x32xf32>
    %46 = arith.negf %45 : vector<16x32xf32>
    %47 = math.exp %46 : vector<16x32xf32>
    %cst_37 = arith.constant 1.000000e+00 : f32
    %48 = vector.broadcast %cst_37 : f32 to vector<16x32xf32>
    %49 = arith.addf %48, %47 : vector<16x32xf32>
    %50 = arith.divf %48, %49 : vector<16x32xf32>
    %51 = vector.extract_strided_slice %37 {offsets = [0, 32], sizes = [16, 32], strides = [1, 1]} : vector<16x96xf32> to vector<16x32xf32>
    %52 = vector.extract_strided_slice %42 {offsets = [0, 32], sizes = [16, 32], strides = [1, 1]} : vector<16x96xf32> to vector<16x32xf32>
    %53 = arith.addf %51, %52 : vector<16x32xf32>
    %54 = arith.negf %53 : vector<16x32xf32>
    %55 = math.exp %54 : vector<16x32xf32>
    %cst_38 = arith.constant 1.000000e+00 : f32
    %56 = vector.broadcast %cst_38 : f32 to vector<16x32xf32>
    %57 = arith.addf %56, %55 : vector<16x32xf32>
    %58 = arith.divf %56, %57 : vector<16x32xf32>
    %59 = vector.extract_strided_slice %37 {offsets = [0, 64], sizes = [16, 32], strides = [1, 1]} : vector<16x96xf32> to vector<16x32xf32>
    %60 = vector.extract_strided_slice %42 {offsets = [0, 64], sizes = [16, 32], strides = [1, 1]} : vector<16x96xf32> to vector<16x32xf32>
    %61 = arith.addf %60, %11 : vector<16x32xf32>
    %62 = arith.mulf %50, %61 : vector<16x32xf32>
    %63 = arith.addf %59, %62 : vector<16x32xf32>
    %64 = math.tanh %63 : vector<16x32xf32>
    %cst_39 = arith.constant 1.000000e+00 : f32
    %65 = vector.broadcast %cst_39 : f32 to vector<16x32xf32>
    %66 = arith.subf %65, %58 : vector<16x32xf32>
    %67 = arith.mulf %66, %64 : vector<16x32xf32>
    %68 = arith.mulf %58, %32 : vector<16x32xf32>
    %69 = arith.addf %67, %68 : vector<16x32xf32>
    %70 = vector.shape_cast %40 : vector<16x1xi1> to vector<16x1xi1>
    %71 = vector.broadcast %70 : vector<16x1xi1> to vector<16x32xi1>
    %72 = arith.select %71, %69, %32 : vector<16x32xi1>, vector<16x32xf32>
    %73 = vector.extract_strided_slice %31 {offsets = [112, 0], sizes = [16, 96], strides = [1, 1]} : vector<128x96xf32> to vector<16x96xf32>
    %c7_i32 = arith.constant 7 : i32
    %74 = arith.addi %36, %c7_i32 : i32
    %75 = vector.broadcast %74 : i32 to vector<16x1xi32>
    %76 = arith.cmpi slt, %75, %3 : vector<16x1xi32>
    %77 = arith.truncf %33 : vector<16x32xf32> to vector<16x32xbf16>
    %cst_40 = arith.constant dense<0.000000e+00> : vector<16x96xf32>
    %78 = tpu.matmul %77, %7, %cst_40 {dimension_numbers = #tpu.dot_dimension_numbers<[1], [0], [0], [1], [0, 0, 1, 1], [], []>} : vector<16x32xbf16>, vector<32x96xbf16>, vector<16x96xf32> -> vector<16x96xf32>
    %79 = vector.extract_strided_slice %73 {offsets = [0, 0], sizes = [16, 32], strides = [1, 1]} : vector<16x96xf32> to vector<16x32xf32>
    %80 = vector.extract_strided_slice %78 {offsets = [0, 0], sizes = [16, 32], strides = [1, 1]} : vector<16x96xf32> to vector<16x32xf32>
    %81 = arith.addf %79, %80 : vector<16x32xf32>
    %82 = arith.negf %81 : vector<16x32xf32>
    %83 = math.exp %82 : vector<16x32xf32>
    %cst_41 = arith.constant 1.000000e+00 : f32
    %84 = vector.broadcast %cst_41 : f32 to vector<16x32xf32>
    %85 = arith.addf %84, %83 : vector<16x32xf32>
    %86 = arith.divf %84, %85 : vector<16x32xf32>
    %87 = vector.extract_strided_slice %73 {offsets = [0, 32], sizes = [16, 32], strides = [1, 1]} : vector<16x96xf32> to vector<16x32xf32>
    %88 = vector.extract_strided_slice %78 {offsets = [0, 32], sizes = [16, 32], strides = [1, 1]} : vector<16x96xf32> to vector<16x32xf32>
    %89 = arith.addf %87, %88 : vector<16x32xf32>
    %90 = arith.negf %89 : vector<16x32xf32>
    %91 = math.exp %90 : vector<16x32xf32>
    %cst_42 = arith.constant 1.000000e+00 : f32
    %92 = vector.broadcast %cst_42 : f32 to vector<16x32xf32>
    %93 = arith.addf %92, %91 : vector<16x32xf32>
    %94 = arith.divf %92, %93 : vector<16x32xf32>
    %95 = vector.extract_strided_slice %73 {offsets = [0, 64], sizes = [16, 32], strides = [1, 1]} : vector<16x96xf32> to vector<16x32xf32>
    %96 = vector.extract_strided_slice %78 {offsets = [0, 64], sizes = [16, 32], strides = [1, 1]} : vector<16x96xf32> to vector<16x32xf32>
    %97 = arith.addf %96, %15 : vector<16x32xf32>
    %98 = arith.mulf %86, %97 : vector<16x32xf32>
    %99 = arith.addf %95, %98 : vector<16x32xf32>
    %100 = math.tanh %99 : vector<16x32xf32>
    %cst_43 = arith.constant 1.000000e+00 : f32
    %101 = vector.broadcast %cst_43 : f32 to vector<16x32xf32>
    %102 = arith.subf %101, %94 : vector<16x32xf32>
    %103 = arith.mulf %102, %100 : vector<16x32xf32>
    %104 = arith.mulf %94, %33 : vector<16x32xf32>
    %105 = arith.addf %103, %104 : vector<16x32xf32>
    %106 = vector.shape_cast %76 : vector<16x1xi1> to vector<16x1xi1>
    %107 = vector.broadcast %106 : vector<16x1xi1> to vector<16x32xi1>
    %108 = arith.select %107, %105, %33 : vector<16x32xi1>, vector<16x32xf32>
    %109 = vector.extract_strided_slice %23 {offsets = [16, 0], sizes = [16, 96], strides = [1, 1]} : vector<128x96xf32> to vector<16x96xf32>
    %c1_i32_44 = arith.constant 1 : i32
    %110 = arith.addi %34, %c1_i32_44 : i32
    %111 = vector.broadcast %110 : i32 to vector<16x1xi32>
    %112 = arith.cmpi slt, %111, %3 : vector<16x1xi32>
    %113 = arith.truncf %72 : vector<16x32xf32> to vector<16x32xbf16>
    %cst_45 = arith.constant dense<0.000000e+00> : vector<16x96xf32>
    %114 = tpu.matmul %113, %5, %cst_45 {dimension_numbers = #tpu.dot_dimension_numbers<[1], [0], [0], [1], [0, 0, 1, 1], [], []>} : vector<16x32xbf16>, vector<32x96xbf16>, vector<16x96xf32> -> vector<16x96xf32>
    %115 = vector.extract_strided_slice %109 {offsets = [0, 0], sizes = [16, 32], strides = [1, 1]} : vector<16x96xf32> to vector<16x32xf32>
    %116 = vector.extract_strided_slice %114 {offsets = [0, 0], sizes = [16, 32], strides = [1, 1]} : vector<16x96xf32> to vector<16x32xf32>
    %117 = arith.addf %115, %116 : vector<16x32xf32>
    %118 = arith.negf %117 : vector<16x32xf32>
    %119 = math.exp %118 : vector<16x32xf32>
    %cst_46 = arith.constant 1.000000e+00 : f32
    %120 = vector.broadcast %cst_46 : f32 to vector<16x32xf32>
    %121 = arith.addf %120, %119 : vector<16x32xf32>
    %122 = arith.divf %120, %121 : vector<16x32xf32>
    %123 = vector.extract_strided_slice %109 {offsets = [0, 32], sizes = [16, 32], strides = [1, 1]} : vector<16x96xf32> to vector<16x32xf32>
    %124 = vector.extract_strided_slice %114 {offsets = [0, 32], sizes = [16, 32], strides = [1, 1]} : vector<16x96xf32> to vector<16x32xf32>
    %125 = arith.addf %123, %124 : vector<16x32xf32>
    %126 = arith.negf %125 : vector<16x32xf32>
    %127 = math.exp %126 : vector<16x32xf32>
    %cst_47 = arith.constant 1.000000e+00 : f32
    %128 = vector.broadcast %cst_47 : f32 to vector<16x32xf32>
    %129 = arith.addf %128, %127 : vector<16x32xf32>
    %130 = arith.divf %128, %129 : vector<16x32xf32>
    %131 = vector.extract_strided_slice %109 {offsets = [0, 64], sizes = [16, 32], strides = [1, 1]} : vector<16x96xf32> to vector<16x32xf32>
    %132 = vector.extract_strided_slice %114 {offsets = [0, 64], sizes = [16, 32], strides = [1, 1]} : vector<16x96xf32> to vector<16x32xf32>
    %133 = arith.addf %132, %11 : vector<16x32xf32>
    %134 = arith.mulf %122, %133 : vector<16x32xf32>
    %135 = arith.addf %131, %134 : vector<16x32xf32>
    %136 = math.tanh %135 : vector<16x32xf32>
    %cst_48 = arith.constant 1.000000e+00 : f32
    %137 = vector.broadcast %cst_48 : f32 to vector<16x32xf32>
    %138 = arith.subf %137, %130 : vector<16x32xf32>
    %139 = arith.mulf %138, %136 : vector<16x32xf32>
    %140 = arith.mulf %130, %72 : vector<16x32xf32>
    %141 = arith.addf %139, %140 : vector<16x32xf32>
    %142 = vector.shape_cast %112 : vector<16x1xi1> to vector<16x1xi1>
    %143 = vector.broadcast %142 : vector<16x1xi1> to vector<16x32xi1>
    %144 = arith.select %143, %141, %72 : vector<16x32xi1>, vector<16x32xf32>
    %145 = vector.extract_strided_slice %31 {offsets = [96, 0], sizes = [16, 96], strides = [1, 1]} : vector<128x96xf32> to vector<16x96xf32>
    %c6_i32 = arith.constant 6 : i32
    %146 = arith.addi %36, %c6_i32 : i32
    %147 = vector.broadcast %146 : i32 to vector<16x1xi32>
    %148 = arith.cmpi slt, %147, %3 : vector<16x1xi32>
    %149 = arith.truncf %108 : vector<16x32xf32> to vector<16x32xbf16>
    %cst_49 = arith.constant dense<0.000000e+00> : vector<16x96xf32>
    %150 = tpu.matmul %149, %7, %cst_49 {dimension_numbers = #tpu.dot_dimension_numbers<[1], [0], [0], [1], [0, 0, 1, 1], [], []>} : vector<16x32xbf16>, vector<32x96xbf16>, vector<16x96xf32> -> vector<16x96xf32>
    %151 = vector.extract_strided_slice %145 {offsets = [0, 0], sizes = [16, 32], strides = [1, 1]} : vector<16x96xf32> to vector<16x32xf32>
    %152 = vector.extract_strided_slice %150 {offsets = [0, 0], sizes = [16, 32], strides = [1, 1]} : vector<16x96xf32> to vector<16x32xf32>
    %153 = arith.addf %151, %152 : vector<16x32xf32>
    %154 = arith.negf %153 : vector<16x32xf32>
    %155 = math.exp %154 : vector<16x32xf32>
    %cst_50 = arith.constant 1.000000e+00 : f32
    %156 = vector.broadcast %cst_50 : f32 to vector<16x32xf32>
    %157 = arith.addf %156, %155 : vector<16x32xf32>
    %158 = arith.divf %156, %157 : vector<16x32xf32>
    %159 = vector.extract_strided_slice %145 {offsets = [0, 32], sizes = [16, 32], strides = [1, 1]} : vector<16x96xf32> to vector<16x32xf32>
    %160 = vector.extract_strided_slice %150 {offsets = [0, 32], sizes = [16, 32], strides = [1, 1]} : vector<16x96xf32> to vector<16x32xf32>
    %161 = arith.addf %159, %160 : vector<16x32xf32>
    %162 = arith.negf %161 : vector<16x32xf32>
    %163 = math.exp %162 : vector<16x32xf32>
    %cst_51 = arith.constant 1.000000e+00 : f32
    %164 = vector.broadcast %cst_51 : f32 to vector<16x32xf32>
    %165 = arith.addf %164, %163 : vector<16x32xf32>
    %166 = arith.divf %164, %165 : vector<16x32xf32>
    %167 = vector.extract_strided_slice %145 {offsets = [0, 64], sizes = [16, 32], strides = [1, 1]} : vector<16x96xf32> to vector<16x32xf32>
    %168 = vector.extract_strided_slice %150 {offsets = [0, 64], sizes = [16, 32], strides = [1, 1]} : vector<16x96xf32> to vector<16x32xf32>
    %169 = arith.addf %168, %15 : vector<16x32xf32>
    %170 = arith.mulf %158, %169 : vector<16x32xf32>
    %171 = arith.addf %167, %170 : vector<16x32xf32>
    %172 = math.tanh %171 : vector<16x32xf32>
    %cst_52 = arith.constant 1.000000e+00 : f32
    %173 = vector.broadcast %cst_52 : f32 to vector<16x32xf32>
    %174 = arith.subf %173, %166 : vector<16x32xf32>
    %175 = arith.mulf %174, %172 : vector<16x32xf32>
    %176 = arith.mulf %166, %108 : vector<16x32xf32>
    %177 = arith.addf %175, %176 : vector<16x32xf32>
    %178 = vector.shape_cast %148 : vector<16x1xi1> to vector<16x1xi1>
    %179 = vector.broadcast %178 : vector<16x1xi1> to vector<16x32xi1>
    %180 = arith.select %179, %177, %108 : vector<16x32xi1>, vector<16x32xf32>
    %181 = vector.extract_strided_slice %23 {offsets = [32, 0], sizes = [16, 96], strides = [1, 1]} : vector<128x96xf32> to vector<16x96xf32>
    %c2_i32 = arith.constant 2 : i32
    %182 = arith.addi %34, %c2_i32 : i32
    %183 = vector.broadcast %182 : i32 to vector<16x1xi32>
    %184 = arith.cmpi slt, %183, %3 : vector<16x1xi32>
    %185 = arith.truncf %144 : vector<16x32xf32> to vector<16x32xbf16>
    %cst_53 = arith.constant dense<0.000000e+00> : vector<16x96xf32>
    %186 = tpu.matmul %185, %5, %cst_53 {dimension_numbers = #tpu.dot_dimension_numbers<[1], [0], [0], [1], [0, 0, 1, 1], [], []>} : vector<16x32xbf16>, vector<32x96xbf16>, vector<16x96xf32> -> vector<16x96xf32>
    %187 = vector.extract_strided_slice %181 {offsets = [0, 0], sizes = [16, 32], strides = [1, 1]} : vector<16x96xf32> to vector<16x32xf32>
    %188 = vector.extract_strided_slice %186 {offsets = [0, 0], sizes = [16, 32], strides = [1, 1]} : vector<16x96xf32> to vector<16x32xf32>
    %189 = arith.addf %187, %188 : vector<16x32xf32>
    %190 = arith.negf %189 : vector<16x32xf32>
    %191 = math.exp %190 : vector<16x32xf32>
    %cst_54 = arith.constant 1.000000e+00 : f32
    %192 = vector.broadcast %cst_54 : f32 to vector<16x32xf32>
    %193 = arith.addf %192, %191 : vector<16x32xf32>
    %194 = arith.divf %192, %193 : vector<16x32xf32>
    %195 = vector.extract_strided_slice %181 {offsets = [0, 32], sizes = [16, 32], strides = [1, 1]} : vector<16x96xf32> to vector<16x32xf32>
    %196 = vector.extract_strided_slice %186 {offsets = [0, 32], sizes = [16, 32], strides = [1, 1]} : vector<16x96xf32> to vector<16x32xf32>
    %197 = arith.addf %195, %196 : vector<16x32xf32>
    %198 = arith.negf %197 : vector<16x32xf32>
    %199 = math.exp %198 : vector<16x32xf32>
    %cst_55 = arith.constant 1.000000e+00 : f32
    %200 = vector.broadcast %cst_55 : f32 to vector<16x32xf32>
    %201 = arith.addf %200, %199 : vector<16x32xf32>
    %202 = arith.divf %200, %201 : vector<16x32xf32>
    %203 = vector.extract_strided_slice %181 {offsets = [0, 64], sizes = [16, 32], strides = [1, 1]} : vector<16x96xf32> to vector<16x32xf32>
    %204 = vector.extract_strided_slice %186 {offsets = [0, 64], sizes = [16, 32], strides = [1, 1]} : vector<16x96xf32> to vector<16x32xf32>
    %205 = arith.addf %204, %11 : vector<16x32xf32>
    %206 = arith.mulf %194, %205 : vector<16x32xf32>
    %207 = arith.addf %203, %206 : vector<16x32xf32>
    %208 = math.tanh %207 : vector<16x32xf32>
    %cst_56 = arith.constant 1.000000e+00 : f32
    %209 = vector.broadcast %cst_56 : f32 to vector<16x32xf32>
    %210 = arith.subf %209, %202 : vector<16x32xf32>
    %211 = arith.mulf %210, %208 : vector<16x32xf32>
    %212 = arith.mulf %202, %144 : vector<16x32xf32>
    %213 = arith.addf %211, %212 : vector<16x32xf32>
    %214 = vector.shape_cast %184 : vector<16x1xi1> to vector<16x1xi1>
    %215 = vector.broadcast %214 : vector<16x1xi1> to vector<16x32xi1>
    %216 = arith.select %215, %213, %144 : vector<16x32xi1>, vector<16x32xf32>
    %217 = vector.extract_strided_slice %31 {offsets = [80, 0], sizes = [16, 96], strides = [1, 1]} : vector<128x96xf32> to vector<16x96xf32>
    %c5_i32 = arith.constant 5 : i32
    %218 = arith.addi %36, %c5_i32 : i32
    %219 = vector.broadcast %218 : i32 to vector<16x1xi32>
    %220 = arith.cmpi slt, %219, %3 : vector<16x1xi32>
    %221 = arith.truncf %180 : vector<16x32xf32> to vector<16x32xbf16>
    %cst_57 = arith.constant dense<0.000000e+00> : vector<16x96xf32>
    %222 = tpu.matmul %221, %7, %cst_57 {dimension_numbers = #tpu.dot_dimension_numbers<[1], [0], [0], [1], [0, 0, 1, 1], [], []>} : vector<16x32xbf16>, vector<32x96xbf16>, vector<16x96xf32> -> vector<16x96xf32>
    %223 = vector.extract_strided_slice %217 {offsets = [0, 0], sizes = [16, 32], strides = [1, 1]} : vector<16x96xf32> to vector<16x32xf32>
    %224 = vector.extract_strided_slice %222 {offsets = [0, 0], sizes = [16, 32], strides = [1, 1]} : vector<16x96xf32> to vector<16x32xf32>
    %225 = arith.addf %223, %224 : vector<16x32xf32>
    %226 = arith.negf %225 : vector<16x32xf32>
    %227 = math.exp %226 : vector<16x32xf32>
    %cst_58 = arith.constant 1.000000e+00 : f32
    %228 = vector.broadcast %cst_58 : f32 to vector<16x32xf32>
    %229 = arith.addf %228, %227 : vector<16x32xf32>
    %230 = arith.divf %228, %229 : vector<16x32xf32>
    %231 = vector.extract_strided_slice %217 {offsets = [0, 32], sizes = [16, 32], strides = [1, 1]} : vector<16x96xf32> to vector<16x32xf32>
    %232 = vector.extract_strided_slice %222 {offsets = [0, 32], sizes = [16, 32], strides = [1, 1]} : vector<16x96xf32> to vector<16x32xf32>
    %233 = arith.addf %231, %232 : vector<16x32xf32>
    %234 = arith.negf %233 : vector<16x32xf32>
    %235 = math.exp %234 : vector<16x32xf32>
    %cst_59 = arith.constant 1.000000e+00 : f32
    %236 = vector.broadcast %cst_59 : f32 to vector<16x32xf32>
    %237 = arith.addf %236, %235 : vector<16x32xf32>
    %238 = arith.divf %236, %237 : vector<16x32xf32>
    %239 = vector.extract_strided_slice %217 {offsets = [0, 64], sizes = [16, 32], strides = [1, 1]} : vector<16x96xf32> to vector<16x32xf32>
    %240 = vector.extract_strided_slice %222 {offsets = [0, 64], sizes = [16, 32], strides = [1, 1]} : vector<16x96xf32> to vector<16x32xf32>
    %241 = arith.addf %240, %15 : vector<16x32xf32>
    %242 = arith.mulf %230, %241 : vector<16x32xf32>
    %243 = arith.addf %239, %242 : vector<16x32xf32>
    %244 = math.tanh %243 : vector<16x32xf32>
    %cst_60 = arith.constant 1.000000e+00 : f32
    %245 = vector.broadcast %cst_60 : f32 to vector<16x32xf32>
    %246 = arith.subf %245, %238 : vector<16x32xf32>
    %247 = arith.mulf %246, %244 : vector<16x32xf32>
    %248 = arith.mulf %238, %180 : vector<16x32xf32>
    %249 = arith.addf %247, %248 : vector<16x32xf32>
    %250 = vector.shape_cast %220 : vector<16x1xi1> to vector<16x1xi1>
    %251 = vector.broadcast %250 : vector<16x1xi1> to vector<16x32xi1>
    %252 = arith.select %251, %249, %180 : vector<16x32xi1>, vector<16x32xf32>
    %253 = vector.extract_strided_slice %23 {offsets = [48, 0], sizes = [16, 96], strides = [1, 1]} : vector<128x96xf32> to vector<16x96xf32>
    %c3_i32 = arith.constant 3 : i32
    %254 = arith.addi %34, %c3_i32 : i32
    %255 = vector.broadcast %254 : i32 to vector<16x1xi32>
    %256 = arith.cmpi slt, %255, %3 : vector<16x1xi32>
    %257 = arith.truncf %216 : vector<16x32xf32> to vector<16x32xbf16>
    %cst_61 = arith.constant dense<0.000000e+00> : vector<16x96xf32>
    %258 = tpu.matmul %257, %5, %cst_61 {dimension_numbers = #tpu.dot_dimension_numbers<[1], [0], [0], [1], [0, 0, 1, 1], [], []>} : vector<16x32xbf16>, vector<32x96xbf16>, vector<16x96xf32> -> vector<16x96xf32>
    %259 = vector.extract_strided_slice %253 {offsets = [0, 0], sizes = [16, 32], strides = [1, 1]} : vector<16x96xf32> to vector<16x32xf32>
    %260 = vector.extract_strided_slice %258 {offsets = [0, 0], sizes = [16, 32], strides = [1, 1]} : vector<16x96xf32> to vector<16x32xf32>
    %261 = arith.addf %259, %260 : vector<16x32xf32>
    %262 = arith.negf %261 : vector<16x32xf32>
    %263 = math.exp %262 : vector<16x32xf32>
    %cst_62 = arith.constant 1.000000e+00 : f32
    %264 = vector.broadcast %cst_62 : f32 to vector<16x32xf32>
    %265 = arith.addf %264, %263 : vector<16x32xf32>
    %266 = arith.divf %264, %265 : vector<16x32xf32>
    %267 = vector.extract_strided_slice %253 {offsets = [0, 32], sizes = [16, 32], strides = [1, 1]} : vector<16x96xf32> to vector<16x32xf32>
    %268 = vector.extract_strided_slice %258 {offsets = [0, 32], sizes = [16, 32], strides = [1, 1]} : vector<16x96xf32> to vector<16x32xf32>
    %269 = arith.addf %267, %268 : vector<16x32xf32>
    %270 = arith.negf %269 : vector<16x32xf32>
    %271 = math.exp %270 : vector<16x32xf32>
    %cst_63 = arith.constant 1.000000e+00 : f32
    %272 = vector.broadcast %cst_63 : f32 to vector<16x32xf32>
    %273 = arith.addf %272, %271 : vector<16x32xf32>
    %274 = arith.divf %272, %273 : vector<16x32xf32>
    %275 = vector.extract_strided_slice %253 {offsets = [0, 64], sizes = [16, 32], strides = [1, 1]} : vector<16x96xf32> to vector<16x32xf32>
    %276 = vector.extract_strided_slice %258 {offsets = [0, 64], sizes = [16, 32], strides = [1, 1]} : vector<16x96xf32> to vector<16x32xf32>
    %277 = arith.addf %276, %11 : vector<16x32xf32>
    %278 = arith.mulf %266, %277 : vector<16x32xf32>
    %279 = arith.addf %275, %278 : vector<16x32xf32>
    %280 = math.tanh %279 : vector<16x32xf32>
    %cst_64 = arith.constant 1.000000e+00 : f32
    %281 = vector.broadcast %cst_64 : f32 to vector<16x32xf32>
    %282 = arith.subf %281, %274 : vector<16x32xf32>
    %283 = arith.mulf %282, %280 : vector<16x32xf32>
    %284 = arith.mulf %274, %216 : vector<16x32xf32>
    %285 = arith.addf %283, %284 : vector<16x32xf32>
    %286 = vector.shape_cast %256 : vector<16x1xi1> to vector<16x1xi1>
    %287 = vector.broadcast %286 : vector<16x1xi1> to vector<16x32xi1>
    %288 = arith.select %287, %285, %216 : vector<16x32xi1>, vector<16x32xf32>
    %289 = vector.extract_strided_slice %31 {offsets = [64, 0], sizes = [16, 96], strides = [1, 1]} : vector<128x96xf32> to vector<16x96xf32>
    %c4_i32 = arith.constant 4 : i32
    %290 = arith.addi %36, %c4_i32 : i32
    %291 = vector.broadcast %290 : i32 to vector<16x1xi32>
    %292 = arith.cmpi slt, %291, %3 : vector<16x1xi32>
    %293 = arith.truncf %252 : vector<16x32xf32> to vector<16x32xbf16>
    %cst_65 = arith.constant dense<0.000000e+00> : vector<16x96xf32>
    %294 = tpu.matmul %293, %7, %cst_65 {dimension_numbers = #tpu.dot_dimension_numbers<[1], [0], [0], [1], [0, 0, 1, 1], [], []>} : vector<16x32xbf16>, vector<32x96xbf16>, vector<16x96xf32> -> vector<16x96xf32>
    %295 = vector.extract_strided_slice %289 {offsets = [0, 0], sizes = [16, 32], strides = [1, 1]} : vector<16x96xf32> to vector<16x32xf32>
    %296 = vector.extract_strided_slice %294 {offsets = [0, 0], sizes = [16, 32], strides = [1, 1]} : vector<16x96xf32> to vector<16x32xf32>
    %297 = arith.addf %295, %296 : vector<16x32xf32>
    %298 = arith.negf %297 : vector<16x32xf32>
    %299 = math.exp %298 : vector<16x32xf32>
    %cst_66 = arith.constant 1.000000e+00 : f32
    %300 = vector.broadcast %cst_66 : f32 to vector<16x32xf32>
    %301 = arith.addf %300, %299 : vector<16x32xf32>
    %302 = arith.divf %300, %301 : vector<16x32xf32>
    %303 = vector.extract_strided_slice %289 {offsets = [0, 32], sizes = [16, 32], strides = [1, 1]} : vector<16x96xf32> to vector<16x32xf32>
    %304 = vector.extract_strided_slice %294 {offsets = [0, 32], sizes = [16, 32], strides = [1, 1]} : vector<16x96xf32> to vector<16x32xf32>
    %305 = arith.addf %303, %304 : vector<16x32xf32>
    %306 = arith.negf %305 : vector<16x32xf32>
    %307 = math.exp %306 : vector<16x32xf32>
    %cst_67 = arith.constant 1.000000e+00 : f32
    %308 = vector.broadcast %cst_67 : f32 to vector<16x32xf32>
    %309 = arith.addf %308, %307 : vector<16x32xf32>
    %310 = arith.divf %308, %309 : vector<16x32xf32>
    %311 = vector.extract_strided_slice %289 {offsets = [0, 64], sizes = [16, 32], strides = [1, 1]} : vector<16x96xf32> to vector<16x32xf32>
    %312 = vector.extract_strided_slice %294 {offsets = [0, 64], sizes = [16, 32], strides = [1, 1]} : vector<16x96xf32> to vector<16x32xf32>
    %313 = arith.addf %312, %15 : vector<16x32xf32>
    %314 = arith.mulf %302, %313 : vector<16x32xf32>
    %315 = arith.addf %311, %314 : vector<16x32xf32>
    %316 = math.tanh %315 : vector<16x32xf32>
    %cst_68 = arith.constant 1.000000e+00 : f32
    %317 = vector.broadcast %cst_68 : f32 to vector<16x32xf32>
    %318 = arith.subf %317, %310 : vector<16x32xf32>
    %319 = arith.mulf %318, %316 : vector<16x32xf32>
    %320 = arith.mulf %310, %252 : vector<16x32xf32>
    %321 = arith.addf %319, %320 : vector<16x32xf32>
    %322 = vector.shape_cast %292 : vector<16x1xi1> to vector<16x1xi1>
    %323 = vector.broadcast %322 : vector<16x1xi1> to vector<16x32xi1>
    %324 = arith.select %323, %321, %252 : vector<16x32xi1>, vector<16x32xf32>
    %325 = vector.extract_strided_slice %23 {offsets = [64, 0], sizes = [16, 96], strides = [1, 1]} : vector<128x96xf32> to vector<16x96xf32>
    %c4_i32_69 = arith.constant 4 : i32
    %326 = arith.addi %34, %c4_i32_69 : i32
    %327 = vector.broadcast %326 : i32 to vector<16x1xi32>
    %328 = arith.cmpi slt, %327, %3 : vector<16x1xi32>
    %329 = arith.truncf %288 : vector<16x32xf32> to vector<16x32xbf16>
    %cst_70 = arith.constant dense<0.000000e+00> : vector<16x96xf32>
    %330 = tpu.matmul %329, %5, %cst_70 {dimension_numbers = #tpu.dot_dimension_numbers<[1], [0], [0], [1], [0, 0, 1, 1], [], []>} : vector<16x32xbf16>, vector<32x96xbf16>, vector<16x96xf32> -> vector<16x96xf32>
    %331 = vector.extract_strided_slice %325 {offsets = [0, 0], sizes = [16, 32], strides = [1, 1]} : vector<16x96xf32> to vector<16x32xf32>
    %332 = vector.extract_strided_slice %330 {offsets = [0, 0], sizes = [16, 32], strides = [1, 1]} : vector<16x96xf32> to vector<16x32xf32>
    %333 = arith.addf %331, %332 : vector<16x32xf32>
    %334 = arith.negf %333 : vector<16x32xf32>
    %335 = math.exp %334 : vector<16x32xf32>
    %cst_71 = arith.constant 1.000000e+00 : f32
    %336 = vector.broadcast %cst_71 : f32 to vector<16x32xf32>
    %337 = arith.addf %336, %335 : vector<16x32xf32>
    %338 = arith.divf %336, %337 : vector<16x32xf32>
    %339 = vector.extract_strided_slice %325 {offsets = [0, 32], sizes = [16, 32], strides = [1, 1]} : vector<16x96xf32> to vector<16x32xf32>
    %340 = vector.extract_strided_slice %330 {offsets = [0, 32], sizes = [16, 32], strides = [1, 1]} : vector<16x96xf32> to vector<16x32xf32>
    %341 = arith.addf %339, %340 : vector<16x32xf32>
    %342 = arith.negf %341 : vector<16x32xf32>
    %343 = math.exp %342 : vector<16x32xf32>
    %cst_72 = arith.constant 1.000000e+00 : f32
    %344 = vector.broadcast %cst_72 : f32 to vector<16x32xf32>
    %345 = arith.addf %344, %343 : vector<16x32xf32>
    %346 = arith.divf %344, %345 : vector<16x32xf32>
    %347 = vector.extract_strided_slice %325 {offsets = [0, 64], sizes = [16, 32], strides = [1, 1]} : vector<16x96xf32> to vector<16x32xf32>
    %348 = vector.extract_strided_slice %330 {offsets = [0, 64], sizes = [16, 32], strides = [1, 1]} : vector<16x96xf32> to vector<16x32xf32>
    %349 = arith.addf %348, %11 : vector<16x32xf32>
    %350 = arith.mulf %338, %349 : vector<16x32xf32>
    %351 = arith.addf %347, %350 : vector<16x32xf32>
    %352 = math.tanh %351 : vector<16x32xf32>
    %cst_73 = arith.constant 1.000000e+00 : f32
    %353 = vector.broadcast %cst_73 : f32 to vector<16x32xf32>
    %354 = arith.subf %353, %346 : vector<16x32xf32>
    %355 = arith.mulf %354, %352 : vector<16x32xf32>
    %356 = arith.mulf %346, %288 : vector<16x32xf32>
    %357 = arith.addf %355, %356 : vector<16x32xf32>
    %358 = vector.shape_cast %328 : vector<16x1xi1> to vector<16x1xi1>
    %359 = vector.broadcast %358 : vector<16x1xi1> to vector<16x32xi1>
    %360 = arith.select %359, %357, %288 : vector<16x32xi1>, vector<16x32xf32>
    %361 = vector.extract_strided_slice %31 {offsets = [48, 0], sizes = [16, 96], strides = [1, 1]} : vector<128x96xf32> to vector<16x96xf32>
    %c3_i32_74 = arith.constant 3 : i32
    %362 = arith.addi %36, %c3_i32_74 : i32
    %363 = vector.broadcast %362 : i32 to vector<16x1xi32>
    %364 = arith.cmpi slt, %363, %3 : vector<16x1xi32>
    %365 = arith.truncf %324 : vector<16x32xf32> to vector<16x32xbf16>
    %cst_75 = arith.constant dense<0.000000e+00> : vector<16x96xf32>
    %366 = tpu.matmul %365, %7, %cst_75 {dimension_numbers = #tpu.dot_dimension_numbers<[1], [0], [0], [1], [0, 0, 1, 1], [], []>} : vector<16x32xbf16>, vector<32x96xbf16>, vector<16x96xf32> -> vector<16x96xf32>
    %367 = vector.extract_strided_slice %361 {offsets = [0, 0], sizes = [16, 32], strides = [1, 1]} : vector<16x96xf32> to vector<16x32xf32>
    %368 = vector.extract_strided_slice %366 {offsets = [0, 0], sizes = [16, 32], strides = [1, 1]} : vector<16x96xf32> to vector<16x32xf32>
    %369 = arith.addf %367, %368 : vector<16x32xf32>
    %370 = arith.negf %369 : vector<16x32xf32>
    %371 = math.exp %370 : vector<16x32xf32>
    %cst_76 = arith.constant 1.000000e+00 : f32
    %372 = vector.broadcast %cst_76 : f32 to vector<16x32xf32>
    %373 = arith.addf %372, %371 : vector<16x32xf32>
    %374 = arith.divf %372, %373 : vector<16x32xf32>
    %375 = vector.extract_strided_slice %361 {offsets = [0, 32], sizes = [16, 32], strides = [1, 1]} : vector<16x96xf32> to vector<16x32xf32>
    %376 = vector.extract_strided_slice %366 {offsets = [0, 32], sizes = [16, 32], strides = [1, 1]} : vector<16x96xf32> to vector<16x32xf32>
    %377 = arith.addf %375, %376 : vector<16x32xf32>
    %378 = arith.negf %377 : vector<16x32xf32>
    %379 = math.exp %378 : vector<16x32xf32>
    %cst_77 = arith.constant 1.000000e+00 : f32
    %380 = vector.broadcast %cst_77 : f32 to vector<16x32xf32>
    %381 = arith.addf %380, %379 : vector<16x32xf32>
    %382 = arith.divf %380, %381 : vector<16x32xf32>
    %383 = vector.extract_strided_slice %361 {offsets = [0, 64], sizes = [16, 32], strides = [1, 1]} : vector<16x96xf32> to vector<16x32xf32>
    %384 = vector.extract_strided_slice %366 {offsets = [0, 64], sizes = [16, 32], strides = [1, 1]} : vector<16x96xf32> to vector<16x32xf32>
    %385 = arith.addf %384, %15 : vector<16x32xf32>
    %386 = arith.mulf %374, %385 : vector<16x32xf32>
    %387 = arith.addf %383, %386 : vector<16x32xf32>
    %388 = math.tanh %387 : vector<16x32xf32>
    %cst_78 = arith.constant 1.000000e+00 : f32
    %389 = vector.broadcast %cst_78 : f32 to vector<16x32xf32>
    %390 = arith.subf %389, %382 : vector<16x32xf32>
    %391 = arith.mulf %390, %388 : vector<16x32xf32>
    %392 = arith.mulf %382, %324 : vector<16x32xf32>
    %393 = arith.addf %391, %392 : vector<16x32xf32>
    %394 = vector.shape_cast %364 : vector<16x1xi1> to vector<16x1xi1>
    %395 = vector.broadcast %394 : vector<16x1xi1> to vector<16x32xi1>
    %396 = arith.select %395, %393, %324 : vector<16x32xi1>, vector<16x32xf32>
    %397 = vector.extract_strided_slice %23 {offsets = [80, 0], sizes = [16, 96], strides = [1, 1]} : vector<128x96xf32> to vector<16x96xf32>
    %c5_i32_79 = arith.constant 5 : i32
    %398 = arith.addi %34, %c5_i32_79 : i32
    %399 = vector.broadcast %398 : i32 to vector<16x1xi32>
    %400 = arith.cmpi slt, %399, %3 : vector<16x1xi32>
    %401 = arith.truncf %360 : vector<16x32xf32> to vector<16x32xbf16>
    %cst_80 = arith.constant dense<0.000000e+00> : vector<16x96xf32>
    %402 = tpu.matmul %401, %5, %cst_80 {dimension_numbers = #tpu.dot_dimension_numbers<[1], [0], [0], [1], [0, 0, 1, 1], [], []>} : vector<16x32xbf16>, vector<32x96xbf16>, vector<16x96xf32> -> vector<16x96xf32>
    %403 = vector.extract_strided_slice %397 {offsets = [0, 0], sizes = [16, 32], strides = [1, 1]} : vector<16x96xf32> to vector<16x32xf32>
    %404 = vector.extract_strided_slice %402 {offsets = [0, 0], sizes = [16, 32], strides = [1, 1]} : vector<16x96xf32> to vector<16x32xf32>
    %405 = arith.addf %403, %404 : vector<16x32xf32>
    %406 = arith.negf %405 : vector<16x32xf32>
    %407 = math.exp %406 : vector<16x32xf32>
    %cst_81 = arith.constant 1.000000e+00 : f32
    %408 = vector.broadcast %cst_81 : f32 to vector<16x32xf32>
    %409 = arith.addf %408, %407 : vector<16x32xf32>
    %410 = arith.divf %408, %409 : vector<16x32xf32>
    %411 = vector.extract_strided_slice %397 {offsets = [0, 32], sizes = [16, 32], strides = [1, 1]} : vector<16x96xf32> to vector<16x32xf32>
    %412 = vector.extract_strided_slice %402 {offsets = [0, 32], sizes = [16, 32], strides = [1, 1]} : vector<16x96xf32> to vector<16x32xf32>
    %413 = arith.addf %411, %412 : vector<16x32xf32>
    %414 = arith.negf %413 : vector<16x32xf32>
    %415 = math.exp %414 : vector<16x32xf32>
    %cst_82 = arith.constant 1.000000e+00 : f32
    %416 = vector.broadcast %cst_82 : f32 to vector<16x32xf32>
    %417 = arith.addf %416, %415 : vector<16x32xf32>
    %418 = arith.divf %416, %417 : vector<16x32xf32>
    %419 = vector.extract_strided_slice %397 {offsets = [0, 64], sizes = [16, 32], strides = [1, 1]} : vector<16x96xf32> to vector<16x32xf32>
    %420 = vector.extract_strided_slice %402 {offsets = [0, 64], sizes = [16, 32], strides = [1, 1]} : vector<16x96xf32> to vector<16x32xf32>
    %421 = arith.addf %420, %11 : vector<16x32xf32>
    %422 = arith.mulf %410, %421 : vector<16x32xf32>
    %423 = arith.addf %419, %422 : vector<16x32xf32>
    %424 = math.tanh %423 : vector<16x32xf32>
    %cst_83 = arith.constant 1.000000e+00 : f32
    %425 = vector.broadcast %cst_83 : f32 to vector<16x32xf32>
    %426 = arith.subf %425, %418 : vector<16x32xf32>
    %427 = arith.mulf %426, %424 : vector<16x32xf32>
    %428 = arith.mulf %418, %360 : vector<16x32xf32>
    %429 = arith.addf %427, %428 : vector<16x32xf32>
    %430 = vector.shape_cast %400 : vector<16x1xi1> to vector<16x1xi1>
    %431 = vector.broadcast %430 : vector<16x1xi1> to vector<16x32xi1>
    %432 = arith.select %431, %429, %360 : vector<16x32xi1>, vector<16x32xf32>
    %433 = vector.extract_strided_slice %31 {offsets = [32, 0], sizes = [16, 96], strides = [1, 1]} : vector<128x96xf32> to vector<16x96xf32>
    %c2_i32_84 = arith.constant 2 : i32
    %434 = arith.addi %36, %c2_i32_84 : i32
    %435 = vector.broadcast %434 : i32 to vector<16x1xi32>
    %436 = arith.cmpi slt, %435, %3 : vector<16x1xi32>
    %437 = arith.truncf %396 : vector<16x32xf32> to vector<16x32xbf16>
    %cst_85 = arith.constant dense<0.000000e+00> : vector<16x96xf32>
    %438 = tpu.matmul %437, %7, %cst_85 {dimension_numbers = #tpu.dot_dimension_numbers<[1], [0], [0], [1], [0, 0, 1, 1], [], []>} : vector<16x32xbf16>, vector<32x96xbf16>, vector<16x96xf32> -> vector<16x96xf32>
    %439 = vector.extract_strided_slice %433 {offsets = [0, 0], sizes = [16, 32], strides = [1, 1]} : vector<16x96xf32> to vector<16x32xf32>
    %440 = vector.extract_strided_slice %438 {offsets = [0, 0], sizes = [16, 32], strides = [1, 1]} : vector<16x96xf32> to vector<16x32xf32>
    %441 = arith.addf %439, %440 : vector<16x32xf32>
    %442 = arith.negf %441 : vector<16x32xf32>
    %443 = math.exp %442 : vector<16x32xf32>
    %cst_86 = arith.constant 1.000000e+00 : f32
    %444 = vector.broadcast %cst_86 : f32 to vector<16x32xf32>
    %445 = arith.addf %444, %443 : vector<16x32xf32>
    %446 = arith.divf %444, %445 : vector<16x32xf32>
    %447 = vector.extract_strided_slice %433 {offsets = [0, 32], sizes = [16, 32], strides = [1, 1]} : vector<16x96xf32> to vector<16x32xf32>
    %448 = vector.extract_strided_slice %438 {offsets = [0, 32], sizes = [16, 32], strides = [1, 1]} : vector<16x96xf32> to vector<16x32xf32>
    %449 = arith.addf %447, %448 : vector<16x32xf32>
    %450 = arith.negf %449 : vector<16x32xf32>
    %451 = math.exp %450 : vector<16x32xf32>
    %cst_87 = arith.constant 1.000000e+00 : f32
    %452 = vector.broadcast %cst_87 : f32 to vector<16x32xf32>
    %453 = arith.addf %452, %451 : vector<16x32xf32>
    %454 = arith.divf %452, %453 : vector<16x32xf32>
    %455 = vector.extract_strided_slice %433 {offsets = [0, 64], sizes = [16, 32], strides = [1, 1]} : vector<16x96xf32> to vector<16x32xf32>
    %456 = vector.extract_strided_slice %438 {offsets = [0, 64], sizes = [16, 32], strides = [1, 1]} : vector<16x96xf32> to vector<16x32xf32>
    %457 = arith.addf %456, %15 : vector<16x32xf32>
    %458 = arith.mulf %446, %457 : vector<16x32xf32>
    %459 = arith.addf %455, %458 : vector<16x32xf32>
    %460 = math.tanh %459 : vector<16x32xf32>
    %cst_88 = arith.constant 1.000000e+00 : f32
    %461 = vector.broadcast %cst_88 : f32 to vector<16x32xf32>
    %462 = arith.subf %461, %454 : vector<16x32xf32>
    %463 = arith.mulf %462, %460 : vector<16x32xf32>
    %464 = arith.mulf %454, %396 : vector<16x32xf32>
    %465 = arith.addf %463, %464 : vector<16x32xf32>
    %466 = vector.shape_cast %436 : vector<16x1xi1> to vector<16x1xi1>
    %467 = vector.broadcast %466 : vector<16x1xi1> to vector<16x32xi1>
    %468 = arith.select %467, %465, %396 : vector<16x32xi1>, vector<16x32xf32>
    %469 = vector.extract_strided_slice %23 {offsets = [96, 0], sizes = [16, 96], strides = [1, 1]} : vector<128x96xf32> to vector<16x96xf32>
    %c6_i32_89 = arith.constant 6 : i32
    %470 = arith.addi %34, %c6_i32_89 : i32
    %471 = vector.broadcast %470 : i32 to vector<16x1xi32>
    %472 = arith.cmpi slt, %471, %3 : vector<16x1xi32>
    %473 = arith.truncf %432 : vector<16x32xf32> to vector<16x32xbf16>
    %cst_90 = arith.constant dense<0.000000e+00> : vector<16x96xf32>
    %474 = tpu.matmul %473, %5, %cst_90 {dimension_numbers = #tpu.dot_dimension_numbers<[1], [0], [0], [1], [0, 0, 1, 1], [], []>} : vector<16x32xbf16>, vector<32x96xbf16>, vector<16x96xf32> -> vector<16x96xf32>
    %475 = vector.extract_strided_slice %469 {offsets = [0, 0], sizes = [16, 32], strides = [1, 1]} : vector<16x96xf32> to vector<16x32xf32>
    %476 = vector.extract_strided_slice %474 {offsets = [0, 0], sizes = [16, 32], strides = [1, 1]} : vector<16x96xf32> to vector<16x32xf32>
    %477 = arith.addf %475, %476 : vector<16x32xf32>
    %478 = arith.negf %477 : vector<16x32xf32>
    %479 = math.exp %478 : vector<16x32xf32>
    %cst_91 = arith.constant 1.000000e+00 : f32
    %480 = vector.broadcast %cst_91 : f32 to vector<16x32xf32>
    %481 = arith.addf %480, %479 : vector<16x32xf32>
    %482 = arith.divf %480, %481 : vector<16x32xf32>
    %483 = vector.extract_strided_slice %469 {offsets = [0, 32], sizes = [16, 32], strides = [1, 1]} : vector<16x96xf32> to vector<16x32xf32>
    %484 = vector.extract_strided_slice %474 {offsets = [0, 32], sizes = [16, 32], strides = [1, 1]} : vector<16x96xf32> to vector<16x32xf32>
    %485 = arith.addf %483, %484 : vector<16x32xf32>
    %486 = arith.negf %485 : vector<16x32xf32>
    %487 = math.exp %486 : vector<16x32xf32>
    %cst_92 = arith.constant 1.000000e+00 : f32
    %488 = vector.broadcast %cst_92 : f32 to vector<16x32xf32>
    %489 = arith.addf %488, %487 : vector<16x32xf32>
    %490 = arith.divf %488, %489 : vector<16x32xf32>
    %491 = vector.extract_strided_slice %469 {offsets = [0, 64], sizes = [16, 32], strides = [1, 1]} : vector<16x96xf32> to vector<16x32xf32>
    %492 = vector.extract_strided_slice %474 {offsets = [0, 64], sizes = [16, 32], strides = [1, 1]} : vector<16x96xf32> to vector<16x32xf32>
    %493 = arith.addf %492, %11 : vector<16x32xf32>
    %494 = arith.mulf %482, %493 : vector<16x32xf32>
    %495 = arith.addf %491, %494 : vector<16x32xf32>
    %496 = math.tanh %495 : vector<16x32xf32>
    %cst_93 = arith.constant 1.000000e+00 : f32
    %497 = vector.broadcast %cst_93 : f32 to vector<16x32xf32>
    %498 = arith.subf %497, %490 : vector<16x32xf32>
    %499 = arith.mulf %498, %496 : vector<16x32xf32>
    %500 = arith.mulf %490, %432 : vector<16x32xf32>
    %501 = arith.addf %499, %500 : vector<16x32xf32>
    %502 = vector.shape_cast %472 : vector<16x1xi1> to vector<16x1xi1>
    %503 = vector.broadcast %502 : vector<16x1xi1> to vector<16x32xi1>
    %504 = arith.select %503, %501, %432 : vector<16x32xi1>, vector<16x32xf32>
    %505 = vector.extract_strided_slice %31 {offsets = [16, 0], sizes = [16, 96], strides = [1, 1]} : vector<128x96xf32> to vector<16x96xf32>
    %c1_i32_94 = arith.constant 1 : i32
    %506 = arith.addi %36, %c1_i32_94 : i32
    %507 = vector.broadcast %506 : i32 to vector<16x1xi32>
    %508 = arith.cmpi slt, %507, %3 : vector<16x1xi32>
    %509 = arith.truncf %468 : vector<16x32xf32> to vector<16x32xbf16>
    %cst_95 = arith.constant dense<0.000000e+00> : vector<16x96xf32>
    %510 = tpu.matmul %509, %7, %cst_95 {dimension_numbers = #tpu.dot_dimension_numbers<[1], [0], [0], [1], [0, 0, 1, 1], [], []>} : vector<16x32xbf16>, vector<32x96xbf16>, vector<16x96xf32> -> vector<16x96xf32>
    %511 = vector.extract_strided_slice %505 {offsets = [0, 0], sizes = [16, 32], strides = [1, 1]} : vector<16x96xf32> to vector<16x32xf32>
    %512 = vector.extract_strided_slice %510 {offsets = [0, 0], sizes = [16, 32], strides = [1, 1]} : vector<16x96xf32> to vector<16x32xf32>
    %513 = arith.addf %511, %512 : vector<16x32xf32>
    %514 = arith.negf %513 : vector<16x32xf32>
    %515 = math.exp %514 : vector<16x32xf32>
    %cst_96 = arith.constant 1.000000e+00 : f32
    %516 = vector.broadcast %cst_96 : f32 to vector<16x32xf32>
    %517 = arith.addf %516, %515 : vector<16x32xf32>
    %518 = arith.divf %516, %517 : vector<16x32xf32>
    %519 = vector.extract_strided_slice %505 {offsets = [0, 32], sizes = [16, 32], strides = [1, 1]} : vector<16x96xf32> to vector<16x32xf32>
    %520 = vector.extract_strided_slice %510 {offsets = [0, 32], sizes = [16, 32], strides = [1, 1]} : vector<16x96xf32> to vector<16x32xf32>
    %521 = arith.addf %519, %520 : vector<16x32xf32>
    %522 = arith.negf %521 : vector<16x32xf32>
    %523 = math.exp %522 : vector<16x32xf32>
    %cst_97 = arith.constant 1.000000e+00 : f32
    %524 = vector.broadcast %cst_97 : f32 to vector<16x32xf32>
    %525 = arith.addf %524, %523 : vector<16x32xf32>
    %526 = arith.divf %524, %525 : vector<16x32xf32>
    %527 = vector.extract_strided_slice %505 {offsets = [0, 64], sizes = [16, 32], strides = [1, 1]} : vector<16x96xf32> to vector<16x32xf32>
    %528 = vector.extract_strided_slice %510 {offsets = [0, 64], sizes = [16, 32], strides = [1, 1]} : vector<16x96xf32> to vector<16x32xf32>
    %529 = arith.addf %528, %15 : vector<16x32xf32>
    %530 = arith.mulf %518, %529 : vector<16x32xf32>
    %531 = arith.addf %527, %530 : vector<16x32xf32>
    %532 = math.tanh %531 : vector<16x32xf32>
    %cst_98 = arith.constant 1.000000e+00 : f32
    %533 = vector.broadcast %cst_98 : f32 to vector<16x32xf32>
    %534 = arith.subf %533, %526 : vector<16x32xf32>
    %535 = arith.mulf %534, %532 : vector<16x32xf32>
    %536 = arith.mulf %526, %468 : vector<16x32xf32>
    %537 = arith.addf %535, %536 : vector<16x32xf32>
    %538 = vector.shape_cast %508 : vector<16x1xi1> to vector<16x1xi1>
    %539 = vector.broadcast %538 : vector<16x1xi1> to vector<16x32xi1>
    %540 = arith.select %539, %537, %468 : vector<16x32xi1>, vector<16x32xf32>
    %541 = vector.extract_strided_slice %23 {offsets = [112, 0], sizes = [16, 96], strides = [1, 1]} : vector<128x96xf32> to vector<16x96xf32>
    %c7_i32_99 = arith.constant 7 : i32
    %542 = arith.addi %34, %c7_i32_99 : i32
    %543 = vector.broadcast %542 : i32 to vector<16x1xi32>
    %544 = arith.cmpi slt, %543, %3 : vector<16x1xi32>
    %545 = arith.truncf %504 : vector<16x32xf32> to vector<16x32xbf16>
    %cst_100 = arith.constant dense<0.000000e+00> : vector<16x96xf32>
    %546 = tpu.matmul %545, %5, %cst_100 {dimension_numbers = #tpu.dot_dimension_numbers<[1], [0], [0], [1], [0, 0, 1, 1], [], []>} : vector<16x32xbf16>, vector<32x96xbf16>, vector<16x96xf32> -> vector<16x96xf32>
    %547 = vector.extract_strided_slice %541 {offsets = [0, 0], sizes = [16, 32], strides = [1, 1]} : vector<16x96xf32> to vector<16x32xf32>
    %548 = vector.extract_strided_slice %546 {offsets = [0, 0], sizes = [16, 32], strides = [1, 1]} : vector<16x96xf32> to vector<16x32xf32>
    %549 = arith.addf %547, %548 : vector<16x32xf32>
    %550 = arith.negf %549 : vector<16x32xf32>
    %551 = math.exp %550 : vector<16x32xf32>
    %cst_101 = arith.constant 1.000000e+00 : f32
    %552 = vector.broadcast %cst_101 : f32 to vector<16x32xf32>
    %553 = arith.addf %552, %551 : vector<16x32xf32>
    %554 = arith.divf %552, %553 : vector<16x32xf32>
    %555 = vector.extract_strided_slice %541 {offsets = [0, 32], sizes = [16, 32], strides = [1, 1]} : vector<16x96xf32> to vector<16x32xf32>
    %556 = vector.extract_strided_slice %546 {offsets = [0, 32], sizes = [16, 32], strides = [1, 1]} : vector<16x96xf32> to vector<16x32xf32>
    %557 = arith.addf %555, %556 : vector<16x32xf32>
    %558 = arith.negf %557 : vector<16x32xf32>
    %559 = math.exp %558 : vector<16x32xf32>
    %cst_102 = arith.constant 1.000000e+00 : f32
    %560 = vector.broadcast %cst_102 : f32 to vector<16x32xf32>
    %561 = arith.addf %560, %559 : vector<16x32xf32>
    %562 = arith.divf %560, %561 : vector<16x32xf32>
    %563 = vector.extract_strided_slice %541 {offsets = [0, 64], sizes = [16, 32], strides = [1, 1]} : vector<16x96xf32> to vector<16x32xf32>
    %564 = vector.extract_strided_slice %546 {offsets = [0, 64], sizes = [16, 32], strides = [1, 1]} : vector<16x96xf32> to vector<16x32xf32>
    %565 = arith.addf %564, %11 : vector<16x32xf32>
    %566 = arith.mulf %554, %565 : vector<16x32xf32>
    %567 = arith.addf %563, %566 : vector<16x32xf32>
    %568 = math.tanh %567 : vector<16x32xf32>
    %cst_103 = arith.constant 1.000000e+00 : f32
    %569 = vector.broadcast %cst_103 : f32 to vector<16x32xf32>
    %570 = arith.subf %569, %562 : vector<16x32xf32>
    %571 = arith.mulf %570, %568 : vector<16x32xf32>
    %572 = arith.mulf %562, %504 : vector<16x32xf32>
    %573 = arith.addf %571, %572 : vector<16x32xf32>
    %574 = vector.shape_cast %544 : vector<16x1xi1> to vector<16x1xi1>
    %575 = vector.broadcast %574 : vector<16x1xi1> to vector<16x32xi1>
    %576 = arith.select %575, %573, %504 : vector<16x32xi1>, vector<16x32xf32>
    %577 = vector.extract_strided_slice %31 {offsets = [0, 0], sizes = [16, 96], strides = [1, 1]} : vector<128x96xf32> to vector<16x96xf32>
    %c0_i32_104 = arith.constant 0 : i32
    %578 = arith.addi %36, %c0_i32_104 : i32
    %579 = vector.broadcast %578 : i32 to vector<16x1xi32>
    %580 = arith.cmpi slt, %579, %3 : vector<16x1xi32>
    %581 = arith.truncf %540 : vector<16x32xf32> to vector<16x32xbf16>
    %cst_105 = arith.constant dense<0.000000e+00> : vector<16x96xf32>
    %582 = tpu.matmul %581, %7, %cst_105 {dimension_numbers = #tpu.dot_dimension_numbers<[1], [0], [0], [1], [0, 0, 1, 1], [], []>} : vector<16x32xbf16>, vector<32x96xbf16>, vector<16x96xf32> -> vector<16x96xf32>
    %583 = vector.extract_strided_slice %577 {offsets = [0, 0], sizes = [16, 32], strides = [1, 1]} : vector<16x96xf32> to vector<16x32xf32>
    %584 = vector.extract_strided_slice %582 {offsets = [0, 0], sizes = [16, 32], strides = [1, 1]} : vector<16x96xf32> to vector<16x32xf32>
    %585 = arith.addf %583, %584 : vector<16x32xf32>
    %586 = arith.negf %585 : vector<16x32xf32>
    %587 = math.exp %586 : vector<16x32xf32>
    %cst_106 = arith.constant 1.000000e+00 : f32
    %588 = vector.broadcast %cst_106 : f32 to vector<16x32xf32>
    %589 = arith.addf %588, %587 : vector<16x32xf32>
    %590 = arith.divf %588, %589 : vector<16x32xf32>
    %591 = vector.extract_strided_slice %577 {offsets = [0, 32], sizes = [16, 32], strides = [1, 1]} : vector<16x96xf32> to vector<16x32xf32>
    %592 = vector.extract_strided_slice %582 {offsets = [0, 32], sizes = [16, 32], strides = [1, 1]} : vector<16x96xf32> to vector<16x32xf32>
    %593 = arith.addf %591, %592 : vector<16x32xf32>
    %594 = arith.negf %593 : vector<16x32xf32>
    %595 = math.exp %594 : vector<16x32xf32>
    %cst_107 = arith.constant 1.000000e+00 : f32
    %596 = vector.broadcast %cst_107 : f32 to vector<16x32xf32>
    %597 = arith.addf %596, %595 : vector<16x32xf32>
    %598 = arith.divf %596, %597 : vector<16x32xf32>
    %599 = vector.extract_strided_slice %577 {offsets = [0, 64], sizes = [16, 32], strides = [1, 1]} : vector<16x96xf32> to vector<16x32xf32>
    %600 = vector.extract_strided_slice %582 {offsets = [0, 64], sizes = [16, 32], strides = [1, 1]} : vector<16x96xf32> to vector<16x32xf32>
    %601 = arith.addf %600, %15 : vector<16x32xf32>
    %602 = arith.mulf %590, %601 : vector<16x32xf32>
    %603 = arith.addf %599, %602 : vector<16x32xf32>
    %604 = math.tanh %603 : vector<16x32xf32>
    %cst_108 = arith.constant 1.000000e+00 : f32
    %605 = vector.broadcast %cst_108 : f32 to vector<16x32xf32>
    %606 = arith.subf %605, %598 : vector<16x32xf32>
    %607 = arith.mulf %606, %604 : vector<16x32xf32>
    %608 = arith.mulf %598, %540 : vector<16x32xf32>
    %609 = arith.addf %607, %608 : vector<16x32xf32>
    %610 = vector.shape_cast %580 : vector<16x1xi1> to vector<16x1xi1>
    %611 = vector.broadcast %610 : vector<16x1xi1> to vector<16x32xi1>
    %612 = arith.select %611, %609, %540 : vector<16x32xi1>, vector<16x32xf32>
    %c0_109 = arith.constant 0 : index
    %c0_110 = arith.constant 0 : index
    %613 = vector.load %arg9[%c0_109, %c0_110] : memref<16x32xf32, #tpu.memory_space<vmem>>, vector<16x32xf32>
    tpu.vector_store %arg9[%c0_109, %c0_110], %576 {strides = array<i32>} : memref<16x32xf32, #tpu.memory_space<vmem>>, vector<16x32xf32>,
    %c0_111 = arith.constant 0 : index
    %c0_112 = arith.constant 0 : index
    %614 = vector.load %arg10[%c0_111, %c0_112] : memref<16x32xf32, #tpu.memory_space<vmem>>, vector<16x32xf32>
    tpu.vector_store %arg10[%c0_111, %c0_112], %612 {strides = array<i32>} : memref<16x32xf32, #tpu.memory_space<vmem>>, vector<16x32xf32>,
    %c1_i32_113 = arith.constant 1 : i32
    %615 = arith.cmpi eq, %arg0, %c1_i32_113 : i32
    %616 = arith.extui %615 : i1 to i32
    %c0_i32_114 = arith.constant 0 : i32
    %617 = arith.cmpi ne, %616, %c0_i32_114 : i32
    scf.if %617 {
      %c0_115 = arith.constant 0 : index
      %c0_116 = arith.constant 0 : index
      %c0_117 = arith.constant 0 : index
      %618 = vector.load %arg8[%c0_115, %c0_116, %c0_117] : memref<2x16x32xf32, #tpu.memory_space<vmem>>, vector<1x16x32xf32>
      %619 = vector.shape_cast %618 : vector<1x16x32xf32> to vector<16x32xf32>
      %620 = vector.shape_cast %576 : vector<16x32xf32> to vector<1x16x32xf32>
      tpu.vector_store %arg8[%c0_115, %c0_116, %c0_117], %620 {strides = array<i32>} : memref<2x16x32xf32, #tpu.memory_space<vmem>>, vector<1x16x32xf32>,
      %c1_118 = arith.constant 1 : index
      %c0_119 = arith.constant 0 : index
      %c0_120 = arith.constant 0 : index
      %621 = vector.load %arg8[%c1_118, %c0_119, %c0_120] : memref<2x16x32xf32, #tpu.memory_space<vmem>>, vector<1x16x32xf32>
      %622 = vector.shape_cast %621 : vector<1x16x32xf32> to vector<16x32xf32>
      %623 = vector.shape_cast %612 : vector<16x32xf32> to vector<1x16x32xf32>
      tpu.vector_store %arg8[%c1_118, %c0_119, %c0_120], %623 {strides = array<i32>} : memref<2x16x32xf32, #tpu.memory_space<vmem>>, vector<1x16x32xf32>,
    } else {
    }
    return
  }
  func.func @transform_0(%arg0: i32) -> (i32, i32) {
    %c0_i32 = arith.constant 0 : i32
    %c0_i32_0 = arith.constant 0 : i32
    %c0_i32_1 = arith.constant 0 : i32
    return %c0_i32, %c0_i32_0 : i32, i32
  }
  func.func @transform_1(%arg0: i32) -> (i32, i32) {
    %c0_i32 = arith.constant 0 : i32
    %c0_i32_0 = arith.constant 0 : i32
    return %arg0, %c0_i32 : i32, i32
  }
  func.func @transform_2(%arg0: i32) -> (i32, i32) {
    %c1_i32 = arith.constant 1 : i32
    %0 = arith.subi %c1_i32, %arg0 : i32
    %c0_i32 = arith.constant 0 : i32
    %c0_i32_0 = arith.constant 0 : i32
    return %0, %c0_i32 : i32, i32
  }
  func.func @transform_3(%arg0: i32) -> (i32, i32, i32) {
    %c0_i32 = arith.constant 0 : i32
    %c0_i32_0 = arith.constant 0 : i32
    %c0_i32_1 = arith.constant 0 : i32
    %c0_i32_2 = arith.constant 0 : i32
    return %c0_i32, %c0_i32_0, %c0_i32_1 : i32, i32, i32
  }
  func.func @transform_4(%arg0: i32) -> (i32, i32, i32) {
    %c0_i32 = arith.constant 0 : i32
    %c0_i32_0 = arith.constant 0 : i32
    %c0_i32_1 = arith.constant 0 : i32
    %c0_i32_2 = arith.constant 0 : i32
    return %c0_i32, %c0_i32_0, %c0_i32_1 : i32, i32, i32
  }
  func.func @transform_5(%arg0: i32) -> (i32, i32, i32) {
    %c0_i32 = arith.constant 0 : i32
    %c0_i32_0 = arith.constant 0 : i32
    %c0_i32_1 = arith.constant 0 : i32
    %c0_i32_2 = arith.constant 0 : i32
    return %c0_i32, %c0_i32_0, %c0_i32_1 : i32, i32, i32
  }
  func.func @transform_6(%arg0: i32) -> (i32, i32, i32) {
    %c0_i32 = arith.constant 0 : i32
    %c0_i32_0 = arith.constant 0 : i32
    %c0_i32_1 = arith.constant 0 : i32
    %c0_i32_2 = arith.constant 0 : i32
    return %c0_i32, %c0_i32_0, %c0_i32_1 : i32, i32, i32
  }
  func.func @transform_7(%arg0: i32) -> (i32, i32, i32) {
    %c0_i32 = arith.constant 0 : i32
    %c0_i32_0 = arith.constant 0 : i32
    %c0_i32_1 = arith.constant 0 : i32
    %c0_i32_2 = arith.constant 0 : i32
    return %c0_i32, %c0_i32_0, %c0_i32_1 : i32, i32, i32
  }
}

</mosaic_0001>

<bundles_post_ra>
// kernel: sentence_encoder_forward.1
= control target key start
LH: loop header
LB: loop body
LE: loop exit
PB: predicated region body
PF: predicated region fallthrough
CT: control target
= control target key end

     0   :  { %s3382_s24 = smov 0   ;;  %s4316_s0 = inlined_call_operand.vmem [shape: s32[16,1], index: 0, kind: input, shape index: {}]   ;;  %s4317_s1 = inlined_call_operand.vmem [shape: bf16[256,32], index: 1, kind: input, shape index: {}, may-alias: {1,2}]   ;;  %s4318_s2 = inlined_call_operand.vmem [shape: bf16[256,32], index: 2, kind: input, shape index: {}, may-alias: {1,2}]   ;;  %s4319_s3 = inlined_call_operand.vmem [shape: bf16[2,32,96], index: 3, kind: input, shape index: {}]   ;;  %s4320_s4 = inlined_call_operand.vmem [shape: bf16[2,32,96], index: 4, kind: input, shape index: {}]   ;;  %s4321_s5 = inlined_call_operand.vmem [shape: f32[2,1,96], index: 5, kind: input, shape index: {}]   ;;  %s4322_s6 = inlined_call_operand.vmem [shape: f32[2,1,32], index: 6, kind: input, shape index: {}]   ;;  %s4323_s7 = inlined_call_operand.vmem [shape: f32[2,16,32], index: 7, kind: output, shape index: {}]  }
   0x1 LB: > { %s3388_s25 = sadd.s32 4294967295, %s3333_s24   ;;  %p2737_p0 = scmp.ge.s32.totalorder %s3333_s24, 1  ;;  %s3333_s24 = sphi %s3382_s24, %s17_s24  }
   0x2   : > { %p248_p1 = scmp.lt.s32.totalorder %s3333_s24, 3 }
   0x4   : > { %p249_p2 = pnand %p2737_p0, %p248_p1 }
   0x5   : > { %s2738_s26 = sshll.u32 (!%p249_p2), %s3388_s25, 4  ;;  %s287_s27 = ssub.s32 (!%p249_p2), 1, %s3388_s25 }
   0x6   : > { %252 = sbr.rel (%p249_p2) target bundleno = 5545 (0x15a9), region = 48  ;;  %p282_p3 = scmp.lt.s32.totalorder (!%p249_p2), %s2738_s26, 31 }
   0x7   : > { %s2740_s28 = sshll.u32 (!%p249_p2), %s287_s27, 4  ;;  %p2742_p5 = scmp.ne.s32.totalorder (!%p249_p2), %s3388_s25, 0 }
   0x8   : > { %p289_p4 = scmp.lt.s32.totalorder (!%p249_p2), %s2740_s28, 31 }
   0xb   : > { %s4325_s26 = smov (!%p282_p3, %s2738_s26), 31  ;;  %s4327_s28 = smov (!%p289_p4, %s2740_s28), 31 }
   0xc   : > { %s2739_s29 = sshll.u32 %s4325_s26, 2  ;;  %s2741_s10 = sshll.u32 %s4327_s28, 2 }
   0xd   : > { %s3399_s9 = scalar_lea.vmem %s4317_s1, %s2739_s29  ;;  %s3404_s13 = scalar_lea.vmem %s4318_s2, %s2741_s10 }
   0xe   : > { %299 = sbr.rel (%p2742_p5) target bundleno = 22 (0x16), region = 52 }
  0x13   : > { %vm300_vm0 = vcmask 261120   ;;  %v3335_v0 = vmov 0.0  }
  0x14   : > { %301 = vst.msk [vmem:[#allocation2] sm:$0xff] %vm300_vm0, %v3335_v0  ;;  %302 = vst.msk [vmem:[#allocation2 + $0x8] sm:$0xff] %vm300_vm0, %v3335_v0 }
  0x15   : > { %303 = vst.msk [vmem:[#allocation3] sm:$0xff] %vm300_vm0, %v3335_v0  ;;  %304 = vst.msk [vmem:[#allocation3 + $0x8] sm:$0xff] %vm300_vm0, %v3335_v0 }
  0x16 PF: > { %v3105_v1 = vld [vmem:[%s4319_s3 + $0x8] sm:$0xff]   ;;  %v3106_v2 = vld [vmem:[%s4319_s3 + $0x18] sm:$0xff]   ;;  %v3107_v3 = vld [vmem:[%s4319_s3] sm:$0xff]   ;;  %vm408_vm1 = vcmask 261120   ;;  %v3336_v9 = vmov 0.0   ;;  %s3337_s14 = smov 64  }
  0x17   : > { %2920 = vmatprep.subr.bf16.mxu0 %v3105_v1  ;;  %2940 = vmatprep.subr.bf16.mxu1 %v3106_v2  ;;  %v3108_v4 = vld [vmem:[%s4319_s3 + $0x10] sm:$0xff]   ;;  %v3109_v5 = vld [vmem:[%s3399_s9] sm:$0xff]   ;;  %v3111_v7 = vld [vmem:[%s3399_s9 + $0x8] sm:$0xff]   ;;  %vm3338_vm2 = vmmov 0   ;;  %s3650_s19 = sshll.u32 %s3388_s25, 3  ;;  %s3656_s20 = sshll.u32 %s287_s27, 3 }
  0x18   : > { %2921 = vmatpush3.bf16.msra.mxu0 %v3105_v1  ;;  %2941 = vmatpush3.bf16.msra.mxu1 %v3106_v2  ;;  %v3110_v6 = vld [vmem:[%s3404_s13] sm:$0xff]   ;;  %v3112_v8 = vld [vmem:[%s3404_s13 + $0x8] sm:$0xff]   ;;  %v3435_v11 = vld [vmem:[%s4320_s4 + $0x18] sm:$0xff]   ;;  %s876_s23 = sadd.s32 7, %s3656_s20  ;;  %s3340_s28 = smov 32  }
  0x19   : > { %2922 = vmatprep.subr.bf16.mxu0 %v3107_v3  ;;  %2942 = vmatprep.subr.bf16.mxu1 %v3108_v4  ;;  %v3429_v10 = vld [vmem:[%s4320_s4 + $0x8] sm:$0xff]   ;;  %v3115_v12 = vld [vmem:[%s3399_s9 + $0x10] sm:$0xff]   ;;  %v3117_v14 = vld [vmem:[%s3399_s9 + $0x18] sm:$0xff]   ;;  %s3341_s29 = smov 96   ;;  %s1014_s30 = sadd.s32 1, %s3650_s19 }
  0x1a   : > { %2924 = vmatprep.mubr.msk.bf16.mxu0 %vm408_vm1, %v3109_v5  ;;  %2944 = vmatprep.mubr.msk.bf16.mxu1 %vm408_vm1, %v3110_v6  ;;  %v3116_v13 = vld [vmem:[%s3404_s13 + $0x10] sm:$0xff]   ;;  %v3118_v15 = vld [vmem:[%s3404_s13 + $0x18] sm:$0xff]   ;;  %v3119_v16 = vld [vmem:[%s3399_s9 + $0x20] sm:$0xff]   ;;  %s1132_s8 = sadd.s32 6, %s3656_s20  ;;  %s1250_s10 = sadd.s32 2, %s3650_s19 }
  0x1b   : > { %v3120_v17 = vld [vmem:[%s3404_s13 + $0x20] sm:$0xff]   ;;  %v3462_v19 = vld [vmem:[%s4320_s4 + $0x10] sm:$0xff]   ;;  %v3121_v20 = vld [vmem:[%s3399_s9 + $0x28] sm:$0xff]   ;;  %s1368_s11 = sadd.s32 5, %s3656_s20  ;;  %s1486_s22 = sadd.s32 3, %s3650_s19 }
  0x1c   : > { %2923 = vmatpush3.bf16.msra.mxu0 %v3107_v3  ;;  %2943 = vmatpush3.bf16.msra.mxu1 %v3108_v4  ;;  %v3455_v18 = vld [vmem:[%s4320_s4] sm:$0xff]   ;;  %v3122_v21 = vld [vmem:[%s3404_s13 + $0x28] sm:$0xff]   ;;  %v3125_v22 = vld [vmem:[%s3399_s9 + $0x30] sm:$0xff]   ;;  %s1722_s27 = sadd.s32 4, %s3650_s19  ;;  %s1840_s26 = sadd.s32 3, %s3656_s20 }
  0x1d   : > { %2960 = vmatprep.subr.bf16.mxu0 %v3336_v9  ;;  %2968 = vmatprep.subr.bf16.mxu1 %v3336_v9  ;;  %v3126_v23 = vld [vmem:[%s3404_s13 + $0x30] sm:$0xff]   ;;  %v2747_v24 = vld [vmem:[%s4322_s6] ss:$0 sm:$0xff]  ;;  %v2749_v25 = vld [vmem:[%s4322_s6 + $0x1] ss:$0 sm:$0xff]  ;;  %s2076_s12 = sadd.s32 2, %s3656_s20 }
  0x1e   : > { %813 = vrot.lane.b32.xlu0 %v2747_v24, %s3337_s14  ;;  %v3127_v26 = vld [vmem:[%s3399_s9 + $0x38] sm:$0xff]   ;;  %v3491_v28 = vld [vmem:[#allocation2] sm:$0xff]  ;;  %v3493_v29 = vld [vmem:[#allocation2 + $0x8] sm:$0xff]  ;;  %s2194_s15 = sadd.s32 6, %s3650_s19  ;;  %s2312_s16 = sadd.s32 1, %s3656_s20 }
  0x1f   : > { %2925 = vmatmul.mubr.msk.bf16.vlgmr.msra.gmra.mxu0 %vm408_vm1, %v3111_v7  ;;  %2945 = vmatmul.mubr.msk.bf16.vlgmr.msra.gmra.mxu1 %vm408_vm1, %v3112_v8  ;;  %v3128_v27 = vld [vmem:[%s3404_s13 + $0x38] sm:$0xff]   ;;  %v3497_v30 = vld [vmem:[#allocation3] sm:$0xff]  ;;  %v742_v32 = vpack.c.bf16 %v3493_v29, %v3491_v28  ;;  %v3522_v34 = vld [vmem:[%s4321_s5] ss:$0 sm:$0xff]  ;;  %s2430_s9 = sadd.s32 7, %s3650_s19  ;;  %p2847_p6 = scmp.ne.s32.totalorder %s3388_s25, 1 }
  0x20   : > { %2961 = vmatpush3.bf16.msra.mxu0 %v3429_v10  ;;  %2969 = vmatpush3.bf16.msra.mxu1 %v3435_v11  ;;  %v3499_v31 = vld [vmem:[#allocation3 + $0x8] sm:$0xff]  ;;  %v3527_v35 = vld [vmem:[%s4321_s5 + $0x1] ss:$0 sm:$0xff] }
  0x21   : > { %2928 = vmatprep.mubr.msk.bf16.mxu0 %vm408_vm1, %v3115_v12  ;;  %2948 = vmatprep.mubr.msk.bf16.mxu1 %vm408_vm1, %v3116_v13  ;;  %v880_v33 = vpack.c.bf16 %v3499_v31, %v3497_v30 }
  0x22   : > { %2962 = vmatprep.subr.bf16.mxu0 %v3336_v9  ;;  %2970 = vmatprep.subr.bf16.mxu1 %v3336_v9 }
  0x23   : > { %951 = vrot.lane.b32.xlu0 %v2749_v25, %s3337_s14 }
  0x24   : > { %2963 = vmatpush3.bf16.msra.mxu0 %v3455_v18  ;;  %2971 = vmatpush3.bf16.msra.mxu1 %v3462_v19 }
  0x25   : > { %2976 = vmatprep.subr.bf16.mxu0 %v3336_v9  ;;  %2984 = vmatprep.subr.bf16.mxu1 %v3336_v9 }
  0x27   : > { %2929 = vmatmul.mubr.msk.bf16.gmra.mxu0 %vm408_vm1, %v3117_v14  ;;  %2949 = vmatmul.mubr.msk.bf16.gmra.mxu1 %vm408_vm1, %v3118_v15 }
  0x28   : > { %2932 = vmatprep.mubr.msk.bf16.mxu0 %vm408_vm1, %v3119_v16  ;;  %2952 = vmatprep.mubr.msk.bf16.mxu1 %vm408_vm1, %v3120_v17 }
  0x2f   : > { %2933 = vmatmul.mubr.msk.bf16.gmra.mxu0 %vm408_vm1, %v3121_v20  ;;  %2953 = vmatmul.mubr.msk.bf16.gmra.mxu1 %vm408_vm1, %v3122_v21 }
  0x30   : > { %2936 = vmatprep.mubr.msk.bf16.mxu0 %vm408_vm1, %v3125_v22  ;;  %2956 = vmatprep.mubr.msk.bf16.mxu1 %vm408_vm1, %v3126_v23 }
  0x37   : > { %2937 = vmatmul.mubr.msk.bf16.gmra.mxu0 %vm408_vm1, %v3127_v26  ;;  %2957 = vmatmul.mubr.msk.bf16.gmra.mxu1 %vm408_vm1, %v3128_v27 }
  0x38   : > { %2964 = vmatprep.mubr.msk.bf16.mxu0 %vm3338_vm2, %v3336_v9  ;;  %2972 = vmatprep.mubr.msk.bf16.mxu1 %vm3338_vm2, %v3336_v9 }
  0x3f   : > { %2965 = vmatmul.mubr.msk.bf16.vlgmr.msra.gmra.mxu0 %vm408_vm1, %v742_v32  ;;  %2973 = vmatmul.mubr.msk.bf16.vlgmr.msra.gmra.mxu1 %vm408_vm1, %v880_v33 }
  0x40   : > { %2977 = vmatpush3.bf16.msra.mxu0 %v3429_v10  ;;  %2980 = vmatprep.mubr.msk.bf16.mxu0 %vm3338_vm2, %v3336_v9 }
  0x41   : > { %2978 = vmatprep.subr.bf16.mxu0 %v3336_v9  ;;  %2985 = vmatpush3.bf16.msra.mxu1 %v3435_v11 }
  0x42   : > { %2988 = vmatprep.mubr.msk.bf16.mxu1 %vm3338_vm2, %v3336_v9  ;;  %2986 = vmatprep.subr.bf16.mxu1 %v3336_v9 }
  0x44   : > { %2979 = vmatpush3.bf16.msra.mxu0 %v3455_v18 }
  0x45   : > { %2992 = vmatprep.subr.bf16.mxu0 %v3336_v9  ;;  %2987 = vmatpush3.bf16.msra.mxu1 %v3462_v19 }
  0x46   : > { %3000 = vmatprep.subr.bf16.mxu1 %v3336_v9 }
  0x90   : > { %v3602_v26 = vpop.permute.xlu0 %813 }
  0xdf   : > { %v2926_v36 = vpop.f32.mrf.mxu0  ;;  %v2946_v38 = vpop.f32.mrf.mxu1 }
  0xe0   : > { %v3530_v37 = vadd.f32 %v2926_v36, %v3522_v34  ;;  %v3533_v39 = vadd.f32 %v2946_v38, %v3527_v35 }
  0xe1   : > { %v3535_v40 = vpop.f32.mrf.mxu0  ;;  %v669_v41 = vpop.f32.mrf.mxu1 }
  0xe2   : > { %v3538_v42 = vadd.f32 %v3527_v35, %v669_v41 }
  0xe3   : > { %v2927_v43 = vpop.f32.mrf.mxu0  ;;  %v2947_v45 = vpop.f32.mrf.mxu1 }
  0xe4   : > { %v3541_v44 = vadd.f32 %v2927_v43, %v3522_v34  ;;  %v3544_v46 = vadd.f32 %v2947_v45, %v3527_v35 }
  0xe5   : > { %v3546_v47 = vpop.f32.mrf.mxu0  ;;  %v672_v48 = vpop.f32.mrf.mxu1 }
  0xe6   : > { %v3549_v49 = vadd.f32 %v3527_v35, %v672_v48 }
  0xe7   : > { %v2930_v50 = vpop.f32.mrf.mxu0  ;;  %v2950_v52 = vpop.f32.mrf.mxu1 }
  0xe8   : > { %v3552_v51 = vadd.f32 %v2930_v50, %v3522_v34  ;;  %v3555_v53 = vadd.f32 %v2950_v52, %v3527_v35  ;;  %v3616_v52 = vpop.permute.xlu0 %951 }
  0xe9   : > { %v483_v54 = vpop.f32.mrf.mxu0  ;;  %v685_v56 = vpop.f32.mrf.mxu1 }
  0xea   : > { %v3558_v55 = vadd.f32 %v3522_v34, %v483_v54  ;;  %v3561_v57 = vadd.f32 %v3527_v35, %v685_v56  ;;  %v3339_v54 = vmov 0  }
  0xeb   : > { %v2931_v58 = vpop.f32.mrf.mxu0  ;;  %v2951_v60 = vpop.f32.mrf.mxu1  ;;  %3103 = vset.pattern.permute.xlu0 %v3339_v54  ;;  %3104 = vset.pattern.permute.xlu1 %v3339_v54 }
  0xec   : > { %v3564_v59 = vadd.f32 %v2931_v58, %v3522_v34  ;;  %v3567_v61 = vadd.f32 %v2951_v60, %v3527_v35 }
  0xed   : > { %v486_v62 = vpop.f32.mrf.mxu0  ;;  %v688_v0 = vpop.f32.mrf.mxu1 }
  0xee   : > { %v3570_v63 = vadd.f32 %v3522_v34, %v486_v62  ;;  %v3573_v1 = vadd.f32 %v3527_v35, %v688_v0 }
  0xef   : > { %v2934_v2 = vpop.f32.mrf.mxu0  ;;  %v2954_v4 = vpop.f32.mrf.mxu1 }
  0xf0   : > { %v3576_v3 = vadd.f32 %v2934_v2, %v3522_v34  ;;  %v3579_v5 = vadd.f32 %v2954_v4, %v3527_v35 }
  0xf1   : > { %v499_v6 = vpop.f32.mrf.mxu0  ;;  %v701_v8 = vpop.f32.mrf.mxu1 }
  0xf2   : > { %v3582_v7 = vadd.f32 %v3522_v34, %v499_v6  ;;  %v3585_v12 = vadd.f32 %v3527_v35, %v701_v8 }
  0xf3   : > { %v2935_v13 = vpop.f32.mrf.mxu0  ;;  %v2955_v15 = vpop.f32.mrf.mxu1 }
  0xf4   : > { %v3588_v14 = vadd.f32 %v2935_v13, %v3522_v34  ;;  %v3591_v16 = vadd.f32 %v2955_v15, %v3527_v35 }
  0xf5   : > { %v502_v17 = vpop.f32.mrf.mxu0  ;;  %v704_v21 = vpop.f32.mrf.mxu1 }
  0xf6   : > { %v3594_v20 = vadd.f32 %v3522_v34, %v502_v17  ;;  %v3597_v22 = vadd.f32 %v3527_v35, %v704_v21 }
  0xf7   : > { %v2938_v23 = vpop.f32.mrf.mxu0  ;;  %v2958_v25 = vpop.f32.mrf.mxu1 }
  0xf8   : > { %v3600_v24 = vadd.f32 %v2938_v23, %v3522_v34  ;;  %v3633_v23 = vadd.f32 %v3522_v34, %v3535_v40 }
  0xf9   : > { %v515_v27 = vpop.f32.mrf.mxu0  ;;  %v717_v33 = vpop.f32.mrf.mxu1 }
  0xfa   : > { %v3605_v32 = vadd.f32 %v3522_v34, %v515_v27  ;;  %v3608_v36 = vadd.f32 %v3527_v35, %v717_v33  ;;  %v3637_v33 = vadd.f32 %v2958_v25, %v3527_v35 }
  0xfb   : > { %v2939_v38 = vpop.f32.mrf.mxu0  ;;  %v2959_v43 = vpop.f32.mrf.mxu1 }
  0xfc   : > { %v3611_v41 = vadd.f32 %v2939_v38, %v3522_v34  ;;  %v3641_v38 = vadd.f32 %v3522_v34, %v3546_v47 }
  0xfd   : > { %v518_v45 = vpop.f32.mrf.mxu0  ;;  %v720_v50 = vpop.f32.mrf.mxu1 }
  0xfe   : > { %v3614_v48 = vadd.f32 %v3522_v34, %v518_v45  ;;  %v3621_v56 = vadd.f32 %v3527_v35, %v720_v50 }
  0xff   : > { %v792_v58 = vpop.f32.mrf.mxu0  ;;  %v930_v60 = vpop.f32.mrf.mxu1 }
 0x100   : > { %v816_v62 = vadd.f32 %v3602_v26, %v792_v58  ;;  %v954_v0 = vadd.f32 %v3616_v52, %v930_v60  ;;  %v799_v27 = vadd.f32 %v792_v58, %v3633_v23  ;;  %v937_v45 = vadd.f32 %v930_v60, %v3637_v33 }
 0x101   : > { %v2966_v2 = vpop.f32.mrf.mxu0  ;;  %v2974_v4 = vpop.f32.mrf.mxu1 }
 0x102   : > { %820 = vrot.lane.b32.xlu1 %v816_v62, %s3337_s14  ;;  %958 = vrot.lane.b32.xlu0 %v954_v0, %s3337_s14  ;;  %v2798_v50 = vmul.f32 -1.442695, %v799_v27  ;;  %v3646_v0 = vadd.f32 %v2959_v43, %v3527_v35  ;;  %v2803_v2 = vmul.f32 -1.442695, %v937_v45  ;;  %v3662_v27 = vld [vmem:[%s4316_s0] sm:$0xff]  ;;  %v739_v45 = vstv %s3650_s19 }
 0x103   : > { %v795_v6 = vpop.f32.mrf.mxu0  ;;  %v933_v13 = vpop.f32.mrf.mxu1  ;;  %vm740_vm3 = vcmp.lt.s32.totalorder %v739_v45, %v3662_v27 }
 0x104   : > { %v817_v8 = vadd.f32 %v3602_v26, %v795_v6  ;;  %v955_v21 = vadd.f32 %v3616_v52, %v933_v13  ;;  %v800_v62 = vadd.f32 %v795_v6, %v3641_v38  ;;  %3129 = vpow2.f32 %v2798_v50 }
 0x105   : > { %v2967_v15 = vpop.f32.mrf.mxu0  ;;  %v2975_v17 = vpop.f32.mrf.mxu1  ;;  %v938_v58 = vadd.f32 %v933_v13, %v3646_v0  ;;  %3131 = vpow2.f32 %v2803_v2 }
 0x106   : > { %822 = vrot.lane.b32.xlu1 %v817_v8, %s3337_s14  ;;  %v2799_v40 = vmul.f32 -1.442695, %v800_v62 }
 0x107   : > { %v2804_v25 = vmul.f32 -1.442695, %v938_v58 }
 0x108   : > { %3133 = vpow2.f32 %v2799_v40 }
 0x109   : > { %3135 = vpow2.f32 %v2804_v25  ;;  %v3677_v25 = vld [vmem:[%s4316_s0 + $0x8] sm:$0xff] }
 0x10a   : > { %960 = vrot.lane.b32.xlu1 %v955_v21, %s3337_s14  ;;  %vm741_vm4 = vcmp.lt.s32.totalorder %v739_v45, %v3677_v25 }
 0x111   : > { %v3130_v34 = vpop.eup %3129 }
 0x112   : > { %v3132_v47 = vpop.eup %3131  ;;  %v807_v60 = vadd.f32 1.0, %v3130_v34  ;;  %v877_v34 = vstv %s876_s23  ;;  %s1604_s23 = sadd.s32 4, %s3656_s20 }
 0x113   : > { %v945_v8 = vadd.f32 1.0, %v3132_v47  ;;  %vm879_vm5 = vcmp.lt.s32.totalorder %v877_v34, %v3677_v25  ;;  %vm878_vm6 = vcmp.lt.s32.totalorder %v877_v34, %v3662_v27 }
 0x114   : > { %3137 = vrcp.f32 %v807_v60 }
 0x115   : > { %v3134_v4 = vpop.eup %3133  ;;  %3139 = vrcp.f32 %v945_v8 }
 0x116   : > { %v808_v6 = vadd.f32 1.0, %v3134_v4  ;;  %v3136_v35 = vpop.eup %3135  ;;  %v864_v4 = vsel %vm740_vm3, 1, %v3339_v54 }
 0x117   : > { %v946_v43 = vadd.f32 1.0, %v3136_v35  ;;  %v1003_v35 = vsel %vm879_vm5, 1, %v3339_v54 }
 0x118   : > { %3141 = vrcp.f32 %v808_v6  ;;  %v865_v6 = vsel %vm741_vm4, 1, %v3339_v54 }
 0x119   : > { %3143 = vrcp.f32 %v946_v43  ;;  %v1002_v43 = vsel %vm878_vm6, 1, %v3339_v54 }
 0x121   : > { %v3652_v13 = vpop.eup %3137 }
 0x122   : > { %v3665_v50 = vpop.eup %3139 }
 0x125   : > { %v3669_v62 = vpop.eup %3141 }
 0x126   : > { %v3681_v47 = vpop.eup %3143 }
 0x174   : > { %v821_v15 = vpop.permute.xlu1 %820  ;;  %v959_v21 = vpop.permute.xlu0 %958 }
 0x175   : > { %v826_v17 = vmul.f32 %v3652_v13, %v821_v15  ;;  %v964_v40 = vmul.f32 %v3665_v50, %v959_v21 }
 0x177   : > { %830 = vrot.lane.b32.xlu0 %v826_v17, %s3337_s14 }
 0x178   : > { %v823_v2 = vpop.permute.xlu1 %822 }
 0x179   : > { %v827_v58 = vmul.f32 %v3669_v62, %v823_v2 }
 0x17b   : > { %968 = vrot.lane.b32.xlu0 %v964_v40, %s3337_s14  ;;  %832 = vrot.lane.b32.xlu1 %v827_v58, %s3337_s14 }
 0x17c   : > { %v961_v60 = vpop.permute.xlu1 %960 }
 0x17d   : > { %v965_v8 = vmul.f32 %v3681_v47, %v961_v60 }
 0x17f   : > { %970 = vrot.lane.b32.xlu1 %v965_v8, %s3337_s14  ;;  %867 = vperm.xlu0 %3103, %v864_v4  }
 0x183   : > { %870 = vperm.xlu1 %3104, %v865_v6   ;;  %1008 = vperm.xlu0 %3103, %v1003_v35   ;;  %v840_v6 = vsub.f32 1.0, %v3652_v13 }
 0x187   : > { %1005 = vperm.xlu1 %3104, %v1002_v43   ;;  %856 = vrot.lane.b32.xlu0 %v3493_v29, %s3340_s28 }
 0x18b   : > { %854 = vrot.lane.b32.xlu1 %v3491_v28, %s3340_s28 }
 0x1e9   : > { %v831_v15 = vpop.permute.xlu0 %830 }
 0x1ea   : > { %v836_v17 = vadd.f32 %v831_v15, %v3633_v23 }
 0x1ec   : > { %3145 = vtanh.f32 %v836_v17 }
 0x1ed   : > { %v969_v21 = vpop.permute.xlu0 %968  ;;  %v833_v45 = vpop.permute.xlu1 %832 }
 0x1ee   : > { %v974_v2 = vadd.f32 %v969_v21, %v3637_v33  ;;  %v837_v40 = vadd.f32 %v833_v45, %v3641_v38  ;;  %v841_v45 = vsub.f32 1.0, %v3669_v62 }
 0x1f0   : > { %3147 = vtanh.f32 %v974_v2 }
 0x1f1   : > { %3149 = vtanh.f32 %v837_v40  ;;  %v971_v58 = vpop.permute.xlu1 %970 }
 0x1f2   : > { %v975_v34 = vadd.f32 %v971_v58, %v3646_v0 }
 0x1f4   : > { %3151 = vtanh.f32 %v975_v34 }
 0x1f9   : > { %v3146_v60 = vpop.eup %3145 }
 0x1fa   : > { %844 = vrot.lane.b32.xlu1 %v3146_v60, %s3341_s29  ;;  %v868_v38 = vpop.permute.xlu0 %867 }
 0x1fb   : > { %vm872_vm7 = vcmp.eq.s32.totalorder %v868_v38, 1 }
 0x1fd   : > { %v3148_v28 = vpop.eup %3147 }
 0x1fe   : > { %v3150_v29 = vpop.eup %3149  ;;  %982 = vrot.lane.b32.xlu1 %v3148_v28, %s3341_s29  ;;  %v871_v33 = vpop.permute.xlu1 %870  ;;  %v978_v28 = vsub.f32 1.0, %v3665_v50 }
 0x1ff   : > { %846 = vrot.lane.b32.xlu0 %v3150_v29, %s3341_s29  ;;  %v1009_v4 = vpop.permute.xlu0 %1008  ;;  %vm873_vm8 = vcmp.eq.s32.totalorder %v871_v33, 1 }
 0x200   : > { %vm1011_vm9 = vcmp.eq.s32.totalorder %v1009_v4, 1 }
 0x201   : > { %v3152_v23 = vpop.eup %3151 }
 0x202   : > { %992 = vrot.lane.b32.xlu1 %v3497_v30, %s3340_s28  ;;  %v1006_v0 = vpop.permute.xlu1 %1005 }
 0x203   : > { %984 = vrot.lane.b32.xlu0 %v3152_v23, %s3341_s29  ;;  %v857_v43 = vpop.permute.xlu0 %856  ;;  %vm1010_vm10 = vcmp.eq.s32.totalorder %v1006_v0, 1 }
 0x204   : > { %v861_v2 = vmul.f32 %v3669_v62, %v857_v43  ;;  %v979_v62 = vsub.f32 1.0, %v3681_v47 }
 0x206   : > { %v855_v8 = vpop.permute.xlu1 %854 }
 0x207   : > { %994 = vrot.lane.b32.xlu0 %v3499_v31, %s3340_s28  ;;  %v860_v17 = vmul.f32 %v3652_v13, %v855_v8 }
 0x26c   : > { %v845_v35 = vpop.permute.xlu1 %844 }
 0x26d   : > { %v850_v15 = vmul.f32 %v845_v35, %v840_v6 }
 0x26f   : > { %v862_v40 = vadd.f32 %v860_v17, %v850_v15 }
 0x270   : > { %v983_v21 = vpop.permute.xlu1 %982 }
 0x271   : > { %v847_v30 = vpop.permute.xlu0 %846  ;;  %v3710_v23 = vsel %vm872_vm7, %v862_v40, %v855_v8  ;;  %v988_v35 = vmul.f32 %v983_v21, %v978_v28 }
 0x272   : > { %v851_v31 = vmul.f32 %v847_v30, %v841_v45 }
 0x274   : > { %v863_v58 = vadd.f32 %v861_v2, %v851_v31  ;;  %v993_v34 = vpop.permute.xlu1 %992 }
 0x275   : > { %v985_v60 = vpop.permute.xlu0 %984  ;;  %v998_v29 = vmul.f32 %v3665_v50, %v993_v34 }
 0x276   : > { %v3712_v13 = vsel %vm873_vm8, %v863_v58, %v857_v43  ;;  %v989_v33 = vmul.f32 %v985_v60, %v979_v62 }
 0x277   : > { %v1018_v6 = vpack.c.bf16 %v3712_v13, %v3710_v23  ;;  %v1000_v38 = vadd.f32 %v998_v29, %v988_v35 }
 0x279   : > { %1020 = vrot.lane.b32.xlu1 %v1018_v6, %s3341_s29  ;;  %v995_v15 = vpop.permute.xlu0 %994  ;;  %v3719_v50 = vsel %vm1010_vm10, %v1000_v38, %v993_v34 }
 0x27a   : > { %v999_v17 = vmul.f32 %v3681_v47, %v995_v15 }
 0x27c   : > { %v1001_v45 = vadd.f32 %v999_v17, %v989_v33 }
 0x27e   : > { %v3721_v8 = vsel %vm1011_vm9, %v1001_v45, %v995_v15 }
 0x27f   : > { %v1136_v43 = vpack.c.bf16 %v3721_v8, %v3719_v50 }
 0x281   : > { %1138 = vrot.lane.b32.xlu0 %v1136_v43, %s3341_s29 }
 0x2eb   : > { %v1021_v21 = vpop.permute.xlu1 %1020 }
 0x2ec   : > { %2981 = vmatmul.mubr.msk.bf16.vlgmr.msra.gmra.mxu0 %vm408_vm1, %v1021_v21 }
 0x2ed   : > { %2993 = vmatpush3.bf16.msra.mxu0 %v3429_v10  ;;  %2996 = vmatprep.mubr.msk.bf16.mxu0 %vm3338_vm2, %v3336_v9 }
 0x2ee   : > { %2994 = vmatprep.subr.bf16.mxu0 %v3336_v9 }
 0x2f1   : > { %2995 = vmatpush3.bf16.msra.mxu0 %v3455_v18 }
 0x2f2   : > { %3008 = vmatprep.subr.bf16.mxu0 %v3336_v9 }
 0x2f3   : > { %v1139_v47 = vpop.permute.xlu0 %1138 }
 0x2f4   : > { %2989 = vmatmul.mubr.msk.bf16.vlgmr.msra.gmra.mxu1 %vm408_vm1, %v1139_v47 }
 0x2f5   : > { %3001 = vmatpush3.bf16.msra.mxu1 %v3435_v11  ;;  %3004 = vmatprep.mubr.msk.bf16.mxu1 %vm3338_vm2, %v3336_v9 }
 0x2f6   : > { %3002 = vmatprep.subr.bf16.mxu1 %v3336_v9 }
 0x2f9   : > { %3003 = vmatpush3.bf16.msra.mxu1 %v3462_v19 }
 0x2fa   : > { %3016 = vmatprep.subr.bf16.mxu1 %v3336_v9 }
 0x3ac   : > { %v1059_v0 = vpop.f32.mrf.mxu0 }
 0x3ad   : > { %v1080_v4 = vadd.f32 %v1059_v0, %v3602_v26  ;;  %v1066_v35 = vadd.f32 %v1059_v0, %v3530_v37 }
 0x3ae   : > { %v2982_v30 = vpop.f32.mrf.mxu0 }
 0x3af   : > { %1084 = vrot.lane.b32.xlu1 %v1080_v4, %s3337_s14  ;;  %v2806_v62 = vmul.f32 -1.442695, %v1066_v35  ;;  %v1015_v35 = vstv %s1014_s30 }
 0x3b0   : > { %v1062_v2 = vpop.f32.mrf.mxu0  ;;  %vm1016_vm11 = vcmp.lt.s32.totalorder %v1015_v35, %v3662_v27  ;;  %vm1017_vm13 = vcmp.lt.s32.totalorder %v1015_v35, %v3677_v25 }
 0x3b1   : > { %v1081_v40 = vadd.f32 %v1062_v2, %v3602_v26  ;;  %v1067_v15 = vadd.f32 %v1062_v2, %v3541_v44  ;;  %3153 = vpow2.f32 %v2806_v62 }
 0x3b2   : > { %v2983_v31 = vpop.f32.mrf.mxu0 }
 0x3b3   : > { %1086 = vrot.lane.b32.xlu0 %v1081_v40, %s3337_s14  ;;  %v2807_v38 = vmul.f32 -1.442695, %v1067_v15 }
 0x3b4   : > { %v1177_v58 = vpop.f32.mrf.mxu1 }
 0x3b5   : > { %v1198_v34 = vadd.f32 %v1177_v58, %v3616_v52  ;;  %v1184_v33 = vadd.f32 %v1177_v58, %v3608_v36  ;;  %3155 = vpow2.f32 %v2807_v38 }
 0x3b6   : > { %v2990_v60 = vpop.f32.mrf.mxu1 }
 0x3b7   : > { %1202 = vrot.lane.b32.xlu1 %v1198_v34, %s3337_s14  ;;  %v2809_v17 = vmul.f32 -1.442695, %v1184_v33  ;;  %v1133_v33 = vstv %s1132_s8 }
 0x3b8   : > { %v1180_v28 = vpop.f32.mrf.mxu1  ;;  %vm1134_vm12 = vcmp.lt.s32.totalorder %v1133_v33, %v3662_v27  ;;  %vm1135_vm14 = vcmp.lt.s32.totalorder %v1133_v33, %v3677_v25 }
 0x3b9   : > { %v1199_v29 = vadd.f32 %v1180_v28, %v3616_v52  ;;  %v1185_v45 = vadd.f32 %v1180_v28, %v3621_v56  ;;  %3157 = vpow2.f32 %v2809_v17 }
 0x3ba   : > { %v2991_v6 = vpop.f32.mrf.mxu1 }
 0x3bb   : > { %1204 = vrot.lane.b32.xlu0 %v1199_v29, %s3337_s14  ;;  %v2810_v43 = vmul.f32 -1.442695, %v1185_v45 }
 0x3bd   : > { %3159 = vpow2.f32 %v2810_v43  ;;  %v1120_v43 = vsel %vm1016_vm11, 1, %v3339_v54 }
 0x3be   : > { %v3154_v21 = vpop.eup %3153 }
 0x3bf   : > { %v1074_v47 = vadd.f32 1.0, %v3154_v21 }
 0x3c1   : > { %3161 = vrcp.f32 %v1074_v47  ;;  %v1238_v47 = vsel %vm1134_vm12, 1, %v3339_v54 }
 0x3c2   : > { %v3156_v4 = vpop.eup %3155 }
 0x3c3   : > { %v1075_v0 = vadd.f32 1.0, %v3156_v4  ;;  %v1121_v4 = vsel %vm1017_vm13, 1, %v3339_v54 }
 0x3c5   : > { %3163 = vrcp.f32 %v1075_v0  ;;  %v1239_v0 = vsel %vm1135_vm14, 1, %v3339_v54 }
 0x3c6   : > { %v3158_v30 = vpop.eup %3157 }
 0x3c7   : > { %v1192_v2 = vadd.f32 1.0, %v3158_v30 }
 0x3c9   : > { %3165 = vrcp.f32 %v1192_v2 }
 0x3ca   : > { %v3160_v40 = vpop.eup %3159 }
 0x3cb   : > { %v1193_v31 = vadd.f32 1.0, %v3160_v40 }
 0x3cd   : > { %3167 = vrcp.f32 %v1193_v31 }
 0x3ce   : > { %v3162_v58 = vpop.eup %3161 }
 0x3d2   : > { %v3164_v28 = vpop.eup %3163 }
 0x3d6   : > { %v3756_v62 = vpop.eup %3165 }
 0x3da   : > { %v3761_v17 = vpop.eup %3167 }
 0x421   : > { %v1085_v34 = vpop.permute.xlu1 %1084 }
 0x422   : > { %v1090_v60 = vmul.f32 %v3162_v58, %v1085_v34 }
 0x424   : > { %1094 = vrot.lane.b32.xlu1 %v1090_v60, %s3337_s14 }
 0x425   : > { %v1087_v29 = vpop.permute.xlu0 %1086 }
 0x426   : > { %v1091_v6 = vmul.f32 %v3164_v28, %v1087_v29 }
 0x428   : > { %1096 = vrot.lane.b32.xlu0 %v1091_v6, %s3337_s14 }
 0x429   : > { %v1203_v15 = vpop.permute.xlu1 %1202 }
 0x42a   : > { %v1208_v38 = vmul.f32 %v3756_v62, %v1203_v15 }
 0x42c   : > { %1212 = vrot.lane.b32.xlu1 %v1208_v38, %s3337_s14 }
 0x42d   : > { %v1205_v45 = vpop.permute.xlu0 %1204 }
 0x42e   : > { %v1209_v21 = vmul.f32 %v3761_v17, %v1205_v45  ;;  %v1104_v45 = vsub.f32 1.0, %v3162_v58 }
 0x430   : > { %1123 = vperm.xlu1 %3104, %v1120_v43   ;;  %1214 = vrot.lane.b32.xlu0 %v1209_v21, %s3337_s14 }
 0x434   : > { %1241 = vperm.xlu1 %3104, %v1238_v47   ;;  %1126 = vperm.xlu0 %3103, %v1121_v4   ;;  %v1116_v47 = vmul.f32 %v3162_v58, %v3710_v23  ;;  %v1105_v4 = vsub.f32 1.0, %v3164_v28 }
 0x438   : > { %1244 = vperm.xlu0 %3103, %v1239_v0  }
 0x496   : > { %v1095_v30 = vpop.permute.xlu1 %1094 }
 0x497   : > { %v1100_v2 = vadd.f32 %v1095_v30, %v3530_v37 }
 0x499   : > { %3169 = vtanh.f32 %v1100_v2  ;;  %v1117_v2 = vmul.f32 %v3164_v28, %v3712_v13  ;;  %v1234_v28 = vmul.f32 %v3756_v62, %v3719_v50 }
 0x49a   : > { %v1097_v40 = vpop.permute.xlu0 %1096 }
 0x49b   : > { %v1101_v31 = vadd.f32 %v1097_v40, %v3541_v44 }
 0x49d   : > { %3171 = vtanh.f32 %v1101_v31 }
 0x49e   : > { %v1213_v34 = vpop.permute.xlu1 %1212 }
 0x49f   : > { %v1218_v60 = vadd.f32 %v1213_v34, %v3608_v36  ;;  %v1222_v34 = vsub.f32 1.0, %v3756_v62 }
 0x4a1   : > { %3173 = vtanh.f32 %v1218_v60 }
 0x4a2   : > { %v1215_v29 = vpop.permute.xlu0 %1214 }
 0x4a3   : > { %v1219_v6 = vadd.f32 %v1215_v29, %v3621_v56 }
 0x4a5   : > { %3175 = vtanh.f32 %v1219_v6 }
 0x4a6   : > { %v3170_v35 = vpop.eup %3169 }
 0x4a7   : > { %1108 = vrot.lane.b32.xlu1 %v3170_v35, %s3341_s29 }
 0x4aa   : > { %v3172_v15 = vpop.eup %3171 }
 0x4ab   : > { %1110 = vrot.lane.b32.xlu0 %v3172_v15, %s3341_s29  ;;  %v1124_v44 = vpop.permute.xlu1 %1123  ;;  %v1223_v15 = vsub.f32 1.0, %v3761_v17 }
 0x4ac   : > { %vm1128_vm15 = vcmp.eq.s32.totalorder %v1124_v44, 1  ;;  %v1235_v44 = vmul.f32 %v3761_v17, %v3721_v8 }
 0x4ae   : > { %v3174_v37 = vpop.eup %3173 }
 0x4af   : > { %1226 = vrot.lane.b32.xlu1 %v3174_v37, %s3341_s29  ;;  %v1127_v33 = vpop.permute.xlu0 %1126  ;;  %v1242_v36 = vpop.permute.xlu1 %1241 }
 0x4b0   : > { %vm1129_vm0 = vcmp.eq.s32.totalorder %v1127_v33, 1  ;;  %vm1246_vm3 = vcmp.eq.s32.totalorder %v1242_v36, 1 }
 0x4b2   : > { %v3176_v38 = vpop.eup %3175 }
 0x4b3   : > { %1228 = vrot.lane.b32.xlu0 %v3176_v38, %s3341_s29  ;;  %v1245_v43 = vpop.permute.xlu0 %1244 }
 0x4b4   : > { %vm1247_vm4 = vcmp.eq.s32.totalorder %v1245_v43, 1 }
 0x519   : > { %v1109_v21 = vpop.permute.xlu1 %1108 }
 0x51a   : > { %v1114_v56 = vmul.f32 %v1109_v21, %v1104_v45 }
 0x51c   : > { %v1118_v30 = vadd.f32 %v1116_v47, %v1114_v56 }
 0x51d   : > { %v1111_v0 = vpop.permute.xlu0 %1110 }
 0x51e   : > { %v1115_v40 = vmul.f32 %v1111_v0, %v1105_v4  ;;  %v3784_v6 = vsel %vm1128_vm15, %v1118_v30, %v3710_v23 }
 0x520   : > { %v1119_v31 = vadd.f32 %v1117_v2, %v1115_v40 }
 0x521   : > { %v1227_v60 = vpop.permute.xlu1 %1226 }
 0x522   : > { %v1232_v29 = vmul.f32 %v1227_v60, %v1222_v34  ;;  %v3787_v35 = vsel %vm1129_vm0, %v1119_v31, %v3712_v13 }
 0x523   : > { %v1254_v58 = vpack.c.bf16 %v3787_v35, %v3784_v6 }
 0x524   : > { %v1236_v38 = vadd.f32 %v1234_v28, %v1232_v29 }
 0x525   : > { %1256 = vrot.lane.b32.xlu1 %v1254_v58, %s3341_s29  ;;  %v1229_v37 = vpop.permute.xlu0 %1228 }
 0x526   : > { %v1233_v23 = vmul.f32 %v1229_v37, %v1223_v15  ;;  %v3798_v13 = vsel %vm1246_vm3, %v1236_v38, %v3719_v50 }
 0x528   : > { %v1237_v33 = vadd.f32 %v1235_v44, %v1233_v23 }
 0x52a   : > { %v3801_v45 = vsel %vm1247_vm4, %v1237_v33, %v3721_v8 }
 0x52b   : > { %v1372_v62 = vpack.c.bf16 %v3801_v45, %v3798_v13 }
 0x52d   : > { %1374 = vrot.lane.b32.xlu0 %v1372_v62, %s3341_s29 }
 0x597   : > { %v1257_v21 = vpop.permute.xlu1 %1256 }
 0x598   : > { %2997 = vmatmul.mubr.msk.bf16.vlgmr.msra.gmra.mxu0 %vm408_vm1, %v1257_v21 }
 0x599   : > { %3009 = vmatpush3.bf16.msra.mxu0 %v3429_v10  ;;  %3012 = vmatprep.mubr.msk.bf16.mxu0 %vm3338_vm2, %v3336_v9 }
 0x59a   : > { %3010 = vmatprep.subr.bf16.mxu0 %v3336_v9 }
 0x59d   : > { %3011 = vmatpush3.bf16.msra.mxu0 %v3455_v18 }
 0x59e   : > { %3024 = vmatprep.subr.bf16.mxu0 %v3336_v9 }
 0x59f   : > { %v1375_v50 = vpop.permute.xlu0 %1374 }
 0x5a0   : > { %3005 = vmatmul.mubr.msk.bf16.vlgmr.msra.gmra.mxu1 %vm408_vm1, %v1375_v50 }
 0x5a1   : > { %3017 = vmatpush3.bf16.msra.mxu1 %v3435_v11  ;;  %3020 = vmatprep.mubr.msk.bf16.mxu1 %vm3338_vm2, %v3336_v9 }
 0x5a2   : > { %3018 = vmatprep.subr.bf16.mxu1 %v3336_v9 }
 0x5a5   : > { %3019 = vmatpush3.bf16.msra.mxu1 %v3462_v19 }
 0x5a6   : > { %3032 = vmatprep.subr.bf16.mxu1 %v3336_v9 }
 0x658   : > { %v1295_v10 = vpop.f32.mrf.mxu0 }
 0x659   : > { %v1316_v8 = vadd.f32 %v1295_v10, %v3602_v26  ;;  %v1302_v30 = vadd.f32 %v1295_v10, %v3558_v55 }
 0x65a   : > { %v2998_v18 = vpop.f32.mrf.mxu0 }
 0x65b   : > { %1320 = vrot.lane.b32.xlu1 %v1316_v8, %s3337_s14  ;;  %v2812_v2 = vmul.f32 -1.442695, %v1302_v30 }
 0x65c   : > { %v1298_v17 = vpop.f32.mrf.mxu0 }
 0x65d   : > { %v1317_v36 = vadd.f32 %v1298_v17, %v3602_v26  ;;  %v1303_v40 = vadd.f32 %v1298_v17, %v3570_v63  ;;  %3177 = vpow2.f32 %v2812_v2 }
 0x65e   : > { %v2999_v43 = vpop.f32.mrf.mxu0 }
 0x65f   : > { %1322 = vrot.lane.b32.xlu0 %v1317_v36, %s3337_s14  ;;  %v2813_v31 = vmul.f32 -1.442695, %v1303_v40  ;;  %v1251_v36 = vstv %s1250_s10 }
 0x660   : > { %v1413_v11 = vpop.f32.mrf.mxu1  ;;  %vm1252_vm5 = vcmp.lt.s32.totalorder %v1251_v36, %v3662_v27  ;;  %vm1253_vm7 = vcmp.lt.s32.totalorder %v1251_v36, %v3677_v25 }
 0x661   : > { %v1434_v56 = vadd.f32 %v1413_v11, %v3616_v52  ;;  %v1420_v34 = vadd.f32 %v1413_v11, %v3579_v5  ;;  %3179 = vpow2.f32 %v2813_v31  ;;  %v1357_v40 = vsel %vm1253_vm7, 1, %v3339_v54 }
 0x662   : > { %v3006_v47 = vpop.f32.mrf.mxu1 }
 0x663   : > { %1438 = vrot.lane.b32.xlu1 %v1434_v56, %s3337_s14  ;;  %v2815_v60 = vmul.f32 -1.442695, %v1420_v34  ;;  %v1369_v47 = vstv %s1368_s11  ;;  %s1958_s11 = sadd.s32 5, %s3650_s19 }
 0x664   : > { %v1416_v19 = vpop.f32.mrf.mxu1  ;;  %vm1370_vm6 = vcmp.lt.s32.totalorder %v1369_v47, %v3662_v27  ;;  %vm1371_vm8 = vcmp.lt.s32.totalorder %v1369_v47, %v3677_v25 }
 0x665   : > { %v1435_v4 = vadd.f32 %v1416_v19, %v3616_v52  ;;  %v1421_v29 = vadd.f32 %v1416_v19, %v3591_v16  ;;  %3181 = vpow2.f32 %v2815_v60  ;;  %v1474_v2 = vsel %vm1370_vm6, 1, %v3339_v54 }
 0x666   : > { %v3007_v0 = vpop.f32.mrf.mxu1  ;;  %v1475_v31 = vsel %vm1371_vm8, 1, %v3339_v54 }
 0x667   : > { %1440 = vrot.lane.b32.xlu0 %v1435_v4, %s3337_s14  ;;  %v2816_v58 = vmul.f32 -1.442695, %v1421_v29  ;;  %v1356_v0 = vsel %vm1252_vm5, 1, %v3339_v54 }
 0x669   : > { %3183 = vpow2.f32 %v2816_v58 }
 0x66a   : > { %v3178_v28 = vpop.eup %3177 }
 0x66b   : > { %v1310_v15 = vadd.f32 1.0, %v3178_v28 }
 0x66d   : > { %3185 = vrcp.f32 %v1310_v15 }
 0x66e   : > { %v3180_v37 = vpop.eup %3179 }
 0x66f   : > { %v1311_v38 = vadd.f32 1.0, %v3180_v37 }
 0x671   : > { %3187 = vrcp.f32 %v1311_v38 }
 0x672   : > { %v3182_v44 = vpop.eup %3181 }
 0x673   : > { %v1428_v23 = vadd.f32 1.0, %v3182_v44 }
 0x675   : > { %3189 = vrcp.f32 %v1428_v23 }
 0x676   : > { %v3184_v33 = vpop.eup %3183 }
 0x677   : > { %v1429_v62 = vadd.f32 1.0, %v3184_v33 }
 0x679   : > { %3191 = vrcp.f32 %v1429_v62 }
 0x67a   : > { %v3186_v21 = vpop.eup %3185 }
 0x67e   : > { %v3188_v8 = vpop.eup %3187 }
 0x67f   : > { %v1341_v36 = vsub.f32 1.0, %v3188_v8  ;;  %v1353_v47 = vmul.f32 %v3188_v8, %v3787_v35 }
 0x682   : > { %v3836_v43 = vpop.eup %3189 }
 0x686   : > { %v3841_v19 = vpop.eup %3191 }
 0x6cd   : > { %v1321_v50 = vpop.permute.xlu1 %1320 }
 0x6ce   : > { %v1326_v10 = vmul.f32 %v3186_v21, %v1321_v50  ;;  %v1340_v50 = vsub.f32 1.0, %v3186_v21 }
 0x6d0   : > { %1330 = vrot.lane.b32.xlu1 %v1326_v10, %s3337_s14 }
 0x6d1   : > { %v1323_v18 = vpop.permute.xlu0 %1322 }
 0x6d2   : > { %v1327_v17 = vmul.f32 %v3188_v8, %v1323_v18  ;;  %v1470_v8 = vmul.f32 %v3836_v43, %v3798_v13 }
 0x6d4   : > { %1332 = vrot.lane.b32.xlu0 %v1327_v17, %s3337_s14  ;;  %v1352_v17 = vmul.f32 %v3186_v21, %v3784_v6 }
 0x6d5   : > { %v1439_v11 = vpop.permute.xlu1 %1438 }
 0x6d6   : > { %v1444_v56 = vmul.f32 %v3836_v43, %v1439_v11 }
 0x6d8   : > { %1448 = vrot.lane.b32.xlu1 %v1444_v56, %s3337_s14 }
 0x6d9   : > { %v1441_v4 = vpop.permute.xlu0 %1440 }
 0x6da   : > { %v1445_v30 = vmul.f32 %v3841_v19, %v1441_v4 }
 0x6dc   : > { %1359 = vperm.xlu1 %3104, %v1356_v0   ;;  %1450 = vrot.lane.b32.xlu0 %v1445_v30, %s3337_s14  ;;  %v1458_v30 = vsub.f32 1.0, %v3836_v43 }
 0x6e0   : > { %1477 = vperm.xlu1 %3104, %v1474_v2   ;;  %1362 = vperm.xlu0 %3103, %v1357_v40  }
 0x6e4   : > { %1480 = vperm.xlu0 %3103, %v1475_v31  }
 0x742   : > { %v1331_v34 = vpop.permute.xlu1 %1330 }
 0x743   : > { %v1336_v60 = vadd.f32 %v1331_v34, %v3558_v55 }
 0x745   : > { %3193 = vtanh.f32 %v1336_v60  ;;  %v1459_v60 = vsub.f32 1.0, %v3841_v19 }
 0x746   : > { %v1333_v29 = vpop.permute.xlu0 %1332 }
 0x747   : > { %v1337_v58 = vadd.f32 %v1333_v29, %v3570_v63 }
 0x749   : > { %3195 = vtanh.f32 %v1337_v58 }
 0x74a   : > { %v1449_v28 = vpop.permute.xlu1 %1448 }
 0x74b   : > { %v1454_v15 = vadd.f32 %v1449_v28, %v3579_v5  ;;  %v1471_v28 = vmul.f32 %v3841_v19, %v3801_v45  ;;  %v3890_v19 = vld [vmem:[%s4320_s4 + $0x8] sm:$0xff]  }
 0x74d   : > { %3197 = vtanh.f32 %v1454_v15 }
 0x74e   : > { %v1451_v37 = vpop.permute.xlu0 %1450 }
 0x74f   : > { %v1455_v38 = vadd.f32 %v1451_v37, %v3591_v16 }
 0x751   : > { %3199 = vtanh.f32 %v1455_v38 }
 0x752   : > { %v3194_v44 = vpop.eup %3193 }
 0x753   : > { %1344 = vrot.lane.b32.xlu1 %v3194_v44, %s3341_s29  ;;  %v3907_v44 = vld [vmem:[%s4320_s4 + $0x18] sm:$0xff]  }
 0x756   : > { %v3196_v23 = vpop.eup %3195 }
 0x757   : > { %1346 = vrot.lane.b32.xlu0 %v3196_v23, %s3341_s29  ;;  %v1360_v63 = vpop.permute.xlu1 %1359  ;;  %v3916_v23 = vld [vmem:[%s4320_s4 + $0x10] sm:$0xff]  }
 0x758   : > { %vm1364_vm9 = vcmp.eq.s32.totalorder %v1360_v63, 1 }
 0x75a   : > { %v3198_v55 = vpop.eup %3197 }
 0x75b   : > { %1462 = vrot.lane.b32.xlu1 %v3198_v55, %s3341_s29  ;;  %v1363_v62 = vpop.permute.xlu0 %1362  ;;  %v1478_v5 = vpop.permute.xlu1 %1477 }
 0x75c   : > { %vm1365_vm10 = vcmp.eq.s32.totalorder %v1363_v62, 1  ;;  %vm1482_vm11 = vcmp.eq.s32.totalorder %v1478_v5, 1 }
 0x75e   : > { %v3200_v33 = vpop.eup %3199 }
 0x75f   : > { %1464 = vrot.lane.b32.xlu0 %v3200_v33, %s3341_s29  ;;  %v1481_v10 = vpop.permute.xlu0 %1480 }
 0x760   : > { %vm1483_vm12 = vcmp.eq.s32.totalorder %v1481_v10, 1 }
 0x7c5   : > { %v1345_v18 = vpop.permute.xlu1 %1344 }
 0x7c6   : > { %v1350_v16 = vmul.f32 %v1345_v18, %v1340_v50 }
 0x7c8   : > { %v1354_v56 = vadd.f32 %v1352_v17, %v1350_v16 }
 0x7c9   : > { %v1347_v11 = vpop.permute.xlu0 %1346 }
 0x7ca   : > { %v1351_v4 = vmul.f32 %v1347_v11, %v1341_v36  ;;  %v3864_v31 = vsel %vm1364_vm9, %v1354_v56, %v3784_v6 }
 0x7cc   : > { %v1355_v0 = vadd.f32 %v1353_v47, %v1351_v4 }
 0x7cd   : > { %v1463_v2 = vpop.permute.xlu1 %1462 }
 0x7ce   : > { %v1468_v40 = vmul.f32 %v1463_v2, %v1458_v30  ;;  %v3867_v34 = vsel %vm1365_vm10, %v1355_v0, %v3787_v35 }
 0x7cf   : > { %v1490_v21 = vpack.c.bf16 %v3867_v34, %v3864_v31 }
 0x7d0   : > { %v1472_v58 = vadd.f32 %v1470_v8, %v1468_v40 }
 0x7d1   : > { %1492 = vrot.lane.b32.xlu1 %v1490_v21, %s3341_s29  ;;  %v1465_v29 = vpop.permute.xlu0 %1464 }
 0x7d2   : > { %v1469_v6 = vmul.f32 %v1465_v29, %v1459_v60  ;;  %v3878_v35 = vsel %vm1482_vm11, %v1472_v58, %v3798_v13  ;;  %v3899_v13 = vld [vmem:[%s4320_s4] sm:$0xff]  }
 0x7d4   : > { %v1473_v15 = vadd.f32 %v1471_v28, %v1469_v6 }
 0x7d6   : > { %v3881_v37 = vsel %vm1483_vm12, %v1473_v15, %v3801_v45 }
 0x7d7   : > { %v1608_v43 = vpack.c.bf16 %v3881_v37, %v3878_v35 }
 0x7d9   : > { %1610 = vrot.lane.b32.xlu0 %v1608_v43, %s3341_s29 }
 0x843   : > { %v1493_v38 = vpop.permute.xlu1 %1492 }
 0x844   : > { %3013 = vmatmul.mubr.msk.bf16.vlgmr.msra.gmra.mxu0 %vm408_vm1, %v1493_v38 }
 0x845   : > { %3025 = vmatpush3.bf16.msra.mxu0 %v3890_v19  ;;  %3028 = vmatprep.mubr.msk.bf16.mxu0 %vm3338_vm2, %v3336_v9 }
 0x846   : > { %3026 = vmatprep.subr.bf16.mxu0 %v3336_v9 }
 0x849   : > { %3027 = vmatpush3.bf16.msra.mxu0 %v3899_v13 }
 0x84a   : > { %3040 = vmatprep.subr.bf16.mxu0 %v3336_v9 }
 0x84b   : > { %v1611_v45 = vpop.permute.xlu0 %1610 }
 0x84c   : > { %3021 = vmatmul.mubr.msk.bf16.vlgmr.msra.gmra.mxu1 %vm408_vm1, %v1611_v45 }
 0x84d   : > { %3033 = vmatpush3.bf16.msra.mxu1 %v3907_v44  ;;  %3036 = vmatprep.mubr.msk.bf16.mxu1 %vm3338_vm2, %v3336_v9 }
 0x84e   : > { %3034 = vmatprep.subr.bf16.mxu1 %v3336_v9 }
 0x851   : > { %3035 = vmatpush3.bf16.msra.mxu1 %v3916_v23 }
 0x852   : > { %3048 = vmatprep.subr.bf16.mxu1 %v3336_v9 }
 0x904   : > { %v1531_v55 = vpop.f32.mrf.mxu0 }
 0x905   : > { %v1552_v33 = vadd.f32 %v1531_v55, %v3602_v26  ;;  %v1538_v56 = vadd.f32 %v1531_v55, %v3552_v51 }
 0x906   : > { %v3014_v63 = vpop.f32.mrf.mxu0 }
 0x907   : > { %1556 = vrot.lane.b32.xlu1 %v1552_v33, %s3337_s14  ;;  %v2818_v47 = vmul.f32 -1.442695, %v1538_v56 }
 0x908   : > { %v1534_v62 = vpop.f32.mrf.mxu0 }
 0x909   : > { %v1553_v5 = vadd.f32 %v1534_v62, %v3602_v26  ;;  %v1539_v4 = vadd.f32 %v1534_v62, %v3564_v59  ;;  %3201 = vpow2.f32 %v2818_v47 }
 0x90a   : > { %v3015_v50 = vpop.f32.mrf.mxu0 }
 0x90b   : > { %1558 = vrot.lane.b32.xlu0 %v1553_v5, %s3337_s14  ;;  %v2819_v0 = vmul.f32 -1.442695, %v1539_v4  ;;  %v1487_v5 = vstv %s1486_s22 }
 0x90c   : > { %v1649_v10 = vpop.f32.mrf.mxu1  ;;  %vm1488_vm13 = vcmp.lt.s32.totalorder %v1487_v5, %v3662_v27  ;;  %vm1489_vm15 = vcmp.lt.s32.totalorder %v1487_v5, %v3677_v25 }
 0x90d   : > { %v1670_v18 = vadd.f32 %v1649_v10, %v3616_v52  ;;  %v1656_v30 = vadd.f32 %v1649_v10, %v3585_v12  ;;  %3203 = vpow2.f32 %v2819_v0  ;;  %v1593_v4 = vsel %vm1489_vm15, 1, %v3339_v54 }
 0x90e   : > { %v3022_v16 = vpop.f32.mrf.mxu1 }
 0x90f   : > { %1674 = vrot.lane.b32.xlu1 %v1670_v18, %s3337_s14  ;;  %v2821_v2 = vmul.f32 -1.442695, %v1656_v30  ;;  %v1605_v16 = vstv %s1604_s23 }
 0x910   : > { %v1652_v17 = vpop.f32.mrf.mxu1  ;;  %vm1606_vm14 = vcmp.lt.s32.totalorder %v1605_v16, %v3662_v27  ;;  %vm1607_vm0 = vcmp.lt.s32.totalorder %v1605_v16, %v3677_v25 }
 0x911   : > { %v1671_v36 = vadd.f32 %v1652_v17, %v3616_v52  ;;  %v1657_v40 = vadd.f32 %v1652_v17, %v3597_v22  ;;  %3205 = vpow2.f32 %v2821_v2  ;;  %v1710_v47 = vsel %vm1606_vm14, 1, %v3339_v54 }
 0x912   : > { %v3023_v11 = vpop.f32.mrf.mxu1  ;;  %v1711_v0 = vsel %vm1607_vm0, 1, %v3339_v54 }
 0x913   : > { %1676 = vrot.lane.b32.xlu0 %v1671_v36, %s3337_s14  ;;  %v2822_v21 = vmul.f32 -1.442695, %v1657_v40  ;;  %v1592_v11 = vsel %vm1488_vm13, 1, %v3339_v54 }
 0x915   : > { %3207 = vpow2.f32 %v2822_v21 }
 0x916   : > { %v3202_v8 = vpop.eup %3201 }
 0x917   : > { %v1546_v60 = vadd.f32 1.0, %v3202_v8 }
 0x919   : > { %3209 = vrcp.f32 %v1546_v60 }
 0x91a   : > { %v3204_v29 = vpop.eup %3203 }
 0x91b   : > { %v1547_v58 = vadd.f32 1.0, %v3204_v29 }
 0x91d   : > { %3211 = vrcp.f32 %v1547_v58 }
 0x91e   : > { %v3206_v28 = vpop.eup %3205 }
 0x91f   : > { %v1664_v6 = vadd.f32 1.0, %v3206_v28 }
 0x921   : > { %3213 = vrcp.f32 %v1664_v6 }
 0x922   : > { %v3208_v15 = vpop.eup %3207 }
 0x923   : > { %v1665_v43 = vadd.f32 1.0, %v3208_v15 }
 0x925   : > { %3215 = vrcp.f32 %v1665_v43 }
 0x926   : > { %v3210_v38 = vpop.eup %3209 }
 0x927   : > { %v1576_v15 = vsub.f32 1.0, %v3210_v38 }
 0x92a   : > { %v3212_v33 = vpop.eup %3211 }
 0x92e   : > { %v3936_v50 = vpop.eup %3213 }
 0x932   : > { %v3941_v17 = vpop.eup %3215 }
 0x979   : > { %v1557_v45 = vpop.permute.xlu1 %1556 }
 0x97a   : > { %v1562_v55 = vmul.f32 %v3210_v38, %v1557_v45 }
 0x97c   : > { %1566 = vrot.lane.b32.xlu1 %v1562_v55, %s3337_s14  ;;  %v1588_v55 = vmul.f32 %v3210_v38, %v3864_v31 }
 0x97d   : > { %v1559_v63 = vpop.permute.xlu0 %1558 }
 0x97e   : > { %v1563_v62 = vmul.f32 %v3212_v33, %v1559_v63  ;;  %v1577_v63 = vsub.f32 1.0, %v3212_v33 }
 0x980   : > { %1568 = vrot.lane.b32.xlu0 %v1563_v62, %s3337_s14 }
 0x981   : > { %v1675_v10 = vpop.permute.xlu1 %1674 }
 0x982   : > { %v1680_v18 = vmul.f32 %v3936_v50, %v1675_v10  ;;  %v1589_v10 = vmul.f32 %v3212_v33, %v3867_v34  ;;  %v1706_v33 = vmul.f32 %v3936_v50, %v3878_v35 }
 0x984   : > { %1684 = vrot.lane.b32.xlu1 %v1680_v18, %s3337_s14 }
 0x985   : > { %v1677_v36 = vpop.permute.xlu0 %1676 }
 0x986   : > { %v1681_v56 = vmul.f32 %v3941_v17, %v1677_v36  ;;  %v1694_v36 = vsub.f32 1.0, %v3936_v50 }
 0x988   : > { %1595 = vperm.xlu1 %3104, %v1592_v11   ;;  %1686 = vrot.lane.b32.xlu0 %v1681_v56, %s3337_s14 }
 0x98c   : > { %1713 = vperm.xlu1 %3104, %v1710_v47   ;;  %1598 = vperm.xlu0 %3103, %v1593_v4  }
 0x990   : > { %1716 = vperm.xlu0 %3103, %v1711_v0   ;;  %v1695_v0 = vsub.f32 1.0, %v3941_v17 }
 0x9ee   : > { %v1567_v30 = vpop.permute.xlu1 %1566 }
 0x9ef   : > { %v1572_v2 = vadd.f32 %v1567_v30, %v3552_v51 }
 0x9f1   : > { %3217 = vtanh.f32 %v1572_v2 }
 0x9f2   : > { %v1569_v27 = vpop.permute.xlu0 %1568 }
 0x9f3   : > { %v1573_v40 = vadd.f32 %v1569_v27, %v3564_v59  ;;  %v1707_v27 = vmul.f32 %v3941_v17, %v3881_v37 }
 0x9f5   : > { %3219 = vtanh.f32 %v1573_v40 }
 0x9f6   : > { %v1685_v21 = vpop.permute.xlu1 %1684 }
 0x9f7   : > { %v1690_v8 = vadd.f32 %v1685_v21, %v3585_v12 }
 0x9f9   : > { %3221 = vtanh.f32 %v1690_v8 }
 0x9fa   : > { %v1687_v60 = vpop.permute.xlu0 %1686 }
 0x9fb   : > { %v1691_v25 = vadd.f32 %v1687_v60, %v3597_v22 }
 0x9fd   : > { %3223 = vtanh.f32 %v1691_v25 }
 0x9fe   : > { %v3218_v29 = vpop.eup %3217 }
 0x9ff   : > { %1580 = vrot.lane.b32.xlu1 %v3218_v29, %s3341_s29 }
 0xa02   : > { %v3220_v58 = vpop.eup %3219 }
 0xa03   : > { %1582 = vrot.lane.b32.xlu0 %v3220_v58, %s3341_s29  ;;  %v1596_v59 = vpop.permute.xlu1 %1595 }
 0xa04   : > { %vm1600_vm3 = vcmp.eq.s32.totalorder %v1596_v59, 1 }
 0xa06   : > { %v3222_v51 = vpop.eup %3221 }
 0xa07   : > { %1698 = vrot.lane.b32.xlu1 %v3222_v51, %s3341_s29  ;;  %v1599_v6 = vpop.permute.xlu0 %1598  ;;  %v1714_v12 = vpop.permute.xlu1 %1713 }
 0xa08   : > { %vm1601_vm4 = vcmp.eq.s32.totalorder %v1599_v6, 1  ;;  %vm1718_vm5 = vcmp.eq.s32.totalorder %v1714_v12, 1 }
 0xa0a   : > { %v3224_v28 = vpop.eup %3223 }
 0xa0b   : > { %1700 = vrot.lane.b32.xlu0 %v3224_v28, %s3341_s29  ;;  %v1717_v43 = vpop.permute.xlu0 %1716 }
 0xa0c   : > { %vm1719_vm6 = vcmp.eq.s32.totalorder %v1717_v43, 1 }
 0xa71   : > { %v1581_v45 = vpop.permute.xlu1 %1580 }
 0xa72   : > { %v1586_v22 = vmul.f32 %v1581_v45, %v1576_v15 }
 0xa74   : > { %v1590_v5 = vadd.f32 %v1588_v55, %v1586_v22 }
 0xa75   : > { %v1583_v62 = vpop.permute.xlu0 %1582 }
 0xa76   : > { %v1587_v18 = vmul.f32 %v1583_v62, %v1577_v63  ;;  %v3964_v47 = vsel %vm1600_vm3, %v1590_v5, %v3864_v31 }
 0xa78   : > { %v1591_v16 = vadd.f32 %v1589_v10, %v1587_v18 }
 0xa79   : > { %v1699_v11 = vpop.permute.xlu1 %1698 }
 0xa7a   : > { %v1704_v56 = vmul.f32 %v1699_v11, %v1694_v36  ;;  %v3967_v4 = vsel %vm1601_vm4, %v1591_v16, %v3867_v34 }
 0xa7b   : > { %v1726_v38 = vpack.c.bf16 %v3967_v4, %v3964_v47 }
 0xa7c   : > { %v1708_v2 = vadd.f32 %v1706_v33, %v1704_v56 }
 0xa7d   : > { %1728 = vrot.lane.b32.xlu1 %v1726_v38, %s3341_s29  ;;  %v1701_v30 = vpop.permute.xlu0 %1700 }
 0xa7e   : > { %v1705_v31 = vmul.f32 %v1701_v30, %v1695_v0  ;;  %v3978_v34 = vsel %vm1718_vm5, %v1708_v2, %v3878_v35 }
 0xa80   : > { %v1709_v40 = vadd.f32 %v1707_v27, %v1705_v31 }
 0xa82   : > { %v3981_v21 = vsel %vm1719_vm6, %v1709_v40, %v3881_v37 }
 0xa83   : > { %v1844_v50 = vpack.c.bf16 %v3981_v21, %v3978_v34 }
 0xa85   : > { %1846 = vrot.lane.b32.xlu0 %v1844_v50, %s3341_s29 }
 0xaef   : > { %v1729_v8 = vpop.permute.xlu1 %1728 }
 0xaf0   : > { %3029 = vmatmul.mubr.msk.bf16.vlgmr.msra.gmra.mxu0 %vm408_vm1, %v1729_v8  ;;  %v1723_v8 = vstv %s1722_s27 }
 0xaf1   : > { %3041 = vmatpush3.bf16.msra.mxu0 %v3890_v19  ;;  %3044 = vmatprep.mubr.msk.bf16.mxu0 %vm3338_vm2, %v3336_v9 }
 0xaf2   : > { %3042 = vmatprep.subr.bf16.mxu0 %v3336_v9 }
 0xaf5   : > { %3043 = vmatpush3.bf16.msra.mxu0 %v3899_v13 }
 0xaf6   : > { %3056 = vmatprep.subr.bf16.mxu0 %v3336_v9 }
 0xaf7   : > { %v1847_v35 = vpop.permute.xlu0 %1846 }
 0xaf8   : > { %3037 = vmatmul.mubr.msk.bf16.vlgmr.msra.gmra.mxu1 %vm408_vm1, %v1847_v35 }
 0xaf9   : > { %3049 = vmatpush3.bf16.msra.mxu1 %v3907_v44  ;;  %3052 = vmatprep.mubr.msk.bf16.mxu1 %vm3338_vm2, %v3336_v9 }
 0xafa   : > { %3050 = vmatprep.subr.bf16.mxu1 %v3336_v9 }
 0xafd   : > { %3051 = vmatpush3.bf16.msra.mxu1 %v3916_v23 }
 0xafe   : > { %3064 = vmatprep.subr.bf16.mxu1 %v3336_v9 }
 0xbb0   : > { %v1767_v37 = vpop.f32.mrf.mxu0 }
 0xbb1   : > { %v1788_v17 = vadd.f32 %v1767_v37, %v3602_v26  ;;  %v1774_v43 = vadd.f32 %v1767_v37, %v3582_v7 }
 0xbb2   : > { %v3030_v60 = vpop.f32.mrf.mxu0 }
 0xbb3   : > { %1792 = vrot.lane.b32.xlu1 %v1788_v17, %s3337_s14  ;;  %v2824_v45 = vmul.f32 -1.442695, %v1774_v43  ;;  %v4022_v60 = vld [vmem:[%s4316_s0] sm:$0xff] }
 0xbb4   : > { %v1770_v25 = vpop.f32.mrf.mxu0  ;;  %vm1724_vm7 = vcmp.lt.s32.totalorder %v1723_v8, %v4022_v60 }
 0xbb5   : > { %v1789_v29 = vadd.f32 %v1770_v25, %v3602_v26  ;;  %v1775_v22 = vadd.f32 %v1770_v25, %v3594_v20  ;;  %3225 = vpow2.f32 %v2824_v45  ;;  %v1841_v25 = vstv %s1840_s26 }
 0xbb6   : > { %v3031_v58 = vpop.f32.mrf.mxu0  ;;  %vm1842_vm8 = vcmp.lt.s32.totalorder %v1841_v25, %v4022_v60 }
 0xbb7   : > { %1794 = vrot.lane.b32.xlu0 %v1789_v29, %s3337_s14  ;;  %v2825_v55 = vmul.f32 -1.442695, %v1775_v22 }
 0xbb8   : > { %v1885_v51 = vpop.f32.mrf.mxu1 }
 0xbb9   : > { %v1906_v28 = vadd.f32 %v1885_v51, %v3616_v52  ;;  %v1892_v63 = vadd.f32 %v1885_v51, %v3555_v53  ;;  %3227 = vpow2.f32 %v2825_v55  ;;  %v1828_v51 = vsel %vm1724_vm7, 1, %v3339_v54 }
 0xbba   : > { %v3038_v59 = vpop.f32.mrf.mxu1 }
 0xbbb   : > { %1910 = vrot.lane.b32.xlu1 %v1906_v28, %s3337_s14  ;;  %v2827_v62 = vmul.f32 -1.442695, %v1892_v63  ;;  %v4034_v59 = vld [vmem:[%s4316_s0 + $0x8] sm:$0xff] }
 0xbbc   : > { %v1888_v6 = vpop.f32.mrf.mxu1  ;;  %vm1725_vm9 = vcmp.lt.s32.totalorder %v1723_v8, %v4034_v59  ;;  %vm1843_vm10 = vcmp.lt.s32.totalorder %v1841_v25, %v4034_v59 }
 0xbbd   : > { %v1907_v12 = vadd.f32 %v1888_v6, %v3616_v52  ;;  %v1893_v5 = vadd.f32 %v1888_v6, %v3567_v61  ;;  %3229 = vpow2.f32 %v2827_v62  ;;  %v1946_v6 = vsel %vm1842_vm8, 1, %v3339_v54 }
 0xbbe   : > { %v3039_v15 = vpop.f32.mrf.mxu1 }
 0xbbf   : > { %1912 = vrot.lane.b32.xlu0 %v1907_v12, %s3337_s14  ;;  %v2828_v10 = vmul.f32 -1.442695, %v1893_v5  ;;  %v1829_v12 = vsel %vm1725_vm9, 1, %v3339_v54  ;;  %v1947_v15 = vsel %vm1843_vm10, 1, %v3339_v54 }
 0xbc1   : > { %3231 = vpow2.f32 %v2828_v10 }
 0xbc2   : > { %v3226_v18 = vpop.eup %3225 }
 0xbc3   : > { %v1782_v16 = vadd.f32 1.0, %v3226_v18 }
 0xbc5   : > { %3233 = vrcp.f32 %v1782_v16 }
 0xbc6   : > { %v3228_v36 = vpop.eup %3227 }
 0xbc7   : > { %v1783_v11 = vadd.f32 1.0, %v3228_v36 }
 0xbc9   : > { %3235 = vrcp.f32 %v1783_v11 }
 0xbca   : > { %v3230_v56 = vpop.eup %3229 }
 0xbcb   : > { %v1900_v38 = vadd.f32 1.0, %v3230_v56 }
 0xbcd   : > { %3237 = vrcp.f32 %v1900_v38 }
 0xbce   : > { %v3232_v33 = vpop.eup %3231 }
 0xbcf   : > { %v1901_v0 = vadd.f32 1.0, %v3232_v33 }
 0xbd1   : > { %3239 = vrcp.f32 %v1901_v0 }
 0xbd2   : > { %v3234_v30 = vpop.eup %3233 }
 0xbd3   : > { %v1812_v56 = vsub.f32 1.0, %v3234_v30  ;;  %v1824_v0 = vmul.f32 %v3234_v30, %v3964_v47 }
 0xbd6   : > { %v3236_v31 = vpop.eup %3235 }
 0xbda   : > { %v4016_v35 = vpop.eup %3237 }
 0xbde   : > { %v4026_v29 = vpop.eup %3239 }
 0xc25   : > { %v1793_v2 = vpop.permute.xlu1 %1792 }
 0xc26   : > { %v1798_v27 = vmul.f32 %v3234_v30, %v1793_v2  ;;  %v1813_v2 = vsub.f32 1.0, %v3236_v31 }
 0xc28   : > { %1802 = vrot.lane.b32.xlu1 %v1798_v27, %s3337_s14 }
 0xc29   : > { %v1795_v40 = vpop.permute.xlu0 %1794 }
 0xc2a   : > { %v1799_v50 = vmul.f32 %v3236_v31, %v1795_v40 }
 0xc2c   : > { %1804 = vrot.lane.b32.xlu0 %v1799_v50, %s3337_s14  ;;  %v1825_v50 = vmul.f32 %v3236_v31, %v3967_v4  ;;  %v1942_v31 = vmul.f32 %v4016_v35, %v3978_v34 }
 0xc2d   : > { %v1911_v37 = vpop.permute.xlu1 %1910 }
 0xc2e   : > { %v1916_v17 = vmul.f32 %v4016_v35, %v1911_v37 }
 0xc30   : > { %1920 = vrot.lane.b32.xlu1 %v1916_v17, %s3337_s14  ;;  %v1930_v17 = vsub.f32 1.0, %v4016_v35 }
 0xc31   : > { %v1913_v58 = vpop.permute.xlu0 %1912 }
 0xc32   : > { %v1917_v28 = vmul.f32 %v4026_v29, %v1913_v58 }
 0xc34   : > { %1831 = vperm.xlu1 %3104, %v1828_v51   ;;  %1922 = vrot.lane.b32.xlu0 %v1917_v28, %s3337_s14 }
 0xc38   : > { %1949 = vperm.xlu1 %3104, %v1946_v6   ;;  %1834 = vperm.xlu0 %3103, %v1829_v12   ;;  %v1931_v6 = vsub.f32 1.0, %v4026_v29 }
 0xc3c   : > { %1952 = vperm.xlu0 %3103, %v1947_v15  }
 0xc9a   : > { %v1803_v43 = vpop.permute.xlu1 %1802 }
 0xc9b   : > { %v1808_v45 = vadd.f32 %v1803_v43, %v3582_v7  ;;  %v1943_v43 = vmul.f32 %v4026_v29, %v3981_v21 }
 0xc9d   : > { %3241 = vtanh.f32 %v1808_v45 }
 0xc9e   : > { %v1805_v22 = vpop.permute.xlu0 %1804 }
 0xc9f   : > { %v1809_v55 = vadd.f32 %v1805_v22, %v3594_v20 }
 0xca1   : > { %3243 = vtanh.f32 %v1809_v55 }
 0xca2   : > { %v1921_v63 = vpop.permute.xlu1 %1920 }
 0xca3   : > { %v1926_v62 = vadd.f32 %v1921_v63, %v3555_v53 }
 0xca5   : > { %3245 = vtanh.f32 %v1926_v62 }
 0xca6   : > { %v1923_v5 = vpop.permute.xlu0 %1922 }
 0xca7   : > { %v1927_v10 = vadd.f32 %v1923_v5, %v3567_v61 }
 0xca9   : > { %3247 = vtanh.f32 %v1927_v10 }
 0xcaa   : > { %v3242_v18 = vpop.eup %3241 }
 0xcab   : > { %1816 = vrot.lane.b32.xlu1 %v3242_v18, %s3341_s29 }
 0xcae   : > { %v3244_v16 = vpop.eup %3243 }
 0xcaf   : > { %1818 = vrot.lane.b32.xlu0 %v3244_v16, %s3341_s29  ;;  %v1832_v20 = vpop.permute.xlu1 %1831 }
 0xcb0   : > { %vm1836_vm11 = vcmp.eq.s32.totalorder %v1832_v20, 1 }
 0xcb2   : > { %v3246_v7 = vpop.eup %3245 }
 0xcb3   : > { %1934 = vrot.lane.b32.xlu1 %v3246_v7, %s3341_s29  ;;  %v1835_v11 = vpop.permute.xlu0 %1834  ;;  %v1950_v53 = vpop.permute.xlu1 %1949 }
 0xcb4   : > { %vm1837_vm12 = vcmp.eq.s32.totalorder %v1835_v11, 1  ;;  %vm1954_vm13 = vcmp.eq.s32.totalorder %v1950_v53, 1 }
 0xcb6   : > { %v3248_v36 = vpop.eup %3247 }
 0xcb7   : > { %1936 = vrot.lane.b32.xlu0 %v3248_v36, %s3341_s29  ;;  %v1953_v38 = vpop.permute.xlu0 %1952 }
 0xcb8   : > { %vm1955_vm14 = vcmp.eq.s32.totalorder %v1953_v38, 1 }
 0xd1d   : > { %v1817_v33 = vpop.permute.xlu1 %1816 }
 0xd1e   : > { %v1822_v61 = vmul.f32 %v1817_v33, %v1812_v56 }
 0xd20   : > { %v1826_v40 = vadd.f32 %v1824_v0, %v1822_v61 }
 0xd21   : > { %v1819_v27 = vpop.permute.xlu0 %1818 }
 0xd22   : > { %v1823_v8 = vmul.f32 %v1819_v27, %v1813_v2  ;;  %v4054_v51 = vsel %vm1836_vm11, %v1826_v40, %v3964_v47 }
 0xd24   : > { %v1827_v37 = vadd.f32 %v1825_v50, %v1823_v8 }
 0xd25   : > { %v1935_v25 = vpop.permute.xlu1 %1934 }
 0xd26   : > { %v1940_v58 = vmul.f32 %v1935_v25, %v1930_v17  ;;  %v4057_v28 = vsel %vm1837_vm12, %v1827_v37, %v3967_v4 }
 0xd27   : > { %v1962_v30 = vpack.c.bf16 %v4057_v28, %v4054_v51 }
 0xd28   : > { %v1944_v15 = vadd.f32 %v1942_v31, %v1940_v58 }
 0xd29   : > { %1964 = vrot.lane.b32.xlu1 %v1962_v30, %s3341_s29  ;;  %v1937_v12 = vpop.permute.xlu0 %1936 }
 0xd2a   : > { %v1941_v47 = vmul.f32 %v1937_v12, %v1931_v6  ;;  %v4068_v4 = vsel %vm1954_vm13, %v1944_v15, %v3978_v34 }
 0xd2c   : > { %v1945_v45 = vadd.f32 %v1943_v43, %v1941_v47 }
 0xd2e   : > { %v4071_v22 = vsel %vm1955_vm14, %v1945_v45, %v3981_v21  ;;  %v1959_v45 = vstv %s1958_s11 }
 0xd2f   : > { %v2080_v35 = vpack.c.bf16 %v4071_v22, %v4068_v4  ;;  %vm1960_vm15 = vcmp.lt.s32.totalorder %v1959_v45, %v4022_v60  ;;  %vm1961_vm3 = vcmp.lt.s32.totalorder %v1959_v45, %v4034_v59 }
 0xd31   : > { %2082 = vrot.lane.b32.xlu0 %v2080_v35, %s3341_s29 }
 0xd9b   : > { %v1965_v55 = vpop.permute.xlu1 %1964 }
 0xd9c   : > { %3045 = vmatmul.mubr.msk.bf16.vlgmr.msra.gmra.mxu0 %vm408_vm1, %v1965_v55 }
 0xd9d   : > { %3057 = vmatpush3.bf16.msra.mxu0 %v3890_v19  ;;  %3060 = vmatprep.mubr.msk.bf16.mxu0 %vm3338_vm2, %v3336_v9 }
 0xd9e   : > { %3058 = vmatprep.subr.bf16.mxu0 %v3336_v9 }
 0xda1   : > { %3059 = vmatpush3.bf16.msra.mxu0 %v3899_v13 }
 0xda2   : > { %3072 = vmatprep.subr.bf16.mxu0 %v3336_v9 }
 0xda3   : > { %v2083_v34 = vpop.permute.xlu0 %2082 }
 0xda4   : > { %3053 = vmatmul.mubr.msk.bf16.vlgmr.msra.gmra.mxu1 %vm408_vm1, %v2083_v34 }
 0xda5   : > { %3065 = vmatpush3.bf16.msra.mxu1 %v3907_v44  ;;  %3068 = vmatprep.mubr.msk.bf16.mxu1 %vm3338_vm2, %v3336_v9 }
 0xda6   : > { %3066 = vmatprep.subr.bf16.mxu1 %v3336_v9 }
 0xda9   : > { %3067 = vmatpush3.bf16.msra.mxu1 %v3916_v23 }
 0xdaa   : > { %3080 = vmatprep.subr.bf16.mxu1 %v3336_v9 }
 0xe5c   : > { %v2003_v21 = vpop.f32.mrf.mxu0 }
 0xe5d   : > { %v2024_v29 = vadd.f32 %v2003_v21, %v3602_v26  ;;  %v2010_v53 = vadd.f32 %v2003_v21, %v3576_v3  ;;  %v2077_v21 = vstv %s2076_s12 }
 0xe5e   : > { %v3046_v63 = vpop.f32.mrf.mxu0  ;;  %vm2078_vm0 = vcmp.lt.s32.totalorder %v2077_v21, %v4022_v60  ;;  %vm2079_vm4 = vcmp.lt.s32.totalorder %v2077_v21, %v4034_v59 }
 0xe5f   : > { %2028 = vrot.lane.b32.xlu1 %v2024_v29, %s3337_s14  ;;  %v2830_v56 = vmul.f32 -1.442695, %v2010_v53 }
 0xe60   : > { %v2006_v62 = vpop.f32.mrf.mxu0 }
 0xe61   : > { %v2025_v5 = vadd.f32 %v2006_v62, %v3602_v26  ;;  %v2011_v38 = vadd.f32 %v2006_v62, %v3588_v14  ;;  %3249 = vpow2.f32 %v2830_v56  ;;  %v2064_v62 = vsel %vm1960_vm15, 1, %v3339_v54 }
 0xe62   : > { %v3047_v10 = vpop.f32.mrf.mxu0 }
 0xe63   : > { %2030 = vrot.lane.b32.xlu0 %v2025_v5, %s3337_s14  ;;  %v2831_v33 = vmul.f32 -1.442695, %v2011_v38  ;;  %v2182_v10 = vsel %vm2078_vm0, 1, %v3339_v54 }
 0xe64   : > { %v2121_v18 = vpop.f32.mrf.mxu1 }
 0xe65   : > { %v2142_v16 = vadd.f32 %v2121_v18, %v3616_v52  ;;  %v2128_v61 = vadd.f32 %v2121_v18, %v3561_v57  ;;  %3251 = vpow2.f32 %v2831_v33  ;;  %v2065_v18 = vsel %vm1961_vm3, 1, %v3339_v54 }
 0xe66   : > { %v3054_v7 = vpop.f32.mrf.mxu1 }
 0xe67   : > { %2146 = vrot.lane.b32.xlu1 %v2142_v16, %s3337_s14  ;;  %v2833_v0 = vmul.f32 -1.442695, %v2128_v61  ;;  %v2183_v16 = vsel %vm2079_vm4, 1, %v3339_v54 }
 0xe68   : > { %v2124_v36 = vpop.f32.mrf.mxu1 }
 0xe69   : > { %v2143_v20 = vadd.f32 %v2124_v36, %v3616_v52  ;;  %v2129_v2 = vadd.f32 %v2124_v36, %v3573_v1  ;;  %3253 = vpow2.f32 %v2833_v0 }
 0xe6a   : > { %v3055_v11 = vpop.f32.mrf.mxu1 }
 0xe6b   : > { %2148 = vrot.lane.b32.xlu0 %v2143_v20, %s3337_s14  ;;  %v2834_v27 = vmul.f32 -1.442695, %v2129_v2 }
 0xe6d   : > { %3255 = vpow2.f32 %v2834_v27 }
 0xe6e   : > { %v3250_v40 = vpop.eup %3249 }
 0xe6f   : > { %v2018_v50 = vadd.f32 1.0, %v3250_v40 }
 0xe71   : > { %3257 = vrcp.f32 %v2018_v50 }
 0xe72   : > { %v3252_v8 = vpop.eup %3251 }
 0xe73   : > { %v2019_v37 = vadd.f32 1.0, %v3252_v8 }
 0xe75   : > { %3259 = vrcp.f32 %v2019_v37 }
 0xe76   : > { %v3254_v17 = vpop.eup %3253 }
 0xe77   : > { %v2136_v25 = vadd.f32 1.0, %v3254_v17 }
 0xe79   : > { %3261 = vrcp.f32 %v2136_v25 }
 0xe7a   : > { %v3256_v58 = vpop.eup %3255 }
 0xe7b   : > { %v2137_v30 = vadd.f32 1.0, %v3256_v58 }
 0xe7d   : > { %3263 = vrcp.f32 %v2137_v30 }
 0xe7e   : > { %v3258_v31 = vpop.eup %3257 }
 0xe7f   : > { %v2048_v40 = vsub.f32 1.0, %v3258_v31  ;;  %v2060_v37 = vmul.f32 %v3258_v31, %v4054_v51 }
 0xe82   : > { %v3260_v15 = vpop.eup %3259 }
 0xe83   : > { %v2049_v17 = vsub.f32 1.0, %v3260_v15  ;;  %v2061_v30 = vmul.f32 %v3260_v15, %v4057_v28 }
 0xe86   : > { %v4106_v35 = vpop.eup %3261 }
 0xe8a   : > { %v4111_v29 = vpop.eup %3263 }
 0xe8b   : > { %v2167_v21 = vsub.f32 1.0, %v4111_v29 }
 0xed1   : > { %v2029_v6 = vpop.permute.xlu1 %2028 }
 0xed2   : > { %v2034_v12 = vmul.f32 %v3258_v31, %v2029_v6 }
 0xed4   : > { %2038 = vrot.lane.b32.xlu1 %v2034_v12, %s3337_s14 }
 0xed5   : > { %v2031_v43 = vpop.permute.xlu0 %2030 }
 0xed6   : > { %v2035_v47 = vmul.f32 %v3260_v15, %v2031_v43  ;;  %v2166_v43 = vsub.f32 1.0, %v4106_v35  ;;  %v2178_v15 = vmul.f32 %v4106_v35, %v4068_v4 }
 0xed8   : > { %2040 = vrot.lane.b32.xlu0 %v2035_v47, %s3337_s14 }
 0xed9   : > { %v2147_v55 = vpop.permute.xlu1 %2146 }
 0xeda   : > { %v2152_v34 = vmul.f32 %v4106_v35, %v2147_v55 }
 0xedc   : > { %2156 = vrot.lane.b32.xlu1 %v2152_v34, %s3337_s14 }
 0xedd   : > { %v2149_v63 = vpop.permute.xlu0 %2148 }
 0xede   : > { %v2153_v5 = vmul.f32 %v4111_v29, %v2149_v63 }
 0xee0   : > { %2067 = vperm.xlu1 %3104, %v2064_v62   ;;  %2158 = vrot.lane.b32.xlu0 %v2153_v5, %s3337_s14 }
 0xee4   : > { %2185 = vperm.xlu1 %3104, %v2182_v10   ;;  %2070 = vperm.xlu0 %3103, %v2065_v18  }
 0xee8   : > { %2188 = vperm.xlu0 %3103, %v2183_v16  }
 0xf46   : > { %v2039_v7 = vpop.permute.xlu1 %2038 }
 0xf47   : > { %v2044_v36 = vadd.f32 %v2039_v7, %v3576_v3 }
 0xf49   : > { %3265 = vtanh.f32 %v2044_v36 }
 0xf4a   : > { %v2041_v20 = vpop.permute.xlu0 %2040 }
 0xf4b   : > { %v2045_v11 = vadd.f32 %v2041_v20, %v3588_v14 }
 0xf4d   : > { %3267 = vtanh.f32 %v2045_v11 }
 0xf4e   : > { %v2157_v53 = vpop.permute.xlu1 %2156 }
 0xf4f   : > { %v2162_v56 = vadd.f32 %v2157_v53, %v3561_v57 }
 0xf51   : > { %3269 = vtanh.f32 %v2162_v56 }
 0xf52   : > { %v2159_v38 = vpop.permute.xlu0 %2158 }
 0xf53   : > { %v2163_v33 = vadd.f32 %v2159_v38, %v3573_v1 }
 0xf55   : > { %3271 = vtanh.f32 %v2163_v33 }
 0xf56   : > { %v3266_v61 = vpop.eup %3265 }
 0xf57   : > { %2052 = vrot.lane.b32.xlu1 %v3266_v61, %s3341_s29 }
 0xf5a   : > { %v3268_v0 = vpop.eup %3267 }
 0xf5b   : > { %2054 = vrot.lane.b32.xlu0 %v3268_v0, %s3341_s29  ;;  %v2068_v14 = vpop.permute.xlu1 %2067 }
 0xf5c   : > { %vm2072_vm5 = vcmp.eq.s32.totalorder %v2068_v14, 1 }
 0xf5e   : > { %v3270_v3 = vpop.eup %3269 }
 0xf5f   : > { %2170 = vrot.lane.b32.xlu1 %v3270_v3, %s3341_s29  ;;  %v2071_v27 = vpop.permute.xlu0 %2070  ;;  %v2186_v57 = vpop.permute.xlu1 %2185 }
 0xf60   : > { %vm2073_vm6 = vcmp.eq.s32.totalorder %v2071_v27, 1  ;;  %vm2190_vm7 = vcmp.eq.s32.totalorder %v2186_v57, 1 }
 0xf62   : > { %v3272_v2 = vpop.eup %3271 }
 0xf63   : > { %2172 = vrot.lane.b32.xlu0 %v3272_v2, %s3341_s29  ;;  %v2189_v50 = vpop.permute.xlu0 %2188 }
 0xf64   : > { %vm2191_vm8 = vcmp.eq.s32.totalorder %v2189_v50, 1 }
 0xfc9   : > { %v2053_v8 = vpop.permute.xlu1 %2052 }
 0xfca   : > { %v2058_v1 = vmul.f32 %v2053_v8, %v2048_v40 }
 0xfcc   : > { %v2062_v58 = vadd.f32 %v2060_v37, %v2058_v1 }
 0xfcd   : > { %v2055_v25 = vpop.permute.xlu0 %2054 }
 0xfce   : > { %v2059_v6 = vmul.f32 %v2055_v25, %v2049_v17  ;;  %v4134_v45 = vsel %vm2072_vm5, %v2062_v58, %v4054_v51  ;;  %v2179_v51 = vmul.f32 %v4111_v29, %v4071_v22 }
 0xfd0   : > { %v2063_v12 = vadd.f32 %v2061_v30, %v2059_v6 }
 0xfd1   : > { %v2171_v47 = vpop.permute.xlu1 %2170 }
 0xfd2   : > { %v4137_v55 = vsel %vm2073_vm6, %v2063_v12, %v4057_v28  ;;  %v2176_v34 = vmul.f32 %v2171_v47, %v2166_v43  ;;  %v2195_v47 = vstv %s2194_s15 }
 0xfd3   : > { %v2198_v31 = vpack.c.bf16 %v4137_v55, %v4134_v45  ;;  %vm2197_vm10 = vcmp.lt.s32.totalorder %v2195_v47, %v4034_v59 }
 0xfd4   : > { %v2180_v62 = vadd.f32 %v2178_v15, %v2176_v34 }
 0xfd5   : > { %2200 = vrot.lane.b32.xlu1 %v2198_v31, %s3341_s29  ;;  %v2173_v63 = vpop.permute.xlu0 %2172 }
 0xfd6   : > { %v2177_v5 = vmul.f32 %v2173_v63, %v2167_v21  ;;  %v4148_v28 = vsel %vm2190_vm7, %v2180_v62, %v4068_v4  ;;  %v2313_v21 = vstv %s2312_s16 }
 0xfd7   : > { %vm2314_vm9 = vcmp.lt.s32.totalorder %v2313_v21, %v4022_v60  ;;  %vm2315_vm11 = vcmp.lt.s32.totalorder %v2313_v21, %v4034_v59 }
 0xfd8   : > { %v2181_v10 = vadd.f32 %v2179_v51, %v2177_v5 }
 0xfda   : > { %v4151_v18 = vsel %vm2191_vm8, %v2181_v10, %v4071_v22  ;;  %v2418_v10 = vsel %vm2314_vm9, 1, %v3339_v54 }
 0xfdb   : > { %v2316_v35 = vpack.c.bf16 %v4151_v18, %v4148_v28 }
 0xfdd   : > { %2318 = vrot.lane.b32.xlu0 %v2316_v35, %s3341_s29  ;;  %v2301_v35 = vsel %vm2197_vm10, 1, %v3339_v54 }
0x1047   : > { %v2201_v16 = vpop.permute.xlu1 %2200 }
0x1048   : > { %3061 = vmatmul.mubr.msk.bf16.vlgmr.msra.gmra.mxu0 %vm408_vm1, %v2201_v16  ;;  %v2419_v16 = vsel %vm2315_vm11, 1, %v3339_v54 }
0x1049   : > { %3073 = vmatpush3.bf16.msra.mxu0 %v3890_v19  ;;  %3076 = vmatprep.mubr.msk.bf16.mxu0 %vm3338_vm2, %v3336_v9 }
0x104a   : > { %3074 = vmatprep.subr.bf16.mxu0 %v3336_v9 }
0x104d   : > { %3075 = vmatpush3.bf16.msra.mxu0 %v3899_v13 }
0x104f   : > { %v2319_v4 = vpop.permute.xlu0 %2318 }
0x1050   : > { %3069 = vmatmul.mubr.msk.bf16.vlgmr.msra.gmra.mxu1 %vm408_vm1, %v2319_v4 }
0x1051   : > { %3081 = vmatpush3.bf16.msra.mxu1 %v3907_v44  ;;  %3084 = vmatprep.mubr.msk.bf16.mxu1 %vm3338_vm2, %v3336_v9  ;;  %vm2196_vm2 = vcmp.lt.s32.totalorder %v2195_v47, %v4022_v60 }
0x1052   : > { %3082 = vmatprep.subr.bf16.mxu1 %v3336_v9  ;;  %v2300_v51 = vsel %vm2196_vm2, 1, %v3339_v54 }
0x1055   : > { %3083 = vmatpush3.bf16.msra.mxu1 %v3916_v23 }
0x1108   : > { %v2239_v19 = vpop.f32.mrf.mxu0 }
0x1109   : > { %v2260_v22 = vadd.f32 %v2239_v19, %v3602_v26  ;;  %v2246_v56 = vadd.f32 %v2239_v19, %v3605_v32 }
0x110a   : > { %v3062_v29 = vpop.f32.mrf.mxu0 }
0x110b   : > { %2264 = vrot.lane.b32.xlu1 %v2260_v22, %s3337_s14  ;;  %v2836_v38 = vmul.f32 -1.442695, %v2246_v56 }
0x110c   : > { %v2242_v7 = vpop.f32.mrf.mxu0 }
0x110d   : > { %v2261_v13 = vadd.f32 %v2242_v7, %v3602_v26  ;;  %v2247_v33 = vadd.f32 %v2242_v7, %v3614_v48  ;;  %3273 = vpow2.f32 %v2836_v38 }
0x110e   : > { %v3063_v36 = vpop.f32.mrf.mxu0 }
0x110f   : > { %2266 = vrot.lane.b32.xlu0 %v2261_v13, %s3337_s14  ;;  %v2837_v61 = vmul.f32 -1.442695, %v2247_v33 }
0x1110   : > { %v2357_v44 = vpop.f32.mrf.mxu1 }
0x1111   : > { %v2378_v20 = vadd.f32 %v2357_v44, %v3616_v52  ;;  %v2364_v0 = vadd.f32 %v2357_v44, %v3533_v39  ;;  %3275 = vpow2.f32 %v2837_v61 }
0x1112   : > { %v3070_v11 = vpop.f32.mrf.mxu1 }
0x1113   : > { %2382 = vrot.lane.b32.xlu1 %v2378_v20, %s3337_s14  ;;  %v2839_v3 = vmul.f32 -1.442695, %v2364_v0 }
0x1114   : > { %v2360_v9 = vpop.f32.mrf.mxu1 }
0x1115   : > { %v2379_v23 = vadd.f32 %v2360_v9, %v3616_v52  ;;  %v2365_v2 = vadd.f32 %v2360_v9, %v3544_v46  ;;  %3277 = vpow2.f32 %v2839_v3 }
0x1116   : > { %v3071_v53 = vpop.f32.mrf.mxu1 }
0x1117   : > { %2384 = vrot.lane.b32.xlu0 %v2379_v23, %s3337_s14  ;;  %v2840_v14 = vmul.f32 -1.442695, %v2365_v2 }
0x1119   : > { %3279 = vpow2.f32 %v2840_v14 }
0x111a   : > { %v3274_v27 = vpop.eup %3273 }
0x111b   : > { %v2254_v57 = vadd.f32 1.0, %v3274_v27 }
0x111d   : > { %3281 = vrcp.f32 %v2254_v57 }
0x111e   : > { %v3276_v40 = vpop.eup %3275 }
0x111f   : > { %v2255_v50 = vadd.f32 1.0, %v3276_v40 }
0x1121   : > { %3283 = vrcp.f32 %v2255_v50 }
0x1122   : > { %v3278_v8 = vpop.eup %3277 }
0x1123   : > { %v2372_v1 = vadd.f32 1.0, %v3278_v8 }
0x1125   : > { %3285 = vrcp.f32 %v2372_v1 }
0x1126   : > { %v3280_v37 = vpop.eup %3279 }
0x1127   : > { %v2373_v17 = vadd.f32 1.0, %v3280_v37 }
0x1129   : > { %3287 = vrcp.f32 %v2373_v17 }
0x112a   : > { %v3282_v25 = vpop.eup %3281 }
0x112b   : > { %v2284_v53 = vsub.f32 1.0, %v3282_v25  ;;  %v2296_v33 = vmul.f32 %v3282_v25, %v4134_v45 }
0x112e   : > { %v3284_v6 = vpop.eup %3283 }
0x112f   : > { %v2285_v61 = vsub.f32 1.0, %v3284_v6  ;;  %v2297_v2 = vmul.f32 %v3284_v6, %v4137_v55 }
0x1132   : > { %v4184_v34 = vpop.eup %3285 }
0x1133   : > { %v2402_v57 = vsub.f32 1.0, %v4184_v34  ;;  %v2414_v17 = vmul.f32 %v4184_v34, %v4148_v28 }
0x1136   : > { %v4189_v63 = vpop.eup %3287 }
0x117d   : > { %v2265_v58 = vpop.permute.xlu1 %2264 }
0x117e   : > { %v2270_v30 = vmul.f32 %v3282_v25, %v2265_v58  ;;  %v2403_v25 = vsub.f32 1.0, %v4189_v63 }
0x1180   : > { %2274 = vrot.lane.b32.xlu1 %v2270_v30, %s3337_s14 }
0x1181   : > { %v2267_v12 = vpop.permute.xlu0 %2266 }
0x1182   : > { %v2271_v43 = vmul.f32 %v3284_v6, %v2267_v12 }
0x1184   : > { %2276 = vrot.lane.b32.xlu0 %v2271_v43, %s3337_s14 }
0x1185   : > { %v2383_v31 = vpop.permute.xlu1 %2382 }
0x1186   : > { %v2388_v15 = vmul.f32 %v4184_v34, %v2383_v31 }
0x1188   : > { %2392 = vrot.lane.b32.xlu1 %v2388_v15, %s3337_s14 }
0x1189   : > { %v2385_v62 = vpop.permute.xlu0 %2384 }
0x118a   : > { %v2389_v5 = vmul.f32 %v4189_v63, %v2385_v62 }
0x118c   : > { %2303 = vperm.xlu1 %3104, %v2300_v51   ;;  %2394 = vrot.lane.b32.xlu0 %v2389_v5, %s3337_s14 }
0x1190   : > { %2421 = vperm.xlu1 %3104, %v2418_v10   ;;  %2306 = vperm.xlu0 %3103, %v2301_v35  }
0x1194   : > { %2424 = vperm.xlu0 %3103, %v2419_v16  }
0x11f2   : > { %v2275_v4 = vpop.permute.xlu1 %2274 }
0x11f3   : > { %v2280_v19 = vadd.f32 %v2275_v4, %v3605_v32 }
0x11f5   : > { %3289 = vtanh.f32 %v2280_v19 }
0x11f6   : > { %v2277_v22 = vpop.permute.xlu0 %2276 }
0x11f7   : > { %v2281_v29 = vadd.f32 %v2277_v22, %v3614_v48 }
0x11f9   : > { %3291 = vtanh.f32 %v2281_v29 }
0x11fa   : > { %v2393_v7 = vpop.permute.xlu1 %2392 }
0x11fb   : > { %v2398_v13 = vadd.f32 %v2393_v7, %v3533_v39 }
0x11fd   : > { %3293 = vtanh.f32 %v2398_v13 }
0x11fe   : > { %v2395_v36 = vpop.permute.xlu0 %2394 }
0x11ff   : > { %v2399_v44 = vadd.f32 %v2395_v36, %v3544_v46 }
0x1201   : > { %3295 = vtanh.f32 %v2399_v44 }
0x1202   : > { %v3290_v20 = vpop.eup %3289 }
0x1203   : > { %2288 = vrot.lane.b32.xlu1 %v3290_v20, %s3341_s29 }
0x1206   : > { %v3292_v11 = vpop.eup %3291 }
0x1207   : > { %2290 = vrot.lane.b32.xlu0 %v3292_v11, %s3341_s29  ;;  %v2304_v48 = vpop.permute.xlu1 %2303 }
0x1208   : > { %vm2308_vm12 = vcmp.eq.s32.totalorder %v2304_v48, 1 }
0x120a   : > { %v3294_v32 = vpop.eup %3293 }
0x120b   : > { %2406 = vrot.lane.b32.xlu1 %v3294_v32, %s3341_s29  ;;  %v2307_v23 = vpop.permute.xlu0 %2306  ;;  %v2422_v39 = vpop.permute.xlu1 %2421 }
0x120c   : > { %vm2309_vm13 = vcmp.eq.s32.totalorder %v2307_v23, 1  ;;  %vm2426_vm14 = vcmp.eq.s32.totalorder %v2422_v39, 1 }
0x120e   : > { %v3296_v9 = vpop.eup %3295 }
0x120f   : > { %2408 = vrot.lane.b32.xlu0 %v3296_v9, %s3341_s29  ;;  %v2425_v56 = vpop.permute.xlu0 %2424 }
0x1210   : > { %vm2427_vm15 = vcmp.eq.s32.totalorder %v2425_v56, 1 }
0x1275   : > { %v2289_v38 = vpop.permute.xlu1 %2288 }
0x1276   : > { %v2294_v46 = vmul.f32 %v2289_v38, %v2284_v53 }
0x1278   : > { %v2298_v3 = vadd.f32 %v2296_v33, %v2294_v46 }
0x1279   : > { %v2291_v0 = vpop.permute.xlu0 %2290 }
0x127a   : > { %v2295_v14 = vmul.f32 %v2291_v0, %v2285_v61  ;;  %v4212_v50 = vsel %vm2308_vm12, %v2298_v3, %v4134_v45  ;;  %v2415_v45 = vmul.f32 %v4189_v63, %v4151_v18  ;;  %v2431_v0 = vstv %s2430_s9 }
0x127b   : > { %vm2432_vm0 = vcmp.lt.s32.totalorder %v2431_v0, %v4022_v60  ;;  %vm2433_vm4 = vcmp.lt.s32.totalorder %v2431_v0, %v4034_v59 }
0x127c   : > { %v2299_v27 = vadd.f32 %v2297_v2, %v2295_v14 }
0x127d   : > { %v2407_v40 = vpop.permute.xlu1 %2406 }
0x127e   : > { %v4215_v8 = vsel %vm2309_vm13, %v2299_v27, %v4137_v55  ;;  %v2412_v1 = vmul.f32 %v2407_v40, %v2402_v57  ;;  %v2548_v27 = vstv %s3656_s20 }
0x127f   : > { %v2434_v37 = vpack.c.bf16 %v4215_v8, %v4212_v50  ;;  %vm2549_vm3 = vcmp.lt.s32.totalorder %v2548_v27, %v4022_v60  ;;  %vm2550_vm5 = vcmp.lt.s32.totalorder %v2548_v27, %v4034_v59 }
0x1280   : > { %v2416_v30 = vadd.f32 %v2414_v17, %v2412_v1  ;;  %v2536_v1 = vsel %vm2432_vm0, 1, %v3339_v54  ;;  %v2653_v17 = vsel %vm2549_vm3, 1, %v3339_v54 }
0x1281   : > { %2436 = vrot.lane.b32.xlu1 %v2434_v37, %s3341_s29  ;;  %v2409_v58 = vpop.permute.xlu0 %2408 }
0x1282   : > { %v2413_v6 = vmul.f32 %v2409_v58, %v2403_v25  ;;  %v4226_v55 = vsel %vm2426_vm14, %v2416_v30, %v4148_v28  ;;  %v2537_v25 = vsel %vm2433_vm4, 1, %v3339_v54  ;;  %v2654_v58 = vsel %vm2550_vm5, 1, %v3339_v54 }
0x1284   : > { %v2417_v12 = vadd.f32 %v2415_v45, %v2413_v6 }
0x1286   : > { %v4229_v43 = vsel %vm2427_vm15, %v2417_v12, %v4151_v18 }
0x1287   : > { %v2551_v47 = vpack.c.bf16 %v4229_v43, %v4226_v55 }
0x1289   : > { %2553 = vrot.lane.b32.xlu0 %v2551_v47, %s3341_s29 }
0x12f3   : > { %v2437_v34 = vpop.permute.xlu1 %2436 }
0x12f4   : > { %3077 = vmatmul.mubr.msk.bf16.vlgmr.msra.gmra.mxu0 %vm408_vm1, %v2437_v34 }
0x12fb   : > { %v2554_v31 = vpop.permute.xlu0 %2553 }
0x12fc   : > { %3085 = vmatmul.mubr.msk.bf16.vlgmr.msra.gmra.mxu1 %vm408_vm1, %v2554_v31 }
0x13b4   : > { %v2475_v15 = vpop.f32.mrf.mxu0 }
0x13b5   : > { %v2496_v21 = vadd.f32 %v2475_v15, %v3602_v26  ;;  %v2482_v19 = vadd.f32 %v2475_v15, %v3600_v24 }
0x13b6   : > { %v3078_v63 = vpop.f32.mrf.mxu0 }
0x13b7   : > { %2500 = vrot.lane.b32.xlu1 %v2496_v21, %s3337_s14  ;;  %v2842_v22 = vmul.f32 -1.442695, %v2482_v19 }
0x13b8   : > { %v2478_v28 = vpop.f32.mrf.mxu0 }
0x13b9   : > { %v2497_v18 = vadd.f32 %v2478_v28, %v3602_v26  ;;  %v2483_v26 = vadd.f32 %v2478_v28, %v3611_v41  ;;  %3297 = vpow2.f32 %v2842_v22 }
0x13ba   : > { %v3079_v62 = vpop.f32.mrf.mxu0 }
0x13bb   : > { %2502 = vrot.lane.b32.xlu0 %v2497_v18, %s3337_s14  ;;  %v2843_v29 = vmul.f32 -1.442695, %v2483_v26 }
0x13bc   : > { %v2592_v51 = vpop.f32.mrf.mxu1 }
0x13bd   : > { %v2613_v5 = vadd.f32 %v2592_v51, %v3616_v52  ;;  %v2599_v7 = vadd.f32 %v2592_v51, %v3538_v42  ;;  %3299 = vpow2.f32 %v2843_v29 }
0x13be   : > { %v3086_v10 = vpop.f32.mrf.mxu1 }
0x13bf   : > { %2617 = vrot.lane.b32.xlu1 %v2613_v5, %s3337_s14  ;;  %v2845_v13 = vmul.f32 -1.442695, %v2599_v7 }
0x13c0   : > { %v2595_v35 = vpop.f32.mrf.mxu1 }
0x13c1   : > { %v2614_v16 = vadd.f32 %v2595_v35, %v3616_v52  ;;  %v2600_v36 = vadd.f32 %v2595_v35, %v3549_v49  ;;  %3301 = vpow2.f32 %v2845_v13 }
0x13c2   : > { %v3087_v4 = vpop.f32.mrf.mxu1 }
0x13c3   : > { %2619 = vrot.lane.b32.xlu0 %v2614_v16, %s3337_s14  ;;  %v2846_v44 = vmul.f32 -1.442695, %v2600_v36 }
0x13c5   : > { %3303 = vpow2.f32 %v2846_v44 }
0x13c6   : > { %v3298_v52 = vpop.eup %3297 }
0x13c7   : > { %v2490_v20 = vadd.f32 1.0, %v3298_v52 }
0x13c9   : > { %3305 = vrcp.f32 %v2490_v20 }
0x13ca   : > { %v3300_v11 = vpop.eup %3299 }
0x13cb   : > { %v2491_v32 = vadd.f32 1.0, %v3300_v11 }
0x13cd   : > { %3307 = vrcp.f32 %v2491_v32 }
0x13ce   : > { %v3302_v9 = vpop.eup %3301 }
0x13cf   : > { %v2607_v48 = vadd.f32 1.0, %v3302_v9 }
0x13d1   : > { %3309 = vrcp.f32 %v2607_v48 }
0x13d2   : > { %v3304_v23 = vpop.eup %3303 }
0x13d3   : > { %v2608_v39 = vadd.f32 1.0, %v3304_v23 }
0x13d5   : > { %3311 = vrcp.f32 %v2608_v39 }
0x13d6   : > { %v3306_v53 = vpop.eup %3305 }
0x13d7   : > { %v2520_v63 = vsub.f32 1.0, %v3306_v53 }
0x13da   : > { %v3308_v46 = vpop.eup %3307 }
0x13db   : > { %v2521_v5 = vsub.f32 1.0, %v3308_v46  ;;  %v2533_v35 = vmul.f32 %v3308_v46, %v4215_v8 }
0x13de   : > { %v4251_v3 = vpop.eup %3309 }
0x13df   : > { %v2637_v22 = vsub.f32 1.0, %v4251_v3  ;;  %v2649_v29 = vmul.f32 %v4251_v3, %v4226_v55 }
0x13e2   : > { %v4257_v57 = vpop.eup %3311 }
0x13e3   : > { %v2638_v44 = vsub.f32 1.0, %v4257_v57  ;;  %v2650_v52 = vmul.f32 %v4257_v57, %v4229_v43 }
0x1429   : > { %v2501_v56 = vpop.permute.xlu1 %2500 }
0x142a   : > { %v2506_v38 = vmul.f32 %v3306_v53, %v2501_v56 }
0x142c   : > { %2510 = vrot.lane.b32.xlu1 %v2506_v38, %s3337_s14 }
0x142d   : > { %v2503_v33 = vpop.permute.xlu0 %2502 }
0x142e   : > { %v2507_v61 = vmul.f32 %v3308_v46, %v2503_v33 }
0x1430   : > { %2512 = vrot.lane.b32.xlu0 %v2507_v61, %s3337_s14 }
0x1431   : > { %v2618_v2 = vpop.permute.xlu1 %2617 }
0x1432   : > { %v2623_v14 = vmul.f32 %v4251_v3, %v2618_v2 }
0x1434   : > { %2627 = vrot.lane.b32.xlu1 %v2623_v14, %s3337_s14 }
0x1435   : > { %v2620_v40 = vpop.permute.xlu0 %2619 }
0x1436   : > { %v2624_v37 = vmul.f32 %v4257_v57, %v2620_v40 }
0x1438   : > { %2539 = vperm.xlu1 %3104, %v2536_v1   ;;  %2629 = vrot.lane.b32.xlu0 %v2624_v37, %s3337_s14 }
0x143c   : > { %2656 = vperm.xlu1 %3104, %v2653_v17   ;;  %2542 = vperm.xlu0 %3103, %v2537_v25  }
0x1440   : > { %2659 = vperm.xlu0 %3103, %v2654_v58  }
0x149e   : > { %v2511_v30 = vpop.permute.xlu1 %2510 }
0x149f   : > { %v2516_v45 = vadd.f32 %v2511_v30, %v3600_v24 }
0x14a1   : > { %3313 = vtanh.f32 %v2516_v45 }
0x14a2   : > { %v2513_v60 = vpop.permute.xlu0 %2512 }
0x14a3   : > { %v2517_v6 = vadd.f32 %v2513_v60, %v3611_v41 }
0x14a5   : > { %3315 = vtanh.f32 %v2517_v6 }
0x14a6   : > { %v2628_v12 = vpop.permute.xlu1 %2627 }
0x14a7   : > { %v2633_v47 = vadd.f32 %v2628_v12, %v3538_v42 }
0x14a9   : > { %3317 = vtanh.f32 %v2633_v47 }
0x14aa   : > { %v2630_v34 = vpop.permute.xlu0 %2629 }
0x14ab   : > { %v2634_v59 = vadd.f32 %v2630_v34, %v3549_v49  ;;  %v2532_v49 = vmul.f32 %v3306_v53, %v4212_v50 }
0x14ad   : > { %3319 = vtanh.f32 %v2634_v59 }
0x14ae   : > { %v3314_v31 = vpop.eup %3313 }
0x14af   : > { %2524 = vrot.lane.b32.xlu1 %v3314_v31, %s3341_s29 }
0x14b2   : > { %v3316_v54 = vpop.eup %3315 }
0x14b3   : > { %2526 = vrot.lane.b32.xlu0 %v3316_v54, %s3341_s29  ;;  %v2540_v41 = vpop.permute.xlu1 %2539 }
0x14b4   : > { %vm2544_vm6 = vcmp.eq.s32.totalorder %v2540_v41, 1 }
0x14b6   : > { %v3318_v24 = vpop.eup %3317 }
0x14b7   : > { %2641 = vrot.lane.b32.xlu1 %v3318_v24, %s3341_s29  ;;  %v2543_v21 = vpop.permute.xlu0 %2542  ;;  %v2657_v42 = vpop.permute.xlu1 %2656 }
0x14b8   : > { %vm2545_vm7 = vcmp.eq.s32.totalorder %v2543_v21, 1  ;;  %vm2661_vm8 = vcmp.eq.s32.totalorder %v2657_v42, 1 }
0x14ba   : > { %v3320_v15 = vpop.eup %3319 }
0x14bb   : > { %2643 = vrot.lane.b32.xlu0 %v3320_v15, %s3341_s29  ;;  %v2660_v28 = vpop.permute.xlu0 %2659 }
0x14bc   : > { %vm2662_vm2 = vcmp.eq.s32.totalorder %v2660_v28, 1 }
0x1521   : > { %v2525_v18 = vpop.permute.xlu1 %2524 }
0x1522   : > { %v2530_v62 = vmul.f32 %v2525_v18, %v2520_v63 }
0x1524   : > { %v2534_v51 = vadd.f32 %v2532_v49, %v2530_v62 }
0x1525   : > { %v2527_v10 = vpop.permute.xlu0 %2526 }
0x1526   : > { %v2531_v16 = vmul.f32 %v2527_v10, %v2521_v5  ;;  %v2546_v4 = vsel %vm2544_vm6, %v2534_v51, %v4212_v50 }
0x1527   : > { %2667 = vrot.lane.b32.xlu1 %v2546_v4, %s3341_s29 }
0x1528   : > { %v2535_v19 = vadd.f32 %v2533_v35, %v2531_v16 }
0x1529   : > { %v2642_v26 = vpop.permute.xlu1 %2641 }
0x152a   : > { %v2647_v7 = vmul.f32 %v2642_v26, %v2637_v22  ;;  %v2547_v13 = vsel %vm2545_vm7, %v2535_v19, %v4215_v8 }
0x152b   : > { %2669 = vrot.lane.b32.xlu0 %v2547_v13, %s3341_s29 }
0x152c   : > { %v2651_v36 = vadd.f32 %v2649_v29, %v2647_v7 }
0x152d   : > { %v2644_v50 = vpop.permute.xlu0 %2643 }
0x152e   : > { %v2648_v20 = vmul.f32 %v2644_v50, %v2638_v44  ;;  %v2663_v11 = vsel %vm2661_vm8, %v2651_v36, %v4226_v55 }
0x152f   : > { %2677 = vrot.lane.b32.xlu1 %v2663_v11, %s3341_s29 }
0x1530   : > { %v2652_v32 = vadd.f32 %v2650_v52, %v2648_v20 }
0x1532   : > { %v2664_v9 = vsel %vm2662_vm2, %v2652_v32, %v4229_v43 }
0x1533   : > { %2679 = vrot.lane.b32.xlu0 %v2664_v9, %s3341_s29 }
0x1599   : > { %v2668_v8 = vpop.permute.xlu1 %2667 }
0x159a   : > { %2673 = vst.msk [vmem:[#allocation2] sm:$0xff] %vm408_vm1, %v2668_v8 }
0x159d   : > { %v2670_v48 = vpop.permute.xlu0 %2669 }
0x159e   : > { %2674 = vst.msk [vmem:[#allocation2 + $0x8] sm:$0xff] %vm408_vm1, %v2670_v48 }
0x15a1   : > { %v2678_v23 = vpop.permute.xlu1 %2677 }
0x15a2   : > { %2683 = vst.msk [vmem:[#allocation3] sm:$0xff] %vm408_vm1, %v2678_v23  ;;  %2688 = sbr.rel (%p2847_p6) target bundleno = 5545 (0x15a9), region = 56 }
0x15a5   : > { %v2680_v39 = vpop.permute.xlu0 %2679 }
0x15a6   : > { %2684 = vst.msk [vmem:[#allocation3 + $0x8] sm:$0xff] %vm408_vm1, %v2680_v39 }
0x15a7   : > { %2689 = vst.msk [vmem:[%s4323_s7] sm:$0xff] %vm408_vm1, %v2668_v8  ;;  %2690 = vst.msk [vmem:[%s4323_s7 + $0x8] sm:$0xff] %vm408_vm1, %v2670_v48 }
0x15a8   : > { %2848 = vst.msk [vmem:[%s4323_s7 + $0x10] sm:$0xff] %vm408_vm1, %v2678_v23  ;;  %2849 = vst.msk [vmem:[%s4323_s7 + $0x18] sm:$0xff] %vm408_vm1, %v2680_v39 }
0x15a9 PF: > { %s17_s24 = sadd.s32 1, %s3333_s24  }
0x15aa   : > { %p14_p7 = scmp.ge.s32.totalorder %s17_s24, 4  }
0x15ac   :  { %16 = sbr.rel (!%p14_p7) target bundleno = 1 (0x1), region = 90 }

</bundles_post_ra>
